<compile_context>
chip_gen: v6e
topology: v6e:2x2x1
jax: 0.10.0
libtpu: 0.0.40
codegen_flags: <defaults>
</compile_context>

<pallas_src>
import functools

import numpy as np
import jax
import jax.numpy as jnp
from jax import lax
from jax.experimental import pallas as pl
from jax.experimental.pallas import tpu as pltpu

N_PAD = 32            # padded node count (multiple of 8 sublanes)
E_PAD = 128           # padded edge count (lane-dense edge rows)
G_PAD = 8             # padded graph-row count for the pooled block
LANES = 128           # lane width of the packed per-layer output slab
SLAB_ROWS = N_PAD + G_PAD


# ----------------------------------------------------------------------------
# In-kernel helpers (traced inside the fused layer kernels)
# ----------------------------------------------------------------------------
def _build_adjacency(src_ref, dst_ref, evalid_ref, nvalid_ref):
    """Dense D^-1/2 (A+I) D^-1/2 built from the (1,E) edge lists in-kernel."""
    f32, bf16 = jnp.float32, jnp.bfloat16
    n, e = N_PAD, E_PAD
    evalid = evalid_ref[...] != 0                                   # (1, e)
    nvalid = nvalid_ref[...] != 0                                   # (1, n)
    nvalid_f = nvalid.astype(f32)

    rows_ne = lax.broadcasted_iota(jnp.int32, (n, e), 0)
    dmask = (rows_ne == dst_ref[...]) & evalid                      # (n, e): dst[e]==i
    smask = (rows_ne == src_ref[...]) & evalid                      # (n, e): src[e]==j
    dmask_f = dmask.astype(f32)
    smask_f = smask.astype(f32)

    # adj[i, j] = 1 if any valid edge j->i (duplicates clamped == coalesce)
    adj = lax.dot_general(dmask_f, smask_f, (((1,), (1,)), ((), ())),
                          preferred_element_type=f32)
    adj = jnp.minimum(adj, 1.0)
    rr = lax.broadcasted_iota(jnp.int32, (n, n), 0)
    cc = lax.broadcasted_iota(jnp.int32, (n, n), 1)
    adj = jnp.maximum(adj, jnp.where(rr == cc, 1.0, 0.0) * nvalid_f)  # self loops

    deg = jnp.sum(adj, axis=1, keepdims=True)                       # (n, 1)
    dinv = jnp.where(deg > 0.0, lax.rsqrt(deg), 0.0)
    return adj.astype(bf16), dinv, dmask, smask, evalid, nvalid


def _remap_features(cluster_ref, nscore_ref, xp_ref, in_dim):
    """new_x = M @ x_prev with M[i,j] = [cluster[j]==i] * node_score[j] (f32)."""
    rows = lax.broadcasted_iota(jnp.int32, (N_PAD, N_PAD), 0)
    m = jnp.where(rows == cluster_ref[...], nscore_ref[...], 0.0)
    return jnp.dot(m, xp_ref[0:N_PAD, 0:in_dim],
                   preferred_element_type=jnp.float32)


def _gnn_block(x_in, adj16, dinv, w1_ref, b1_ref, w2_ref, b2_ref,
               wl1_ref, wl2_ref, bl_ref, final_relu):
    """relu(gcn1) -> relu(gcn2) -> lin(cat(x1,x2)) [-> relu]; out is 128 lanes."""
    f32, bf16 = jnp.float32, jnp.bfloat16

    def gcn(y, w_ref, b_ref):
        h = jnp.dot(y.astype(bf16), w_ref[...].astype(bf16),
                    preferred_element_type=f32)
        h = jnp.dot(adj16, (dinv * h).astype(bf16), preferred_element_type=f32)
        return dinv * h + b_ref[...]

    x1 = jnp.maximum(gcn(x_in, w1_ref, b1_ref), 0.0)
    x2 = jnp.maximum(gcn(x1, w2_ref, b2_ref), 0.0)
    out = (jnp.dot(x1.astype(bf16), wl1_ref[...].astype(bf16),
                   preferred_element_type=f32)
           + jnp.dot(x2.astype(bf16), wl2_ref[...].astype(bf16),
                     preferred_element_type=f32)
           + bl_ref[...])
    if final_relu:
        out = jnp.maximum(out, 0.0)
    return out                                                       # (N_PAD, 128)


def _mean_pool(out, batch_ref, nvalid):
    """global_mean_pool as a tiny built-in P matrix (G_PAD rows)."""
    f32 = jnp.float32
    g_rows = lax.broadcasted_iota(jnp.int32, (G_PAD, N_PAD), 0)
    pm = ((g_rows == batch_ref[...]) & nvalid).astype(f32)
    cnt = jnp.maximum(jnp.sum(pm, axis=1, keepdims=True), 1.0)
    return jnp.dot(pm / cnt, out, preferred_element_type=f32)        # (G_PAD, 128)


def _edge_scores(out, dmask, smask, evalid, pw_ref, pb_ref):
    """EdgePooling scores: lin(cat(x[src],x[dst])) -> softmax grouped by dst +0.5."""
    f32, bf16 = jnp.float32, jnp.bfloat16
    neg = jnp.float32(-1e30)
    dmask_f = dmask.astype(f32)
    smask_f = smask.astype(f32)

    s2 = jnp.dot(out.astype(bf16), pw_ref[...].astype(bf16),
                 preferred_element_type=f32)                         # (n, 2)
    raw = (jnp.sum(smask_f * s2[:, 0:1], axis=0, keepdims=True)
           + jnp.sum(dmask_f * s2[:, 1:2], axis=0, keepdims=True)
           + pb_ref[...])                                            # (1, e)
    raw_m = jnp.where(evalid, raw, neg)
    gmax = jnp.max(jnp.where(dmask, raw, neg), axis=1, keepdims=True)    # (n, 1)
    gmax_e = jnp.sum(dmask_f * gmax, axis=0, keepdims=True)              # (1, e)
    ex = jnp.exp(raw_m - jnp.where(evalid, gmax_e, 0.0))
    den = jnp.sum(jnp.where(dmask, ex, 0.0), axis=1, keepdims=True)      # (n, 1)
    den_e = jnp.sum(dmask_f * den, axis=0, keepdims=True)                # (1, e)
    score = ex / jnp.where(den_e > 0.0, den_e, 1.0) + 0.5
    # TODO(synk): ties sorted by lower edge index; torch.argsort(descending) may differ.
    negkey = jnp.where(evalid, -score, jnp.float32(1e30))
    return score, negkey


# ----------------------------------------------------------------------------
# Fused per-layer kernel: remap + adjacency + GCNx2 + lin + pool + edge scores
# ----------------------------------------------------------------------------
def _layer_kernel(*refs, in_dim, use_cluster):
    idx = 2 if use_cluster else 0
    (xp_ref, src_ref, dst_ref, evalid_ref, nvalid_ref, batch_ref,
     w1_ref, b1_ref, w2_ref, b2_ref, wl1_ref, wl2_ref, bl_ref,
     pw_ref, pb_ref, slab_ref, escore_ref, negkey_ref) = refs[idx:]

    adj16, dinv, dmask, smask, evalid, nvalid = _build_adjacency(
        src_ref, dst_ref, evalid_ref, nvalid_ref)

    if use_cluster:
        x_in = _remap_features(refs[0], refs[1], xp_ref, in_dim)
    else:
        x_in = xp_ref[0:N_PAD, 0:in_dim]          # raw features (zero padded rows)

    out = _gnn_block(x_in, adj16, dinv, w1_ref, b1_ref, w2_ref, b2_ref,
                     wl1_ref, wl2_ref, bl_ref, final_relu=True)
    pooled = _mean_pool(out, batch_ref, nvalid)
    score, negkey = _edge_scores(out, dmask, smask, evalid, pw_ref, pb_ref)

    escore_ref[...] = score
    negkey_ref[...] = negkey
    # Single lane-dense slab store: node features then pooled rows.
    slab_ref[...] = jnp.concatenate([out, pooled], axis=0)


def gnn_layer(cluster, nscore, x_prev, src, dst, evalid, nvalid, batch_p,
              blk, pool, *, use_cluster):
    in_dim = blk["w1"].shape[0]
    kernel = functools.partial(_layer_kernel, in_dim=in_dim,
                               use_cluster=use_cluster)
    args = []
    if use_cluster:
        args += [cluster, nscore]
    args += [x_prev, src, dst, evalid, nvalid, batch_p,
             blk["w1"], blk["b1"], blk["w2"], blk["b2"],
             blk["wl1"], blk["wl2"], blk["bl"], pool["w"], pool["b"]]
    return pl.pallas_call(
        kernel,
        out_shape=(
            jax.ShapeDtypeStruct((SLAB_ROWS, LANES), jnp.float32),   # x_out + pooled
            jax.ShapeDtypeStruct((1, E_PAD), jnp.float32),           # edge scores
            jax.ShapeDtypeStruct((1, E_PAD), jnp.float32),           # argsort key
        ),
    )(*args)


# ----------------------------------------------------------------------------
# Final layer: embed_final block + pooling + fused JumpingKnowledge head
# ----------------------------------------------------------------------------
def _final_kernel(*refs, hidden, num_graphs, n_prev):
    f32, bf16 = jnp.float32, jnp.bfloat16
    cluster_ref, nscore_ref = refs[0], refs[1]
    slab_refs = refs[2:2 + n_prev]
    base = 2 + n_prev
    (src_ref, dst_ref, evalid_ref, nvalid_ref, batch_ref) = refs[base:base + 5]
    (w1_ref, b1_ref, w2_ref, b2_ref, wl1_ref, wl2_ref, bl_ref) = refs[base + 5:base + 12]
    base += 12
    l1_refs = refs[base:base + n_prev + 1]
    l1b_ref, l2w_ref, l2b_ref = refs[base + n_prev + 1:base + n_prev + 4]
    out_ref = refs[base + n_prev + 4]

    adj16, dinv, _, _, _, nvalid = _build_adjacency(
        src_ref, dst_ref, evalid_ref, nvalid_ref)
    x_in = _remap_features(cluster_ref, nscore_ref, slab_refs[-1], hidden)
    out = _gnn_block(x_in, adj16, dinv, w1_ref, b1_ref, w2_ref, b2_ref,
                     wl1_ref, wl2_ref, bl_ref, final_relu=False)
    pooled = _mean_pool(out, batch_ref, nvalid)[0:num_graphs, 0:hidden]   # (G, H)

    # JumpingKnowledge(cat) -> lin1 -> relu -> lin2 -> log_softmax (concat-free)
    h = l1b_ref[...]
    for k in range(n_prev):
        pk = slab_refs[k][N_PAD:N_PAD + num_graphs, 0:hidden]
        h = h + jnp.dot(pk.astype(bf16), l1_refs[k][...].astype(bf16),
                        preferred_element_type=f32)
    h = h + jnp.dot(pooled.astype(bf16), l1_refs[n_prev][...].astype(bf16),
                    preferred_element_type=f32)
    h = jnp.maximum(h, 0.0)
    # TODO(synk): F.dropout(p=0.5) is the eval-mode identity here.
    o = jnp.dot(h.astype(bf16), l2w_ref[...].astype(bf16),
                preferred_element_type=f32) + l2b_ref[...]
    o = o - jnp.max(o, axis=-1, keepdims=True)
    out_ref[...] = o - jnp.log(jnp.sum(jnp.exp(o), axis=-1, keepdims=True))


def final_layer(cluster, nscore, slabs, src, dst, evalid, nvalid, batch_p,
                blk, params, num_graphs):
    hidden = blk["w1"].shape[1]
    num_classes = params["lin2_w"].shape[1]
    n_prev = len(slabs)
    kernel = functools.partial(_final_kernel, hidden=hidden,
                               num_graphs=num_graphs, n_prev=n_prev)
    args = ([cluster, nscore] + list(slabs)
            + [src, dst, evalid, nvalid, batch_p,
               blk["w1"], blk["b1"], blk["w2"], blk["b2"],
               blk["wl1"], blk["wl2"], blk["bl"]]
            + list(params["lin1_chunks"])
            + [params["lin1_b"], params["lin2_w"], params["lin2_b"]])
    return pl.pallas_call(
        kernel,
        out_shape=jax.ShapeDtypeStruct((num_graphs, num_classes), jnp.float32),
    )(*args)


# ----------------------------------------------------------------------------
# Greedy edge matching (EdgePooling.__merge_edges__) as a scalar SMEM kernel.
# Emits everything the next layer needs: cluster map, per-node merge scores
# (columns of M), new batch / validity vectors, remapped (uncoalesced) edges.
# ----------------------------------------------------------------------------
def _merge_kernel(order_ref, escore_ref, src_ref, dst_ref, evalid_ref,
                  nvalid_ref, batch_ref,
                  cluster_ref, nscore_ref, nbatch_ref, nnvalid_ref,
                  nsrc_ref, ndst_ref, rem_ref):
    n = nvalid_ref.shape[1]
    e = src_ref.shape[1]

    def init_body(k, c):
        v = nvalid_ref[0, k]
        rem_ref[0, k] = v
        cluster_ref[0, k] = 0
        nscore_ref[0, k] = v.astype(jnp.float32)   # invalid cols of M -> 0
        nbatch_ref[0, k] = 0
        nnvalid_ref[0, k] = 0
        return c

    lax.fori_loop(0, n, init_body, 0)

    def edge_body(k, i):
        eidx = order_ref[0, k]
        s = src_ref[0, eidx]
        t = dst_ref[0, eidx]
        ok = ((evalid_ref[0, eidx] == 1)
              & (rem_ref[0, s] == 1) & (rem_ref[0, t] == 1))

        @pl.when(ok)
        def _():
            sc = escore_ref[0, eidx]
            cluster_ref[0, s] = i
            nscore_ref[0, s] = sc
            rem_ref[0, s] = 0
            nbatch_ref[0, i] = batch_ref[0, s]

            @pl.when(s != t)
            def _():
                cluster_ref[0, t] = i
                nscore_ref[0, t] = sc
                rem_ref[0, t] = 0

        return i + ok.astype(jnp.int32)

    i = lax.fori_loop(0, e, edge_body, jnp.int32(0))

    def single_body(k, i):
        ok = rem_ref[0, k] == 1

        @pl.when(ok)
        def _():
            cluster_ref[0, k] = i
            nbatch_ref[0, i] = batch_ref[0, k]
            rem_ref[0, k] = 0

        return i + ok.astype(jnp.int32)

    i = lax.fori_loop(0, n, single_body, i)

    def valid_body(k, c):
        nnvalid_ref[0, k] = (k < i).astype(jnp.int32)
        return c

    lax.fori_loop(0, n, valid_body, 0)

    def remap_body(k, c):
        nsrc_ref[0, k] = cluster_ref[0, src_ref[0, k]]
        ndst_ref[0, k] = cluster_ref[0, dst_ref[0, k]]
        return c

    lax.fori_loop(0, e, remap_body, 0)


def merge_step(order, escore, src, dst, evalid, nvalid, batch_p):
    smem = pl.BlockSpec(memory_space=pltpu.MemorySpace.SMEM)
    n = nvalid.shape[1]
    e = src.shape[1]
    return pl.pallas_call(
        _merge_kernel,
        in_specs=[smem] * 7,
        out_specs=(smem,) * 6,
        out_shape=(
            jax.ShapeDtypeStruct((1, n), jnp.int32),    # cluster id per old node
            jax.ShapeDtypeStruct((1, n), jnp.float32),  # per-node merge score (M cols)
            jax.ShapeDtypeStruct((1, n), jnp.int32),    # new batch per cluster
            jax.ShapeDtypeStruct((1, n), jnp.int32),    # new node validity
            jax.ShapeDtypeStruct((1, e), jnp.int32),    # remapped src
            jax.ShapeDtypeStruct((1, e), jnp.int32),    # remapped dst
        ),
        scratch_shapes=[pltpu.SMEM((1, n), jnp.int32)],
    )(order, escore, src, dst, evalid, nvalid, batch_p)


# ----------------------------------------------------------------------------
# Forward pass (fixed padded shapes; no host round-trips)
# ----------------------------------------------------------------------------
@functools.partial(jax.jit, static_argnums=(4,))
def edgepool_forward(params, x, edge_index, batch, num_graphs):
    n_real, f_dim = x.shape
    e_real = edge_index.shape[1]
    hidden = params["conv1"]["w1"].shape[1]
    assert n_real <= N_PAD and e_real <= E_PAD
    assert num_graphs <= G_PAD and hidden <= LANES

    x_pad = jnp.zeros((N_PAD, f_dim), jnp.float32).at[:n_real].set(
        x.astype(jnp.float32))
    src = jnp.zeros((1, E_PAD), jnp.int32).at[0, :e_real].set(
        edge_index[0].astype(jnp.int32))
    dst = jnp.zeros((1, E_PAD), jnp.int32).at[0, :e_real].set(
        edge_index[1].astype(jnp.int32))
    evalid = (jnp.arange(E_PAD, dtype=jnp.int32) < e_real).astype(jnp.int32)[None, :]
    nvalid = (jnp.arange(N_PAD, dtype=jnp.int32) < n_real).astype(jnp.int32)[None, :]
    batch_p = jnp.zeros((1, N_PAD), jnp.int32).at[0, :n_real].set(
        batch.astype(jnp.int32))

    blocks = [params["conv1"]] + list(params["convs"]) + [params["embed_final"]]
    pools = [params["pool1"]] + list(params["pools"])

    cluster = nscore = None
    x_slab = x_pad
    slabs = []
    for li in range(len(blocks) - 1):
        slab, escore, negkey = gnn_layer(
            cluster, nscore, x_slab, src, dst, evalid, nvalid, batch_p,
            blocks[li], pools[li], use_cluster=(li > 0))
        slabs.append(slab)
        # The only per-layer XLA op: data-dependent edge ordering for the greedy merge.
        order = jnp.argsort(negkey, axis=1).astype(jnp.int32)
        cluster, nscore, batch_p, nvalid, src, dst = merge_step(
            order, escore, src, dst, evalid, nvalid, batch_p)
        x_slab = slab

    return final_layer(cluster, nscore, slabs, src, dst, evalid, nvalid,
                       batch_p, blocks[-1], params, num_graphs)


# ----------------------------------------------------------------------------
# Parameter init (kernel-friendly layout; lin/pool weights padded to 128 lanes)
# ----------------------------------------------------------------------------
def init_params(key, num_features, hidden, num_classes, num_layers):
    keys = iter(jax.random.split(key, 8 * num_layers + 16))

    def dense(fan_in, fan_out):
        k1, k2 = jax.random.split(next(keys))
        scale = 1.0 / np.sqrt(fan_in)
        w = jax.random.uniform(k1, (fan_in, fan_out), jnp.float32, -scale, scale)
        b = jax.random.uniform(k2, (fan_out,), jnp.float32, -scale, scale)
        return w, b

    pad = LANES - hidden

    def gnn_block_params(cin, h):
        w1, b1 = dense(cin, h)
        w2, b2 = dense(h, h)
        wl, bl = dense(2 * h, h)
        z = jnp.zeros((h, pad), jnp.float32)
        return dict(
            w1=w1, b1=b1.reshape(1, h), w2=w2, b2=b2.reshape(1, h),
            wl1=jnp.concatenate([wl[:h], z], axis=1),
            wl2=jnp.concatenate([wl[h:], z], axis=1),
            bl=jnp.concatenate([bl.reshape(1, h), jnp.zeros((1, pad), jnp.float32)], axis=1),
        )

    def pool_p(h):
        w, b = dense(2 * h, 1)
        w2col = jnp.concatenate([w[:h], w[h:]], axis=1)                    # (h, 2)
        w2col = jnp.concatenate(
            [w2col, jnp.zeros((LANES - h, 2), jnp.float32)], axis=0)       # (128, 2)
        return dict(w=w2col, b=b.reshape(1, 1))

    params = dict(
        conv1=gnn_block_params(num_features, hidden),
        pool1=pool_p(hidden),
        convs=[gnn_block_params(hidden, hidden) for _ in range(num_layers - 1)],
        pools=[pool_p(hidden) for _ in range(num_layers - 1)],
        embed_final=gnn_block_params(hidden, hidden),
    )
    l1w, l1b = dense((num_layers + 1) * hidden, hidden)
    params["lin1_chunks"] = [l1w[k * hidden:(k + 1) * hidden]
                             for k in range(num_layers + 1)]
    params["lin1_b"] = l1b.reshape(1, hidden)
    l2w, l2b = dense(hidden, num_classes)
    params["lin2_w"] = l2w
    params["lin2_b"] = l2b.reshape(1, num_classes)
    return params


if __name__ == "__main__":
    NUM_FEATURES, HIDDEN, NUM_CLASSES, NUM_LAYERS = 16, 32, 4, 2
    key = jax.random.PRNGKey(0)
    k_param, k_x = jax.random.split(key)
    params = init_params(k_param, NUM_FEATURES, HIDDEN, NUM_CLASSES, NUM_LAYERS)

    # Two ring graphs (12 nodes each) with a couple of chords, symmetric edges.
    nodes_per_graph, num_graphs = 12, 2
    num_nodes = nodes_per_graph * num_graphs
    edges = []
    for g in range(num_graphs):
        off = g * nodes_per_graph
        for i in range(nodes_per_graph):
            j = (i + 1) % nodes_per_graph
            edges.append((off + i, off + j))
            edges.append((off + j, off + i))
        edges.append((off + 0, off + 6))
        edges.append((off + 6, off + 0))
        edges.append((off + 3, off + 9))
        edges.append((off + 9, off + 3))
    edge_index = jnp.asarray(np.array(edges, dtype=np.int32).T)      # (2, 56)
    batch = jnp.asarray(np.repeat(np.arange(num_graphs, dtype=np.int32),
                                  nodes_per_graph))                  # (24,)
    x = jax.random.normal(k_x, (num_nodes, NUM_FEATURES), jnp.float32)

    out = edgepool_forward(params, x, edge_index, batch, num_graphs)
    out = jax.block_until_ready(out)

    assert out.shape == (num_graphs, NUM_CLASSES)
    probs = np.exp(np.asarray(out)).sum(axis=-1)
    assert np.allclose(probs, 1.0, atol=1e-3), probs
    assert np.all(np.isfinite(np.asarray(out)))
    print("KERNEL_OK")
</pallas_src>

<mosaic_0001>
module attributes {stable_mosaic.version = 11 : i64} {
  func.func @_merge_kernel(%arg0: memref<1x128xi32, #tpu.memory_space<smem>>, %arg1: memref<1x128xf32, #tpu.memory_space<smem>>, %arg2: memref<1x128xi32, #tpu.memory_space<smem>>, %arg3: memref<1x128xi32, #tpu.memory_space<smem>>, %arg4: memref<1x128xi32, #tpu.memory_space<smem>>, %arg5: memref<1x32xi32, #tpu.memory_space<smem>>, %arg6: memref<1x32xi32, #tpu.memory_space<smem>>, %arg7: memref<1x32xi32, #tpu.memory_space<smem>>, %arg8: memref<1x32xf32, #tpu.memory_space<smem>>, %arg9: memref<1x32xi32, #tpu.memory_space<smem>>, %arg10: memref<1x32xi32, #tpu.memory_space<smem>>, %arg11: memref<1x128xi32, #tpu.memory_space<smem>>, %arg12: memref<1x128xi32, #tpu.memory_space<smem>>, %arg13: memref<1x32xi32, #tpu.memory_space<smem>>) attributes {dimension_semantics = [], scalar_prefetch = 0 : i64, scratch_operands = 1 : i64, tpu.core_type = #tpu.core_type<tc>} {
    %c0_i32 = arith.constant 0 : i32
    %c32_i32 = arith.constant 32 : i32
    %0 = arith.addi %c0_i32, %c32_i32 : i32
    %c1_i32 = arith.constant 1 : i32
    scf.for %arg14 = %c0_i32 to %0 step %c1_i32  : i32 {
      %c0 = arith.constant 0 : index
      %7 = arith.index_cast %arg14 : i32 to index
      %8 = memref.load %arg5[%c0, %7] : memref<1x32xi32, #tpu.memory_space<smem>>
      %c0_17 = arith.constant 0 : index
      %9 = arith.index_cast %arg14 : i32 to index
      %10 = memref.load %arg13[%c0_17, %9] : memref<1x32xi32, #tpu.memory_space<smem>>
      memref.store %8, %arg13[%c0_17, %9] : memref<1x32xi32, #tpu.memory_space<smem>>
      %c0_i32_18 = arith.constant 0 : i32
      %c0_19 = arith.constant 0 : index
      %11 = arith.index_cast %arg14 : i32 to index
      %12 = memref.load %arg7[%c0_19, %11] : memref<1x32xi32, #tpu.memory_space<smem>>
      memref.store %c0_i32_18, %arg7[%c0_19, %11] : memref<1x32xi32, #tpu.memory_space<smem>>
      %13 = arith.sitofp %8 : i32 to f32
      %c0_20 = arith.constant 0 : index
      %14 = arith.index_cast %arg14 : i32 to index
      %15 = memref.load %arg8[%c0_20, %14] : memref<1x32xf32, #tpu.memory_space<smem>>
      memref.store %13, %arg8[%c0_20, %14] : memref<1x32xf32, #tpu.memory_space<smem>>
      %c0_i32_21 = arith.constant 0 : i32
      %c0_22 = arith.constant 0 : index
      %16 = arith.index_cast %arg14 : i32 to index
      %17 = memref.load %arg9[%c0_22, %16] : memref<1x32xi32, #tpu.memory_space<smem>>
      memref.store %c0_i32_21, %arg9[%c0_22, %16] : memref<1x32xi32, #tpu.memory_space<smem>>
      %c0_i32_23 = arith.constant 0 : i32
      %c0_24 = arith.constant 0 : index
      %18 = arith.index_cast %arg14 : i32 to index
      %19 = memref.load %arg10[%c0_24, %18] : memref<1x32xi32, #tpu.memory_space<smem>>
      memref.store %c0_i32_23, %arg10[%c0_24, %18] : memref<1x32xi32, #tpu.memory_space<smem>>
    }
    %c32_i32_0 = arith.constant 32 : i32
    %c0_i32_1 = arith.constant 0 : i32
    %c0_i32_2 = arith.constant 0 : i32
    %c128_i32 = arith.constant 128 : i32
    %1 = arith.addi %c0_i32_2, %c128_i32 : i32
    %c1_i32_3 = arith.constant 1 : i32
    %2 = scf.for %arg14 = %c0_i32_2 to %1 step %c1_i32_3 iter_args(%arg15 = %c0_i32_1) -> (i32)  : i32 {
      %c0 = arith.constant 0 : index
      %7 = arith.index_cast %arg14 : i32 to index
      %8 = memref.load %arg0[%c0, %7] : memref<1x128xi32, #tpu.memory_space<smem>>
      %c0_17 = arith.constant 0 : index
      %9 = arith.index_cast %8 : i32 to index
      %10 = memref.load %arg2[%c0_17, %9] : memref<1x128xi32, #tpu.memory_space<smem>>
      %c0_18 = arith.constant 0 : index
      %11 = arith.index_cast %8 : i32 to index
      %12 = memref.load %arg3[%c0_18, %11] : memref<1x128xi32, #tpu.memory_space<smem>>
      %c0_19 = arith.constant 0 : index
      %13 = arith.index_cast %8 : i32 to index
      %14 = memref.load %arg4[%c0_19, %13] : memref<1x128xi32, #tpu.memory_space<smem>>
      %c1_i32_20 = arith.constant 1 : i32
      %15 = arith.cmpi eq, %14, %c1_i32_20 : i32
      %c0_21 = arith.constant 0 : index
      %16 = arith.index_cast %10 : i32 to index
      %17 = memref.load %arg13[%c0_21, %16] : memref<1x32xi32, #tpu.memory_space<smem>>
      %c1_i32_22 = arith.constant 1 : i32
      %18 = arith.cmpi eq, %17, %c1_i32_22 : i32
      %19 = arith.andi %15, %18 : i1
      %c0_23 = arith.constant 0 : index
      %20 = arith.index_cast %12 : i32 to index
      %21 = memref.load %arg13[%c0_23, %20] : memref<1x32xi32, #tpu.memory_space<smem>>
      %c1_i32_24 = arith.constant 1 : i32
      %22 = arith.cmpi eq, %21, %c1_i32_24 : i32
      %23 = arith.andi %19, %22 : i1
      %24 = arith.extui %23 : i1 to i32
      %c0_i32_25 = arith.constant 0 : i32
      %25 = arith.cmpi ne, %24, %c0_i32_25 : i32
      scf.if %25 {
        %c0_26 = arith.constant 0 : index
        %28 = arith.index_cast %8 : i32 to index
        %29 = memref.load %arg1[%c0_26, %28] : memref<1x128xf32, #tpu.memory_space<smem>>
        %c0_27 = arith.constant 0 : index
        %30 = arith.index_cast %10 : i32 to index
        %31 = memref.load %arg7[%c0_27, %30] : memref<1x32xi32, #tpu.memory_space<smem>>
        memref.store %arg15, %arg7[%c0_27, %30] : memref<1x32xi32, #tpu.memory_space<smem>>
        %c0_28 = arith.constant 0 : index
        %32 = arith.index_cast %10 : i32 to index
        %33 = memref.load %arg8[%c0_28, %32] : memref<1x32xf32, #tpu.memory_space<smem>>
        memref.store %29, %arg8[%c0_28, %32] : memref<1x32xf32, #tpu.memory_space<smem>>
        %c0_i32_29 = arith.constant 0 : i32
        %c0_30 = arith.constant 0 : index
        %34 = arith.index_cast %10 : i32 to index
        %35 = memref.load %arg13[%c0_30, %34] : memref<1x32xi32, #tpu.memory_space<smem>>
        memref.store %c0_i32_29, %arg13[%c0_30, %34] : memref<1x32xi32, #tpu.memory_space<smem>>
        %c0_31 = arith.constant 0 : index
        %36 = arith.index_cast %10 : i32 to index
        %37 = memref.load %arg6[%c0_31, %36] : memref<1x32xi32, #tpu.memory_space<smem>>
        %c0_32 = arith.constant 0 : index
        %38 = arith.index_cast %arg15 : i32 to index
        %39 = memref.load %arg9[%c0_32, %38] : memref<1x32xi32, #tpu.memory_space<smem>>
        memref.store %37, %arg9[%c0_32, %38] : memref<1x32xi32, #tpu.memory_space<smem>>
        %40 = arith.cmpi ne, %10, %12 : i32
        %41 = arith.extui %40 : i1 to i32
        %c0_i32_33 = arith.constant 0 : i32
        %42 = arith.cmpi ne, %41, %c0_i32_33 : i32
        scf.if %42 {
          %c0_34 = arith.constant 0 : index
          %43 = arith.index_cast %12 : i32 to index
          %44 = memref.load %arg7[%c0_34, %43] : memref<1x32xi32, #tpu.memory_space<smem>>
          memref.store %arg15, %arg7[%c0_34, %43] : memref<1x32xi32, #tpu.memory_space<smem>>
          %c0_35 = arith.constant 0 : index
          %45 = arith.index_cast %12 : i32 to index
          %46 = memref.load %arg8[%c0_35, %45] : memref<1x32xf32, #tpu.memory_space<smem>>
          memref.store %29, %arg8[%c0_35, %45] : memref<1x32xf32, #tpu.memory_space<smem>>
          %c0_i32_36 = arith.constant 0 : i32
          %c0_37 = arith.constant 0 : index
          %47 = arith.index_cast %12 : i32 to index
          %48 = memref.load %arg13[%c0_37, %47] : memref<1x32xi32, #tpu.memory_space<smem>>
          memref.store %c0_i32_36, %arg13[%c0_37, %47] : memref<1x32xi32, #tpu.memory_space<smem>>
        } else {
        }
      } else {
      }
      %26 = arith.extui %23 : i1 to i32
      %27 = arith.addi %arg15, %26 : i32
      scf.yield %27 : i32
    }
    %c128_i32_4 = arith.constant 128 : i32
    %c0_i32_5 = arith.constant 0 : i32
    %c32_i32_6 = arith.constant 32 : i32
    %3 = arith.addi %c0_i32_5, %c32_i32_6 : i32
    %c1_i32_7 = arith.constant 1 : i32
    %4 = scf.for %arg14 = %c0_i32_5 to %3 step %c1_i32_7 iter_args(%arg15 = %2) -> (i32)  : i32 {
      %c0 = arith.constant 0 : index
      %7 = arith.index_cast %arg14 : i32 to index
      %8 = memref.load %arg13[%c0, %7] : memref<1x32xi32, #tpu.memory_space<smem>>
      %c1_i32_17 = arith.constant 1 : i32
      %9 = arith.cmpi eq, %8, %c1_i32_17 : i32
      %10 = arith.extui %9 : i1 to i32
      %c0_i32_18 = arith.constant 0 : i32
      %11 = arith.cmpi ne, %10, %c0_i32_18 : i32
      scf.if %11 {
        %c0_19 = arith.constant 0 : index
        %14 = arith.index_cast %arg14 : i32 to index
        %15 = memref.load %arg7[%c0_19, %14] : memref<1x32xi32, #tpu.memory_space<smem>>
        memref.store %arg15, %arg7[%c0_19, %14] : memref<1x32xi32, #tpu.memory_space<smem>>
        %c0_20 = arith.constant 0 : index
        %16 = arith.index_cast %arg14 : i32 to index
        %17 = memref.load %arg6[%c0_20, %16] : memref<1x32xi32, #tpu.memory_space<smem>>
        %c0_21 = arith.constant 0 : index
        %18 = arith.index_cast %arg15 : i32 to index
        %19 = memref.load %arg9[%c0_21, %18] : memref<1x32xi32, #tpu.memory_space<smem>>
        memref.store %17, %arg9[%c0_21, %18] : memref<1x32xi32, #tpu.memory_space<smem>>
        %c0_i32_22 = arith.constant 0 : i32
        %c0_23 = arith.constant 0 : index
        %20 = arith.index_cast %arg14 : i32 to index
        %21 = memref.load %arg13[%c0_23, %20] : memref<1x32xi32, #tpu.memory_space<smem>>
        memref.store %c0_i32_22, %arg13[%c0_23, %20] : memref<1x32xi32, #tpu.memory_space<smem>>
      } else {
      }
      %12 = arith.extui %9 : i1 to i32
      %13 = arith.addi %arg15, %12 : i32
      scf.yield %13 : i32
    }
    %c32_i32_8 = arith.constant 32 : i32
    %c0_i32_9 = arith.constant 0 : i32
    %c32_i32_10 = arith.constant 32 : i32
    %5 = arith.addi %c0_i32_9, %c32_i32_10 : i32
    %c1_i32_11 = arith.constant 1 : i32
    scf.for %arg14 = %c0_i32_9 to %5 step %c1_i32_11  : i32 {
      %7 = arith.cmpi slt, %arg14, %4 : i32
      %8 = arith.extui %7 : i1 to i32
      %c0 = arith.constant 0 : index
      %9 = arith.index_cast %arg14 : i32 to index
      %10 = memref.load %arg10[%c0, %9] : memref<1x32xi32, #tpu.memory_space<smem>>
      memref.store %8, %arg10[%c0, %9] : memref<1x32xi32, #tpu.memory_space<smem>>
    }
    %c32_i32_12 = arith.constant 32 : i32
    %c0_i32_13 = arith.constant 0 : i32
    %c128_i32_14 = arith.constant 128 : i32
    %6 = arith.addi %c0_i32_13, %c128_i32_14 : i32
    %c1_i32_15 = arith.constant 1 : i32
    scf.for %arg14 = %c0_i32_13 to %6 step %c1_i32_15  : i32 {
      %c0 = arith.constant 0 : index
      %7 = arith.index_cast %arg14 : i32 to index
      %8 = memref.load %arg2[%c0, %7] : memref<1x128xi32, #tpu.memory_space<smem>>
      %c0_17 = arith.constant 0 : index
      %9 = arith.index_cast %8 : i32 to index
      %10 = memref.load %arg7[%c0_17, %9] : memref<1x32xi32, #tpu.memory_space<smem>>
      %c0_18 = arith.constant 0 : index
      %11 = arith.index_cast %arg14 : i32 to index
      %12 = memref.load %arg11[%c0_18, %11] : memref<1x128xi32, #tpu.memory_space<smem>>
      memref.store %10, %arg11[%c0_18, %11] : memref<1x128xi32, #tpu.memory_space<smem>>
      %c0_19 = arith.constant 0 : index
      %13 = arith.index_cast %arg14 : i32 to index
      %14 = memref.load %arg3[%c0_19, %13] : memref<1x128xi32, #tpu.memory_space<smem>>
      %c0_20 = arith.constant 0 : index
      %15 = arith.index_cast %14 : i32 to index
      %16 = memref.load %arg7[%c0_20, %15] : memref<1x32xi32, #tpu.memory_space<smem>>
      %c0_21 = arith.constant 0 : index
      %17 = arith.index_cast %arg14 : i32 to index
      %18 = memref.load %arg12[%c0_21, %17] : memref<1x128xi32, #tpu.memory_space<smem>>
      memref.store %16, %arg12[%c0_21, %17] : memref<1x128xi32, #tpu.memory_space<smem>>
    }
    %c128_i32_16 = arith.constant 128 : i32
    return
  }
}

module attributes {stable_mosaic.version = 11 : i64} {
  func.func @_layer_kernel(%arg0: memref<32x16xf32, #tpu.memory_space<vmem>>, %arg1: memref<1x128xi32, #tpu.memory_space<vmem>>, %arg2: memref<1x128xi32, #tpu.memory_space<vmem>>, %arg3: memref<1x128xi32, #tpu.memory_space<vmem>>, %arg4: memref<1x32xi32, #tpu.memory_space<vmem>>, %arg5: memref<1x32xi32, #tpu.memory_space<vmem>>, %arg6: memref<16x32xf32, #tpu.memory_space<vmem>>, %arg7: memref<1x32xf32, #tpu.memory_space<vmem>>, %arg8: memref<32x32xf32, #tpu.memory_space<vmem>>, %arg9: memref<1x32xf32, #tpu.memory_space<vmem>>, %arg10: memref<32x128xf32, #tpu.memory_space<vmem>>, %arg11: memref<32x128xf32, #tpu.memory_space<vmem>>, %arg12: memref<1x128xf32, #tpu.memory_space<vmem>>, %arg13: memref<128x2xf32, #tpu.memory_space<vmem>>, %arg14: memref<1x1xf32, #tpu.memory_space<vmem>>, %arg15: memref<40x128xf32, #tpu.memory_space<vmem>>, %arg16: memref<1x128xf32, #tpu.memory_space<vmem>>, %arg17: memref<1x128xf32, #tpu.memory_space<vmem>>) attributes {dimension_semantics = [], scalar_prefetch = 0 : i64, scratch_operands = 0 : i64, tpu.core_type = #tpu.core_type<tc>} {
    %c0 = arith.constant 0 : index
    %c0_0 = arith.constant 0 : index
    %0 = vector.load %arg3[%c0, %c0_0] : memref<1x128xi32, #tpu.memory_space<vmem>>, vector<1x128xi32>
    %c0_i32 = arith.constant 0 : i32
    %1 = vector.broadcast %c0_i32 : i32 to vector<1x128xi32>
    %2 = arith.cmpi ne, %0, %1 : vector<1x128xi32>
    %c0_1 = arith.constant 0 : index
    %c0_2 = arith.constant 0 : index
    %3 = vector.load %arg4[%c0_1, %c0_2] : memref<1x32xi32, #tpu.memory_space<vmem>>, vector<1x32xi32>
    %c0_i32_3 = arith.constant 0 : i32
    %4 = vector.broadcast %c0_i32_3 : i32 to vector<1x32xi32>
    %5 = arith.cmpi ne, %3, %4 : vector<1x32xi32>
    %6 = arith.extui %5 : vector<1x32xi1> to vector<1x32xi32>
    %7 = arith.sitofp %6 : vector<1x32xi32> to vector<1x32xf32>
    %8 = tpu.iota {dimensions = array<i32: 0>} : vector<32x128xi32>
    %c0_4 = arith.constant 0 : index
    %c0_5 = arith.constant 0 : index
    %9 = vector.load %arg2[%c0_4, %c0_5] : memref<1x128xi32, #tpu.memory_space<vmem>>, vector<1x128xi32>
    %10 = vector.broadcast %9 : vector<1x128xi32> to vector<32x128xi32>
    %11 = arith.cmpi eq, %8, %10 : vector<32x128xi32>
    %12 = vector.broadcast %2 : vector<1x128xi1> to vector<32x128xi1>
    %13 = arith.andi %11, %12 : vector<32x128xi1>
    %c0_6 = arith.constant 0 : index
    %c0_7 = arith.constant 0 : index
    %14 = vector.load %arg1[%c0_6, %c0_7] : memref<1x128xi32, #tpu.memory_space<vmem>>, vector<1x128xi32>
    %15 = vector.broadcast %14 : vector<1x128xi32> to vector<32x128xi32>
    %16 = arith.cmpi eq, %8, %15 : vector<32x128xi32>
    %17 = vector.broadcast %2 : vector<1x128xi1> to vector<32x128xi1>
    %18 = arith.andi %16, %17 : vector<32x128xi1>
    %19 = arith.extui %13 : vector<32x128xi1> to vector<32x128xi32>
    %20 = arith.sitofp %19 : vector<32x128xi32> to vector<32x128xf32>
    %21 = arith.extui %18 : vector<32x128xi1> to vector<32x128xi32>
    %22 = arith.sitofp %21 : vector<32x128xi32> to vector<32x128xf32>
    %cst = arith.constant dense<0.000000e+00> : vector<32x32xf32>
    %23 = tpu.matmul %20, %22, %cst {dimension_numbers = #tpu.dot_dimension_numbers<[1], [1], [0], [0], [0, 0, 1, 0], [], []>} : vector<32x128xf32>, vector<32x128xf32>, vector<32x32xf32> -> vector<32x32xf32>
    %cst_8 = arith.constant 1.000000e+00 : f32
    %24 = vector.broadcast %cst_8 : f32 to vector<32x32xf32>
    %25 = arith.minimumf %23, %24 : vector<32x32xf32>
    %26 = tpu.iota {dimensions = array<i32: 0>} : vector<32x32xi32>
    %27 = tpu.iota {dimensions = array<i32: 1>} : vector<32x32xi32>
    %28 = arith.cmpi eq, %26, %27 : vector<32x32xi32>
    %cst_9 = arith.constant 1.000000e+00 : f32
    %cst_10 = arith.constant 0.000000e+00 : f32
    %29 = vector.broadcast %cst_9 : f32 to vector<32x32xf32>
    %30 = vector.broadcast %cst_10 : f32 to vector<32x32xf32>
    %31 = arith.select %28, %29, %30 : vector<32x32xi1>, vector<32x32xf32>
    %32 = vector.broadcast %7 : vector<1x32xf32> to vector<32x32xf32>
    %33 = arith.mulf %31, %32 : vector<32x32xf32>
    %34 = arith.maximumf %25, %33 : vector<32x32xf32>
    %cst_11 = arith.constant dense<0.000000e+00> : vector<32xf32>
    %35 = vector.multi_reduction <add>, %34, %cst_11 [1] : vector<32x32xf32> to vector<32xf32>
    %36 = vector.shape_cast %35 : vector<32xf32> to vector<32x1xf32>
    %cst_12 = arith.constant 0.000000e+00 : f32
    %37 = vector.broadcast %cst_12 : f32 to vector<32x1xf32>
    %38 = arith.cmpf ogt, %36, %37 : vector<32x1xf32>
    %39 = math.rsqrt %36 : vector<32x1xf32>
    %cst_13 = arith.constant 0.000000e+00 : f32
    %40 = vector.broadcast %cst_13 : f32 to vector<32x1xf32>
    %41 = arith.select %38, %39, %40 : vector<32x1xi1>, vector<32x1xf32>
    %42 = arith.truncf %34 : vector<32x32xf32> to vector<32x32xbf16>
    %c0_14 = arith.constant 0 : index
    %c0_15 = arith.constant 0 : index
    %43 = vector.load %arg0[%c0_14, %c0_15] : memref<32x16xf32, #tpu.memory_space<vmem>>, vector<32x16xf32>
    %44 = arith.truncf %43 : vector<32x16xf32> to vector<32x16xbf16>
    %c0_16 = arith.constant 0 : index
    %c0_17 = arith.constant 0 : index
    %45 = vector.load %arg6[%c0_16, %c0_17] : memref<16x32xf32, #tpu.memory_space<vmem>>, vector<16x32xf32>
    %46 = arith.truncf %45 : vector<16x32xf32> to vector<16x32xbf16>
    %cst_18 = arith.constant dense<0.000000e+00> : vector<32x32xf32>
    %47 = tpu.matmul %44, %46, %cst_18 {dimension_numbers = #tpu.dot_dimension_numbers<[1], [0], [0], [1], [0, 0, 1, 1], [], []>} : vector<32x16xbf16>, vector<16x32xbf16>, vector<32x32xf32> -> vector<32x32xf32>
    %48 = vector.broadcast %41 : vector<32x1xf32> to vector<32x32xf32>
    %49 = arith.mulf %48, %47 : vector<32x32xf32>
    %50 = arith.truncf %49 : vector<32x32xf32> to vector<32x32xbf16>
    %cst_19 = arith.constant dense<0.000000e+00> : vector<32x32xf32>
    %51 = tpu.matmul %42, %50, %cst_19 {dimension_numbers = #tpu.dot_dimension_numbers<[1], [0], [0], [1], [0, 0, 1, 1], [], []>} : vector<32x32xbf16>, vector<32x32xbf16>, vector<32x32xf32> -> vector<32x32xf32>
    %52 = vector.broadcast %41 : vector<32x1xf32> to vector<32x32xf32>
    %53 = arith.mulf %52, %51 : vector<32x32xf32>
    %c0_20 = arith.constant 0 : index
    %c0_21 = arith.constant 0 : index
    %54 = vector.load %arg7[%c0_20, %c0_21] : memref<1x32xf32, #tpu.memory_space<vmem>>, vector<1x32xf32>
    %55 = vector.broadcast %54 : vector<1x32xf32> to vector<32x32xf32>
    %56 = arith.addf %53, %55 : vector<32x32xf32>
    %cst_22 = arith.constant 0.000000e+00 : f32
    %57 = vector.broadcast %cst_22 : f32 to vector<32x32xf32>
    %58 = arith.maximumf %56, %57 : vector<32x32xf32>
    %59 = arith.truncf %58 : vector<32x32xf32> to vector<32x32xbf16>
    %c0_23 = arith.constant 0 : index
    %c0_24 = arith.constant 0 : index
    %60 = vector.load %arg8[%c0_23, %c0_24] : memref<32x32xf32, #tpu.memory_space<vmem>>, vector<32x32xf32>
    %61 = arith.truncf %60 : vector<32x32xf32> to vector<32x32xbf16>
    %cst_25 = arith.constant dense<0.000000e+00> : vector<32x32xf32>
    %62 = tpu.matmul %59, %61, %cst_25 {dimension_numbers = #tpu.dot_dimension_numbers<[1], [0], [0], [1], [0, 0, 1, 1], [], []>} : vector<32x32xbf16>, vector<32x32xbf16>, vector<32x32xf32> -> vector<32x32xf32>
    %63 = vector.broadcast %41 : vector<32x1xf32> to vector<32x32xf32>
    %64 = arith.mulf %63, %62 : vector<32x32xf32>
    %65 = arith.truncf %64 : vector<32x32xf32> to vector<32x32xbf16>
    %cst_26 = arith.constant dense<0.000000e+00> : vector<32x32xf32>
    %66 = tpu.matmul %42, %65, %cst_26 {dimension_numbers = #tpu.dot_dimension_numbers<[1], [0], [0], [1], [0, 0, 1, 1], [], []>} : vector<32x32xbf16>, vector<32x32xbf16>, vector<32x32xf32> -> vector<32x32xf32>
    %67 = vector.broadcast %41 : vector<32x1xf32> to vector<32x32xf32>
    %68 = arith.mulf %67, %66 : vector<32x32xf32>
    %c0_27 = arith.constant 0 : index
    %c0_28 = arith.constant 0 : index
    %69 = vector.load %arg9[%c0_27, %c0_28] : memref<1x32xf32, #tpu.memory_space<vmem>>, vector<1x32xf32>
    %70 = vector.broadcast %69 : vector<1x32xf32> to vector<32x32xf32>
    %71 = arith.addf %68, %70 : vector<32x32xf32>
    %cst_29 = arith.constant 0.000000e+00 : f32
    %72 = vector.broadcast %cst_29 : f32 to vector<32x32xf32>
    %73 = arith.maximumf %71, %72 : vector<32x32xf32>
    %74 = arith.truncf %58 : vector<32x32xf32> to vector<32x32xbf16>
    %c0_30 = arith.constant 0 : index
    %c0_31 = arith.constant 0 : index
    %75 = vector.load %arg10[%c0_30, %c0_31] : memref<32x128xf32, #tpu.memory_space<vmem>>, vector<32x128xf32>
    %76 = arith.truncf %75 : vector<32x128xf32> to vector<32x128xbf16>
    %cst_32 = arith.constant dense<0.000000e+00> : vector<32x128xf32>
    %77 = tpu.matmul %74, %76, %cst_32 {dimension_numbers = #tpu.dot_dimension_numbers<[1], [0], [0], [1], [0, 0, 1, 1], [], []>} : vector<32x32xbf16>, vector<32x128xbf16>, vector<32x128xf32> -> vector<32x128xf32>
    %78 = arith.truncf %73 : vector<32x32xf32> to vector<32x32xbf16>
    %c0_33 = arith.constant 0 : index
    %c0_34 = arith.constant 0 : index
    %79 = vector.load %arg11[%c0_33, %c0_34] : memref<32x128xf32, #tpu.memory_space<vmem>>, vector<32x128xf32>
    %80 = arith.truncf %79 : vector<32x128xf32> to vector<32x128xbf16>
    %cst_35 = arith.constant dense<0.000000e+00> : vector<32x128xf32>
    %81 = tpu.matmul %78, %80, %cst_35 {dimension_numbers = #tpu.dot_dimension_numbers<[1], [0], [0], [1], [0, 0, 1, 1], [], []>} : vector<32x32xbf16>, vector<32x128xbf16>, vector<32x128xf32> -> vector<32x128xf32>
    %82 = arith.addf %77, %81 : vector<32x128xf32>
    %c0_36 = arith.constant 0 : index
    %c0_37 = arith.constant 0 : index
    %83 = vector.load %arg12[%c0_36, %c0_37] : memref<1x128xf32, #tpu.memory_space<vmem>>, vector<1x128xf32>
    %84 = vector.broadcast %83 : vector<1x128xf32> to vector<32x128xf32>
    %85 = arith.addf %82, %84 : vector<32x128xf32>
    %cst_38 = arith.constant 0.000000e+00 : f32
    %86 = vector.broadcast %cst_38 : f32 to vector<32x128xf32>
    %87 = arith.maximumf %85, %86 : vector<32x128xf32>
    %88 = tpu.iota {dimensions = array<i32: 0>} : vector<8x32xi32>
    %c0_39 = arith.constant 0 : index
    %c0_40 = arith.constant 0 : index
    %89 = vector.load %arg5[%c0_39, %c0_40] : memref<1x32xi32, #tpu.memory_space<vmem>>, vector<1x32xi32>
    %90 = vector.broadcast %89 : vector<1x32xi32> to vector<8x32xi32>
    %91 = arith.cmpi eq, %88, %90 : vector<8x32xi32>
    %92 = vector.broadcast %5 : vector<1x32xi1> to vector<8x32xi1>
    %93 = arith.andi %91, %92 : vector<8x32xi1>
    %94 = arith.extui %93 : vector<8x32xi1> to vector<8x32xi32>
    %95 = arith.sitofp %94 : vector<8x32xi32> to vector<8x32xf32>
    %cst_41 = arith.constant dense<0.000000e+00> : vector<8xf32>
    %96 = vector.multi_reduction <add>, %95, %cst_41 [1] : vector<8x32xf32> to vector<8xf32>
    %97 = vector.shape_cast %96 : vector<8xf32> to vector<8x1xf32>
    %cst_42 = arith.constant 1.000000e+00 : f32
    %98 = vector.broadcast %cst_42 : f32 to vector<8x1xf32>
    %99 = arith.maximumf %97, %98 : vector<8x1xf32>
    %100 = vector.broadcast %99 : vector<8x1xf32> to vector<8x32xf32>
    %101 = arith.divf %95, %100 : vector<8x32xf32>
    %cst_43 = arith.constant dense<0.000000e+00> : vector<8x128xf32>
    %102 = tpu.matmul %101, %87, %cst_43 {dimension_numbers = #tpu.dot_dimension_numbers<[1], [0], [0], [1], [0, 0, 1, 1], [], []>} : vector<8x32xf32>, vector<32x128xf32>, vector<8x128xf32> -> vector<8x128xf32>
    %103 = arith.extui %13 : vector<32x128xi1> to vector<32x128xi32>
    %104 = arith.sitofp %103 : vector<32x128xi32> to vector<32x128xf32>
    %105 = arith.extui %18 : vector<32x128xi1> to vector<32x128xi32>
    %106 = arith.sitofp %105 : vector<32x128xi32> to vector<32x128xf32>
    %107 = arith.truncf %87 : vector<32x128xf32> to vector<32x128xbf16>
    %c0_44 = arith.constant 0 : index
    %c0_45 = arith.constant 0 : index
    %108 = vector.load %arg13[%c0_44, %c0_45] : memref<128x2xf32, #tpu.memory_space<vmem>>, vector<128x2xf32>
    %109 = arith.truncf %108 : vector<128x2xf32> to vector<128x2xbf16>
    %cst_46 = arith.constant dense<0.000000e+00> : vector<32x2xf32>
    %110 = tpu.matmul %107, %109, %cst_46 {dimension_numbers = #tpu.dot_dimension_numbers<[1], [0], [0], [1], [0, 0, 1, 1], [], []>} : vector<32x128xbf16>, vector<128x2xbf16>, vector<32x2xf32> -> vector<32x2xf32>
    %111 = vector.extract_strided_slice %110 {offsets = [0, 0], sizes = [32, 1], strides = [1, 1]} : vector<32x2xf32> to vector<32x1xf32>
    %112 = vector.broadcast %111 : vector<32x1xf32> to vector<32x128xf32>
    %113 = arith.mulf %106, %112 : vector<32x128xf32>
    %cst_47 = arith.constant dense<0.000000e+00> : vector<128xf32>
    %114 = vector.multi_reduction <add>, %113, %cst_47 [0] : vector<32x128xf32> to vector<128xf32>
    %115 = vector.shape_cast %114 : vector<128xf32> to vector<1x128xf32>
    %116 = vector.extract_strided_slice %110 {offsets = [0, 1], sizes = [32, 1], strides = [1, 1]} : vector<32x2xf32> to vector<32x1xf32>
    %117 = vector.broadcast %116 : vector<32x1xf32> to vector<32x128xf32>
    %118 = arith.mulf %104, %117 : vector<32x128xf32>
    %cst_48 = arith.constant dense<0.000000e+00> : vector<128xf32>
    %119 = vector.multi_reduction <add>, %118, %cst_48 [0] : vector<32x128xf32> to vector<128xf32>
    %120 = vector.shape_cast %119 : vector<128xf32> to vector<1x128xf32>
    %121 = arith.addf %115, %120 : vector<1x128xf32>
    %c0_49 = arith.constant 0 : index
    %c0_50 = arith.constant 0 : index
    %122 = vector.load %arg14[%c0_49, %c0_50] : memref<1x1xf32, #tpu.memory_space<vmem>>, vector<1x1xf32>
    %123 = vector.broadcast %122 : vector<1x1xf32> to vector<1x128xf32>
    %124 = arith.addf %121, %123 : vector<1x128xf32>
    %cst_51 = arith.constant -1.000000e+30 : f32
    %125 = vector.broadcast %cst_51 : f32 to vector<1x128xf32>
    %126 = arith.select %2, %124, %125 : vector<1x128xi1>, vector<1x128xf32>
    %cst_52 = arith.constant -1.000000e+30 : f32
    %127 = vector.shape_cast %124 : vector<1x128xf32> to vector<1x128xf32>
    %128 = vector.broadcast %127 : vector<1x128xf32> to vector<32x128xf32>
    %129 = vector.broadcast %cst_52 : f32 to vector<32x128xf32>
    %130 = arith.select %13, %128, %129 : vector<32x128xi1>, vector<32x128xf32>
    %cst_53 = arith.constant dense<0xFF800000> : vector<32xf32>
    %131 = vector.multi_reduction <maximumf>, %130, %cst_53 [1] : vector<32x128xf32> to vector<32xf32>
    %132 = vector.shape_cast %131 : vector<32xf32> to vector<32x1xf32>
    %133 = vector.broadcast %132 : vector<32x1xf32> to vector<32x128xf32>
    %134 = arith.mulf %104, %133 : vector<32x128xf32>
    %cst_54 = arith.constant dense<0.000000e+00> : vector<128xf32>
    %135 = vector.multi_reduction <add>, %134, %cst_54 [0] : vector<32x128xf32> to vector<128xf32>
    %136 = vector.shape_cast %135 : vector<128xf32> to vector<1x128xf32>
    %cst_55 = arith.constant 0.000000e+00 : f32
    %137 = vector.broadcast %cst_55 : f32 to vector<1x128xf32>
    %138 = arith.select %2, %136, %137 : vector<1x128xi1>, vector<1x128xf32>
    %139 = arith.subf %126, %138 : vector<1x128xf32>
    %140 = math.exp %139 : vector<1x128xf32>
    %cst_56 = arith.constant 0.000000e+00 : f32
    %141 = vector.shape_cast %140 : vector<1x128xf32> to vector<1x128xf32>
    %142 = vector.broadcast %141 : vector<1x128xf32> to vector<32x128xf32>
    %143 = vector.broadcast %cst_56 : f32 to vector<32x128xf32>
    %144 = arith.select %13, %142, %143 : vector<32x128xi1>, vector<32x128xf32>
    %cst_57 = arith.constant dense<0.000000e+00> : vector<32xf32>
    %145 = vector.multi_reduction <add>, %144, %cst_57 [1] : vector<32x128xf32> to vector<32xf32>
    %146 = vector.shape_cast %145 : vector<32xf32> to vector<32x1xf32>
    %147 = vector.broadcast %146 : vector<32x1xf32> to vector<32x128xf32>
    %148 = arith.mulf %104, %147 : vector<32x128xf32>
    %cst_58 = arith.constant dense<0.000000e+00> : vector<128xf32>
    %149 = vector.multi_reduction <add>, %148, %cst_58 [0] : vector<32x128xf32> to vector<128xf32>
    %150 = vector.shape_cast %149 : vector<128xf32> to vector<1x128xf32>
    %cst_59 = arith.constant 0.000000e+00 : f32
    %151 = vector.broadcast %cst_59 : f32 to vector<1x128xf32>
    %152 = arith.cmpf ogt, %150, %151 : vector<1x128xf32>
    %cst_60 = arith.constant 1.000000e+00 : f32
    %153 = vector.broadcast %cst_60 : f32 to vector<1x128xf32>
    %154 = arith.select %152, %150, %153 : vector<1x128xi1>, vector<1x128xf32>
    %155 = arith.divf %140, %154 : vector<1x128xf32>
    %cst_61 = arith.constant 5.000000e-01 : f32
    %156 = vector.broadcast %cst_61 : f32 to vector<1x128xf32>
    %157 = arith.addf %155, %156 : vector<1x128xf32>
    %cst_62 = arith.constant 0.000000e+00 : f32
    %158 = vector.broadcast %cst_62 : f32 to vector<1x128xf32>
    %159 = arith.subf %158, %157 : vector<1x128xf32>
    %cst_63 = arith.constant 1.000000e+30 : f32
    %160 = vector.broadcast %cst_63 : f32 to vector<1x128xf32>
    %161 = arith.select %2, %159, %160 : vector<1x128xi1>, vector<1x128xf32>
    %c0_64 = arith.constant 0 : index
    %c0_65 = arith.constant 0 : index
    %162 = vector.load %arg16[%c0_64, %c0_65] : memref<1x128xf32, #tpu.memory_space<vmem>>, vector<1x128xf32>
    tpu.vector_store %arg16[%c0_64, %c0_65], %157 {strides = array<i32>} : memref<1x128xf32, #tpu.memory_space<vmem>>, vector<1x128xf32>,
    %c0_66 = arith.constant 0 : index
    %c0_67 = arith.constant 0 : index
    %163 = vector.load %arg17[%c0_66, %c0_67] : memref<1x128xf32, #tpu.memory_space<vmem>>, vector<1x128xf32>
    tpu.vector_store %arg17[%c0_66, %c0_67], %161 {strides = array<i32>} : memref<1x128xf32, #tpu.memory_space<vmem>>, vector<1x128xf32>,
    %164 = tpu.concatenate %87, %102 in 0 : vector<32x128xf32>, vector<8x128xf32> -> vector<40x128xf32>
    %c0_68 = arith.constant 0 : index
    %c0_69 = arith.constant 0 : index
    %165 = vector.load %arg15[%c0_68, %c0_69] : memref<40x128xf32, #tpu.memory_space<vmem>>, vector<40x128xf32>
    tpu.vector_store %arg15[%c0_68, %c0_69], %164 {strides = array<i32>} : memref<40x128xf32, #tpu.memory_space<vmem>>, vector<40x128xf32>,
    return
  }
}

module attributes {stable_mosaic.version = 11 : i64} {
  func.func @_layer_kernel(%arg0: memref<1x32xi32, #tpu.memory_space<vmem>>, %arg1: memref<1x32xf32, #tpu.memory_space<vmem>>, %arg2: memref<40x128xf32, #tpu.memory_space<vmem>>, %arg3: memref<1x128xi32, #tpu.memory_space<vmem>>, %arg4: memref<1x128xi32, #tpu.memory_space<vmem>>, %arg5: memref<1x128xi32, #tpu.memory_space<vmem>>, %arg6: memref<1x32xi32, #tpu.memory_space<vmem>>, %arg7: memref<1x32xi32, #tpu.memory_space<vmem>>, %arg8: memref<32x32xf32, #tpu.memory_space<vmem>>, %arg9: memref<1x32xf32, #tpu.memory_space<vmem>>, %arg10: memref<32x32xf32, #tpu.memory_space<vmem>>, %arg11: memref<1x32xf32, #tpu.memory_space<vmem>>, %arg12: memref<32x128xf32, #tpu.memory_space<vmem>>, %arg13: memref<32x128xf32, #tpu.memory_space<vmem>>, %arg14: memref<1x128xf32, #tpu.memory_space<vmem>>, %arg15: memref<128x2xf32, #tpu.memory_space<vmem>>, %arg16: memref<1x1xf32, #tpu.memory_space<vmem>>, %arg17: memref<40x128xf32, #tpu.memory_space<vmem>>, %arg18: memref<1x128xf32, #tpu.memory_space<vmem>>, %arg19: memref<1x128xf32, #tpu.memory_space<vmem>>) attributes {dimension_semantics = [], scalar_prefetch = 0 : i64, scratch_operands = 0 : i64, tpu.core_type = #tpu.core_type<tc>} {
    %c0 = arith.constant 0 : index
    %c0_0 = arith.constant 0 : index
    %0 = vector.load %arg5[%c0, %c0_0] : memref<1x128xi32, #tpu.memory_space<vmem>>, vector<1x128xi32>
    %c0_i32 = arith.constant 0 : i32
    %1 = vector.broadcast %c0_i32 : i32 to vector<1x128xi32>
    %2 = arith.cmpi ne, %0, %1 : vector<1x128xi32>
    %c0_1 = arith.constant 0 : index
    %c0_2 = arith.constant 0 : index
    %3 = vector.load %arg6[%c0_1, %c0_2] : memref<1x32xi32, #tpu.memory_space<vmem>>, vector<1x32xi32>
    %c0_i32_3 = arith.constant 0 : i32
    %4 = vector.broadcast %c0_i32_3 : i32 to vector<1x32xi32>
    %5 = arith.cmpi ne, %3, %4 : vector<1x32xi32>
    %6 = arith.extui %5 : vector<1x32xi1> to vector<1x32xi32>
    %7 = arith.sitofp %6 : vector<1x32xi32> to vector<1x32xf32>
    %8 = tpu.iota {dimensions = array<i32: 0>} : vector<32x128xi32>
    %c0_4 = arith.constant 0 : index
    %c0_5 = arith.constant 0 : index
    %9 = vector.load %arg4[%c0_4, %c0_5] : memref<1x128xi32, #tpu.memory_space<vmem>>, vector<1x128xi32>
    %10 = vector.broadcast %9 : vector<1x128xi32> to vector<32x128xi32>
    %11 = arith.cmpi eq, %8, %10 : vector<32x128xi32>
    %12 = vector.broadcast %2 : vector<1x128xi1> to vector<32x128xi1>
    %13 = arith.andi %11, %12 : vector<32x128xi1>
    %c0_6 = arith.constant 0 : index
    %c0_7 = arith.constant 0 : index
    %14 = vector.load %arg3[%c0_6, %c0_7] : memref<1x128xi32, #tpu.memory_space<vmem>>, vector<1x128xi32>
    %15 = vector.broadcast %14 : vector<1x128xi32> to vector<32x128xi32>
    %16 = arith.cmpi eq, %8, %15 : vector<32x128xi32>
    %17 = vector.broadcast %2 : vector<1x128xi1> to vector<32x128xi1>
    %18 = arith.andi %16, %17 : vector<32x128xi1>
    %19 = arith.extui %13 : vector<32x128xi1> to vector<32x128xi32>
    %20 = arith.sitofp %19 : vector<32x128xi32> to vector<32x128xf32>
    %21 = arith.extui %18 : vector<32x128xi1> to vector<32x128xi32>
    %22 = arith.sitofp %21 : vector<32x128xi32> to vector<32x128xf32>
    %cst = arith.constant dense<0.000000e+00> : vector<32x32xf32>
    %23 = tpu.matmul %20, %22, %cst {dimension_numbers = #tpu.dot_dimension_numbers<[1], [1], [0], [0], [0, 0, 1, 0], [], []>} : vector<32x128xf32>, vector<32x128xf32>, vector<32x32xf32> -> vector<32x32xf32>
    %cst_8 = arith.constant 1.000000e+00 : f32
    %24 = vector.broadcast %cst_8 : f32 to vector<32x32xf32>
    %25 = arith.minimumf %23, %24 : vector<32x32xf32>
    %26 = tpu.iota {dimensions = array<i32: 0>} : vector<32x32xi32>
    %27 = tpu.iota {dimensions = array<i32: 1>} : vector<32x32xi32>
    %28 = arith.cmpi eq, %26, %27 : vector<32x32xi32>
    %cst_9 = arith.constant 1.000000e+00 : f32
    %cst_10 = arith.constant 0.000000e+00 : f32
    %29 = vector.broadcast %cst_9 : f32 to vector<32x32xf32>
    %30 = vector.broadcast %cst_10 : f32 to vector<32x32xf32>
    %31 = arith.select %28, %29, %30 : vector<32x32xi1>, vector<32x32xf32>
    %32 = vector.broadcast %7 : vector<1x32xf32> to vector<32x32xf32>
    %33 = arith.mulf %31, %32 : vector<32x32xf32>
    %34 = arith.maximumf %25, %33 : vector<32x32xf32>
    %cst_11 = arith.constant dense<0.000000e+00> : vector<32xf32>
    %35 = vector.multi_reduction <add>, %34, %cst_11 [1] : vector<32x32xf32> to vector<32xf32>
    %36 = vector.shape_cast %35 : vector<32xf32> to vector<32x1xf32>
    %cst_12 = arith.constant 0.000000e+00 : f32
    %37 = vector.broadcast %cst_12 : f32 to vector<32x1xf32>
    %38 = arith.cmpf ogt, %36, %37 : vector<32x1xf32>
    %39 = math.rsqrt %36 : vector<32x1xf32>
    %cst_13 = arith.constant 0.000000e+00 : f32
    %40 = vector.broadcast %cst_13 : f32 to vector<32x1xf32>
    %41 = arith.select %38, %39, %40 : vector<32x1xi1>, vector<32x1xf32>
    %42 = arith.truncf %34 : vector<32x32xf32> to vector<32x32xbf16>
    %43 = tpu.iota {dimensions = array<i32: 0>} : vector<32x32xi32>
    %c0_14 = arith.constant 0 : index
    %c0_15 = arith.constant 0 : index
    %44 = vector.load %arg0[%c0_14, %c0_15] : memref<1x32xi32, #tpu.memory_space<vmem>>, vector<1x32xi32>
    %45 = vector.broadcast %44 : vector<1x32xi32> to vector<32x32xi32>
    %46 = arith.cmpi eq, %43, %45 : vector<32x32xi32>
    %c0_16 = arith.constant 0 : index
    %c0_17 = arith.constant 0 : index
    %47 = vector.load %arg1[%c0_16, %c0_17] : memref<1x32xf32, #tpu.memory_space<vmem>>, vector<1x32xf32>
    %cst_18 = arith.constant 0.000000e+00 : f32
    %48 = vector.shape_cast %47 : vector<1x32xf32> to vector<1x32xf32>
    %49 = vector.broadcast %48 : vector<1x32xf32> to vector<32x32xf32>
    %50 = vector.broadcast %cst_18 : f32 to vector<32x32xf32>
    %51 = arith.select %46, %49, %50 : vector<32x32xi1>, vector<32x32xf32>
    %c0_19 = arith.constant 0 : index
    %c0_20 = arith.constant 0 : index
    %52 = vector.load %arg2[%c0_19, %c0_20] : memref<40x128xf32, #tpu.memory_space<vmem>>, vector<32x32xf32>
    %cst_21 = arith.constant dense<0.000000e+00> : vector<32x32xf32>
    %53 = tpu.matmul %51, %52, %cst_21 {dimension_numbers = #tpu.dot_dimension_numbers<[1], [0], [0], [1], [0, 0, 1, 1], [], []>} : vector<32x32xf32>, vector<32x32xf32>, vector<32x32xf32> -> vector<32x32xf32>
    %54 = arith.truncf %53 : vector<32x32xf32> to vector<32x32xbf16>
    %c0_22 = arith.constant 0 : index
    %c0_23 = arith.constant 0 : index
    %55 = vector.load %arg8[%c0_22, %c0_23] : memref<32x32xf32, #tpu.memory_space<vmem>>, vector<32x32xf32>
    %56 = arith.truncf %55 : vector<32x32xf32> to vector<32x32xbf16>
    %cst_24 = arith.constant dense<0.000000e+00> : vector<32x32xf32>
    %57 = tpu.matmul %54, %56, %cst_24 {dimension_numbers = #tpu.dot_dimension_numbers<[1], [0], [0], [1], [0, 0, 1, 1], [], []>} : vector<32x32xbf16>, vector<32x32xbf16>, vector<32x32xf32> -> vector<32x32xf32>
    %58 = vector.broadcast %41 : vector<32x1xf32> to vector<32x32xf32>
    %59 = arith.mulf %58, %57 : vector<32x32xf32>
    %60 = arith.truncf %59 : vector<32x32xf32> to vector<32x32xbf16>
    %cst_25 = arith.constant dense<0.000000e+00> : vector<32x32xf32>
    %61 = tpu.matmul %42, %60, %cst_25 {dimension_numbers = #tpu.dot_dimension_numbers<[1], [0], [0], [1], [0, 0, 1, 1], [], []>} : vector<32x32xbf16>, vector<32x32xbf16>, vector<32x32xf32> -> vector<32x32xf32>
    %62 = vector.broadcast %41 : vector<32x1xf32> to vector<32x32xf32>
    %63 = arith.mulf %62, %61 : vector<32x32xf32>
    %c0_26 = arith.constant 0 : index
    %c0_27 = arith.constant 0 : index
    %64 = vector.load %arg9[%c0_26, %c0_27] : memref<1x32xf32, #tpu.memory_space<vmem>>, vector<1x32xf32>
    %65 = vector.broadcast %64 : vector<1x32xf32> to vector<32x32xf32>
    %66 = arith.addf %63, %65 : vector<32x32xf32>
    %cst_28 = arith.constant 0.000000e+00 : f32
    %67 = vector.broadcast %cst_28 : f32 to vector<32x32xf32>
    %68 = arith.maximumf %66, %67 : vector<32x32xf32>
    %69 = arith.truncf %68 : vector<32x32xf32> to vector<32x32xbf16>
    %c0_29 = arith.constant 0 : index
    %c0_30 = arith.constant 0 : index
    %70 = vector.load %arg10[%c0_29, %c0_30] : memref<32x32xf32, #tpu.memory_space<vmem>>, vector<32x32xf32>
    %71 = arith.truncf %70 : vector<32x32xf32> to vector<32x32xbf16>
    %cst_31 = arith.constant dense<0.000000e+00> : vector<32x32xf32>
    %72 = tpu.matmul %69, %71, %cst_31 {dimension_numbers = #tpu.dot_dimension_numbers<[1], [0], [0], [1], [0, 0, 1, 1], [], []>} : vector<32x32xbf16>, vector<32x32xbf16>, vector<32x32xf32> -> vector<32x32xf32>
    %73 = vector.broadcast %41 : vector<32x1xf32> to vector<32x32xf32>
    %74 = arith.mulf %73, %72 : vector<32x32xf32>
    %75 = arith.truncf %74 : vector<32x32xf32> to vector<32x32xbf16>
    %cst_32 = arith.constant dense<0.000000e+00> : vector<32x32xf32>
    %76 = tpu.matmul %42, %75, %cst_32 {dimension_numbers = #tpu.dot_dimension_numbers<[1], [0], [0], [1], [0, 0, 1, 1], [], []>} : vector<32x32xbf16>, vector<32x32xbf16>, vector<32x32xf32> -> vector<32x32xf32>
    %77 = vector.broadcast %41 : vector<32x1xf32> to vector<32x32xf32>
    %78 = arith.mulf %77, %76 : vector<32x32xf32>
    %c0_33 = arith.constant 0 : index
    %c0_34 = arith.constant 0 : index
    %79 = vector.load %arg11[%c0_33, %c0_34] : memref<1x32xf32, #tpu.memory_space<vmem>>, vector<1x32xf32>
    %80 = vector.broadcast %79 : vector<1x32xf32> to vector<32x32xf32>
    %81 = arith.addf %78, %80 : vector<32x32xf32>
    %cst_35 = arith.constant 0.000000e+00 : f32
    %82 = vector.broadcast %cst_35 : f32 to vector<32x32xf32>
    %83 = arith.maximumf %81, %82 : vector<32x32xf32>
    %84 = arith.truncf %68 : vector<32x32xf32> to vector<32x32xbf16>
    %c0_36 = arith.constant 0 : index
    %c0_37 = arith.constant 0 : index
    %85 = vector.load %arg12[%c0_36, %c0_37] : memref<32x128xf32, #tpu.memory_space<vmem>>, vector<32x128xf32>
    %86 = arith.truncf %85 : vector<32x128xf32> to vector<32x128xbf16>
    %cst_38 = arith.constant dense<0.000000e+00> : vector<32x128xf32>
    %87 = tpu.matmul %84, %86, %cst_38 {dimension_numbers = #tpu.dot_dimension_numbers<[1], [0], [0], [1], [0, 0, 1, 1], [], []>} : vector<32x32xbf16>, vector<32x128xbf16>, vector<32x128xf32> -> vector<32x128xf32>
    %88 = arith.truncf %83 : vector<32x32xf32> to vector<32x32xbf16>
    %c0_39 = arith.constant 0 : index
    %c0_40 = arith.constant 0 : index
    %89 = vector.load %arg13[%c0_39, %c0_40] : memref<32x128xf32, #tpu.memory_space<vmem>>, vector<32x128xf32>
    %90 = arith.truncf %89 : vector<32x128xf32> to vector<32x128xbf16>
    %cst_41 = arith.constant dense<0.000000e+00> : vector<32x128xf32>
    %91 = tpu.matmul %88, %90, %cst_41 {dimension_numbers = #tpu.dot_dimension_numbers<[1], [0], [0], [1], [0, 0, 1, 1], [], []>} : vector<32x32xbf16>, vector<32x128xbf16>, vector<32x128xf32> -> vector<32x128xf32>
    %92 = arith.addf %87, %91 : vector<32x128xf32>
    %c0_42 = arith.constant 0 : index
    %c0_43 = arith.constant 0 : index
    %93 = vector.load %arg14[%c0_42, %c0_43] : memref<1x128xf32, #tpu.memory_space<vmem>>, vector<1x128xf32>
    %94 = vector.broadcast %93 : vector<1x128xf32> to vector<32x128xf32>
    %95 = arith.addf %92, %94 : vector<32x128xf32>
    %cst_44 = arith.constant 0.000000e+00 : f32
    %96 = vector.broadcast %cst_44 : f32 to vector<32x128xf32>
    %97 = arith.maximumf %95, %96 : vector<32x128xf32>
    %98 = tpu.iota {dimensions = array<i32: 0>} : vector<8x32xi32>
    %c0_45 = arith.constant 0 : index
    %c0_46 = arith.constant 0 : index
    %99 = vector.load %arg7[%c0_45, %c0_46] : memref<1x32xi32, #tpu.memory_space<vmem>>, vector<1x32xi32>
    %100 = vector.broadcast %99 : vector<1x32xi32> to vector<8x32xi32>
    %101 = arith.cmpi eq, %98, %100 : vector<8x32xi32>
    %102 = vector.broadcast %5 : vector<1x32xi1> to vector<8x32xi1>
    %103 = arith.andi %101, %102 : vector<8x32xi1>
    %104 = arith.extui %103 : vector<8x32xi1> to vector<8x32xi32>
    %105 = arith.sitofp %104 : vector<8x32xi32> to vector<8x32xf32>
    %cst_47 = arith.constant dense<0.000000e+00> : vector<8xf32>
    %106 = vector.multi_reduction <add>, %105, %cst_47 [1] : vector<8x32xf32> to vector<8xf32>
    %107 = vector.shape_cast %106 : vector<8xf32> to vector<8x1xf32>
    %cst_48 = arith.constant 1.000000e+00 : f32
    %108 = vector.broadcast %cst_48 : f32 to vector<8x1xf32>
    %109 = arith.maximumf %107, %108 : vector<8x1xf32>
    %110 = vector.broadcast %109 : vector<8x1xf32> to vector<8x32xf32>
    %111 = arith.divf %105, %110 : vector<8x32xf32>
    %cst_49 = arith.constant dense<0.000000e+00> : vector<8x128xf32>
    %112 = tpu.matmul %111, %97, %cst_49 {dimension_numbers = #tpu.dot_dimension_numbers<[1], [0], [0], [1], [0, 0, 1, 1], [], []>} : vector<8x32xf32>, vector<32x128xf32>, vector<8x128xf32> -> vector<8x128xf32>
    %113 = arith.extui %13 : vector<32x128xi1> to vector<32x128xi32>
    %114 = arith.sitofp %113 : vector<32x128xi32> to vector<32x128xf32>
    %115 = arith.extui %18 : vector<32x128xi1> to vector<32x128xi32>
    %116 = arith.sitofp %115 : vector<32x128xi32> to vector<32x128xf32>
    %117 = arith.truncf %97 : vector<32x128xf32> to vector<32x128xbf16>
    %c0_50 = arith.constant 0 : index
    %c0_51 = arith.constant 0 : index
    %118 = vector.load %arg15[%c0_50, %c0_51] : memref<128x2xf32, #tpu.memory_space<vmem>>, vector<128x2xf32>
    %119 = arith.truncf %118 : vector<128x2xf32> to vector<128x2xbf16>
    %cst_52 = arith.constant dense<0.000000e+00> : vector<32x2xf32>
    %120 = tpu.matmul %117, %119, %cst_52 {dimension_numbers = #tpu.dot_dimension_numbers<[1], [0], [0], [1], [0, 0, 1, 1], [], []>} : vector<32x128xbf16>, vector<128x2xbf16>, vector<32x2xf32> -> vector<32x2xf32>
    %121 = vector.extract_strided_slice %120 {offsets = [0, 0], sizes = [32, 1], strides = [1, 1]} : vector<32x2xf32> to vector<32x1xf32>
    %122 = vector.broadcast %121 : vector<32x1xf32> to vector<32x128xf32>
    %123 = arith.mulf %116, %122 : vector<32x128xf32>
    %cst_53 = arith.constant dense<0.000000e+00> : vector<128xf32>
    %124 = vector.multi_reduction <add>, %123, %cst_53 [0] : vector<32x128xf32> to vector<128xf32>
    %125 = vector.shape_cast %124 : vector<128xf32> to vector<1x128xf32>
    %126 = vector.extract_strided_slice %120 {offsets = [0, 1], sizes = [32, 1], strides = [1, 1]} : vector<32x2xf32> to vector<32x1xf32>
    %127 = vector.broadcast %126 : vector<32x1xf32> to vector<32x128xf32>
    %128 = arith.mulf %114, %127 : vector<32x128xf32>
    %cst_54 = arith.constant dense<0.000000e+00> : vector<128xf32>
    %129 = vector.multi_reduction <add>, %128, %cst_54 [0] : vector<32x128xf32> to vector<128xf32>
    %130 = vector.shape_cast %129 : vector<128xf32> to vector<1x128xf32>
    %131 = arith.addf %125, %130 : vector<1x128xf32>
    %c0_55 = arith.constant 0 : index
    %c0_56 = arith.constant 0 : index
    %132 = vector.load %arg16[%c0_55, %c0_56] : memref<1x1xf32, #tpu.memory_space<vmem>>, vector<1x1xf32>
    %133 = vector.broadcast %132 : vector<1x1xf32> to vector<1x128xf32>
    %134 = arith.addf %131, %133 : vector<1x128xf32>
    %cst_57 = arith.constant -1.000000e+30 : f32
    %135 = vector.broadcast %cst_57 : f32 to vector<1x128xf32>
    %136 = arith.select %2, %134, %135 : vector<1x128xi1>, vector<1x128xf32>
    %cst_58 = arith.constant -1.000000e+30 : f32
    %137 = vector.shape_cast %134 : vector<1x128xf32> to vector<1x128xf32>
    %138 = vector.broadcast %137 : vector<1x128xf32> to vector<32x128xf32>
    %139 = vector.broadcast %cst_58 : f32 to vector<32x128xf32>
    %140 = arith.select %13, %138, %139 : vector<32x128xi1>, vector<32x128xf32>
    %cst_59 = arith.constant dense<0xFF800000> : vector<32xf32>
    %141 = vector.multi_reduction <maximumf>, %140, %cst_59 [1] : vector<32x128xf32> to vector<32xf32>
    %142 = vector.shape_cast %141 : vector<32xf32> to vector<32x1xf32>
    %143 = vector.broadcast %142 : vector<32x1xf32> to vector<32x128xf32>
    %144 = arith.mulf %114, %143 : vector<32x128xf32>
    %cst_60 = arith.constant dense<0.000000e+00> : vector<128xf32>
    %145 = vector.multi_reduction <add>, %144, %cst_60 [0] : vector<32x128xf32> to vector<128xf32>
    %146 = vector.shape_cast %145 : vector<128xf32> to vector<1x128xf32>
    %cst_61 = arith.constant 0.000000e+00 : f32
    %147 = vector.broadcast %cst_61 : f32 to vector<1x128xf32>
    %148 = arith.select %2, %146, %147 : vector<1x128xi1>, vector<1x128xf32>
    %149 = arith.subf %136, %148 : vector<1x128xf32>
    %150 = math.exp %149 : vector<1x128xf32>
    %cst_62 = arith.constant 0.000000e+00 : f32
    %151 = vector.shape_cast %150 : vector<1x128xf32> to vector<1x128xf32>
    %152 = vector.broadcast %151 : vector<1x128xf32> to vector<32x128xf32>
    %153 = vector.broadcast %cst_62 : f32 to vector<32x128xf32>
    %154 = arith.select %13, %152, %153 : vector<32x128xi1>, vector<32x128xf32>
    %cst_63 = arith.constant dense<0.000000e+00> : vector<32xf32>
    %155 = vector.multi_reduction <add>, %154, %cst_63 [1] : vector<32x128xf32> to vector<32xf32>
    %156 = vector.shape_cast %155 : vector<32xf32> to vector<32x1xf32>
    %157 = vector.broadcast %156 : vector<32x1xf32> to vector<32x128xf32>
    %158 = arith.mulf %114, %157 : vector<32x128xf32>
    %cst_64 = arith.constant dense<0.000000e+00> : vector<128xf32>
    %159 = vector.multi_reduction <add>, %158, %cst_64 [0] : vector<32x128xf32> to vector<128xf32>
    %160 = vector.shape_cast %159 : vector<128xf32> to vector<1x128xf32>
    %cst_65 = arith.constant 0.000000e+00 : f32
    %161 = vector.broadcast %cst_65 : f32 to vector<1x128xf32>
    %162 = arith.cmpf ogt, %160, %161 : vector<1x128xf32>
    %cst_66 = arith.constant 1.000000e+00 : f32
    %163 = vector.broadcast %cst_66 : f32 to vector<1x128xf32>
    %164 = arith.select %162, %160, %163 : vector<1x128xi1>, vector<1x128xf32>
    %165 = arith.divf %150, %164 : vector<1x128xf32>
    %cst_67 = arith.constant 5.000000e-01 : f32
    %166 = vector.broadcast %cst_67 : f32 to vector<1x128xf32>
    %167 = arith.addf %165, %166 : vector<1x128xf32>
    %cst_68 = arith.constant 0.000000e+00 : f32
    %168 = vector.broadcast %cst_68 : f32 to vector<1x128xf32>
    %169 = arith.subf %168, %167 : vector<1x128xf32>
    %cst_69 = arith.constant 1.000000e+30 : f32
    %170 = vector.broadcast %cst_69 : f32 to vector<1x128xf32>
    %171 = arith.select %2, %169, %170 : vector<1x128xi1>, vector<1x128xf32>
    %c0_70 = arith.constant 0 : index
    %c0_71 = arith.constant 0 : index
    %172 = vector.load %arg18[%c0_70, %c0_71] : memref<1x128xf32, #tpu.memory_space<vmem>>, vector<1x128xf32>
    tpu.vector_store %arg18[%c0_70, %c0_71], %167 {strides = array<i32>} : memref<1x128xf32, #tpu.memory_space<vmem>>, vector<1x128xf32>,
    %c0_72 = arith.constant 0 : index
    %c0_73 = arith.constant 0 : index
    %173 = vector.load %arg19[%c0_72, %c0_73] : memref<1x128xf32, #tpu.memory_space<vmem>>, vector<1x128xf32>
    tpu.vector_store %arg19[%c0_72, %c0_73], %171 {strides = array<i32>} : memref<1x128xf32, #tpu.memory_space<vmem>>, vector<1x128xf32>,
    %174 = tpu.concatenate %97, %112 in 0 : vector<32x128xf32>, vector<8x128xf32> -> vector<40x128xf32>
    %c0_74 = arith.constant 0 : index
    %c0_75 = arith.constant 0 : index
    %175 = vector.load %arg17[%c0_74, %c0_75] : memref<40x128xf32, #tpu.memory_space<vmem>>, vector<40x128xf32>
    tpu.vector_store %arg17[%c0_74, %c0_75], %174 {strides = array<i32>} : memref<40x128xf32, #tpu.memory_space<vmem>>, vector<40x128xf32>,
    return
  }
}

module attributes {stable_mosaic.version = 11 : i64} {
  func.func @_final_kernel(%arg0: memref<1x32xi32, #tpu.memory_space<vmem>>, %arg1: memref<1x32xf32, #tpu.memory_space<vmem>>, %arg2: memref<40x128xf32, #tpu.memory_space<vmem>>, %arg3: memref<40x128xf32, #tpu.memory_space<vmem>>, %arg4: memref<1x128xi32, #tpu.memory_space<vmem>>, %arg5: memref<1x128xi32, #tpu.memory_space<vmem>>, %arg6: memref<1x128xi32, #tpu.memory_space<vmem>>, %arg7: memref<1x32xi32, #tpu.memory_space<vmem>>, %arg8: memref<1x32xi32, #tpu.memory_space<vmem>>, %arg9: memref<32x32xf32, #tpu.memory_space<vmem>>, %arg10: memref<1x32xf32, #tpu.memory_space<vmem>>, %arg11: memref<32x32xf32, #tpu.memory_space<vmem>>, %arg12: memref<1x32xf32, #tpu.memory_space<vmem>>, %arg13: memref<32x128xf32, #tpu.memory_space<vmem>>, %arg14: memref<32x128xf32, #tpu.memory_space<vmem>>, %arg15: memref<1x128xf32, #tpu.memory_space<vmem>>, %arg16: memref<32x32xf32, #tpu.memory_space<vmem>>, %arg17: memref<32x32xf32, #tpu.memory_space<vmem>>, %arg18: memref<32x32xf32, #tpu.memory_space<vmem>>, %arg19: memref<1x32xf32, #tpu.memory_space<vmem>>, %arg20: memref<32x4xf32, #tpu.memory_space<vmem>>, %arg21: memref<1x4xf32, #tpu.memory_space<vmem>>, %arg22: memref<2x4xf32, #tpu.memory_space<vmem>>) attributes {dimension_semantics = [], scalar_prefetch = 0 : i64, scratch_operands = 0 : i64, tpu.core_type = #tpu.core_type<tc>} {
    %c0 = arith.constant 0 : index
    %c0_0 = arith.constant 0 : index
    %0 = vector.load %arg6[%c0, %c0_0] : memref<1x128xi32, #tpu.memory_space<vmem>>, vector<1x128xi32>
    %c0_i32 = arith.constant 0 : i32
    %1 = vector.broadcast %c0_i32 : i32 to vector<1x128xi32>
    %2 = arith.cmpi ne, %0, %1 : vector<1x128xi32>
    %c0_1 = arith.constant 0 : index
    %c0_2 = arith.constant 0 : index
    %3 = vector.load %arg7[%c0_1, %c0_2] : memref<1x32xi32, #tpu.memory_space<vmem>>, vector<1x32xi32>
    %c0_i32_3 = arith.constant 0 : i32
    %4 = vector.broadcast %c0_i32_3 : i32 to vector<1x32xi32>
    %5 = arith.cmpi ne, %3, %4 : vector<1x32xi32>
    %6 = arith.extui %5 : vector<1x32xi1> to vector<1x32xi32>
    %7 = arith.sitofp %6 : vector<1x32xi32> to vector<1x32xf32>
    %8 = tpu.iota {dimensions = array<i32: 0>} : vector<32x128xi32>
    %c0_4 = arith.constant 0 : index
    %c0_5 = arith.constant 0 : index
    %9 = vector.load %arg5[%c0_4, %c0_5] : memref<1x128xi32, #tpu.memory_space<vmem>>, vector<1x128xi32>
    %10 = vector.broadcast %9 : vector<1x128xi32> to vector<32x128xi32>
    %11 = arith.cmpi eq, %8, %10 : vector<32x128xi32>
    %12 = vector.broadcast %2 : vector<1x128xi1> to vector<32x128xi1>
    %13 = arith.andi %11, %12 : vector<32x128xi1>
    %c0_6 = arith.constant 0 : index
    %c0_7 = arith.constant 0 : index
    %14 = vector.load %arg4[%c0_6, %c0_7] : memref<1x128xi32, #tpu.memory_space<vmem>>, vector<1x128xi32>
    %15 = vector.broadcast %14 : vector<1x128xi32> to vector<32x128xi32>
    %16 = arith.cmpi eq, %8, %15 : vector<32x128xi32>
    %17 = vector.broadcast %2 : vector<1x128xi1> to vector<32x128xi1>
    %18 = arith.andi %16, %17 : vector<32x128xi1>
    %19 = arith.extui %13 : vector<32x128xi1> to vector<32x128xi32>
    %20 = arith.sitofp %19 : vector<32x128xi32> to vector<32x128xf32>
    %21 = arith.extui %18 : vector<32x128xi1> to vector<32x128xi32>
    %22 = arith.sitofp %21 : vector<32x128xi32> to vector<32x128xf32>
    %cst = arith.constant dense<0.000000e+00> : vector<32x32xf32>
    %23 = tpu.matmul %20, %22, %cst {dimension_numbers = #tpu.dot_dimension_numbers<[1], [1], [0], [0], [0, 0, 1, 0], [], []>} : vector<32x128xf32>, vector<32x128xf32>, vector<32x32xf32> -> vector<32x32xf32>
    %cst_8 = arith.constant 1.000000e+00 : f32
    %24 = vector.broadcast %cst_8 : f32 to vector<32x32xf32>
    %25 = arith.minimumf %23, %24 : vector<32x32xf32>
    %26 = tpu.iota {dimensions = array<i32: 0>} : vector<32x32xi32>
    %27 = tpu.iota {dimensions = array<i32: 1>} : vector<32x32xi32>
    %28 = arith.cmpi eq, %26, %27 : vector<32x32xi32>
    %cst_9 = arith.constant 1.000000e+00 : f32
    %cst_10 = arith.constant 0.000000e+00 : f32
    %29 = vector.broadcast %cst_9 : f32 to vector<32x32xf32>
    %30 = vector.broadcast %cst_10 : f32 to vector<32x32xf32>
    %31 = arith.select %28, %29, %30 : vector<32x32xi1>, vector<32x32xf32>
    %32 = vector.broadcast %7 : vector<1x32xf32> to vector<32x32xf32>
    %33 = arith.mulf %31, %32 : vector<32x32xf32>
    %34 = arith.maximumf %25, %33 : vector<32x32xf32>
    %cst_11 = arith.constant dense<0.000000e+00> : vector<32xf32>
    %35 = vector.multi_reduction <add>, %34, %cst_11 [1] : vector<32x32xf32> to vector<32xf32>
    %36 = vector.shape_cast %35 : vector<32xf32> to vector<32x1xf32>
    %cst_12 = arith.constant 0.000000e+00 : f32
    %37 = vector.broadcast %cst_12 : f32 to vector<32x1xf32>
    %38 = arith.cmpf ogt, %36, %37 : vector<32x1xf32>
    %39 = math.rsqrt %36 : vector<32x1xf32>
    %cst_13 = arith.constant 0.000000e+00 : f32
    %40 = vector.broadcast %cst_13 : f32 to vector<32x1xf32>
    %41 = arith.select %38, %39, %40 : vector<32x1xi1>, vector<32x1xf32>
    %42 = arith.truncf %34 : vector<32x32xf32> to vector<32x32xbf16>
    %43 = tpu.iota {dimensions = array<i32: 0>} : vector<32x32xi32>
    %c0_14 = arith.constant 0 : index
    %c0_15 = arith.constant 0 : index
    %44 = vector.load %arg0[%c0_14, %c0_15] : memref<1x32xi32, #tpu.memory_space<vmem>>, vector<1x32xi32>
    %45 = vector.broadcast %44 : vector<1x32xi32> to vector<32x32xi32>
    %46 = arith.cmpi eq, %43, %45 : vector<32x32xi32>
    %c0_16 = arith.constant 0 : index
    %c0_17 = arith.constant 0 : index
    %47 = vector.load %arg1[%c0_16, %c0_17] : memref<1x32xf32, #tpu.memory_space<vmem>>, vector<1x32xf32>
    %cst_18 = arith.constant 0.000000e+00 : f32
    %48 = vector.shape_cast %47 : vector<1x32xf32> to vector<1x32xf32>
    %49 = vector.broadcast %48 : vector<1x32xf32> to vector<32x32xf32>
    %50 = vector.broadcast %cst_18 : f32 to vector<32x32xf32>
    %51 = arith.select %46, %49, %50 : vector<32x32xi1>, vector<32x32xf32>
    %c0_19 = arith.constant 0 : index
    %c0_20 = arith.constant 0 : index
    %52 = vector.load %arg3[%c0_19, %c0_20] : memref<40x128xf32, #tpu.memory_space<vmem>>, vector<32x32xf32>
    %cst_21 = arith.constant dense<0.000000e+00> : vector<32x32xf32>
    %53 = tpu.matmul %51, %52, %cst_21 {dimension_numbers = #tpu.dot_dimension_numbers<[1], [0], [0], [1], [0, 0, 1, 1], [], []>} : vector<32x32xf32>, vector<32x32xf32>, vector<32x32xf32> -> vector<32x32xf32>
    %54 = arith.truncf %53 : vector<32x32xf32> to vector<32x32xbf16>
    %c0_22 = arith.constant 0 : index
    %c0_23 = arith.constant 0 : index
    %55 = vector.load %arg9[%c0_22, %c0_23] : memref<32x32xf32, #tpu.memory_space<vmem>>, vector<32x32xf32>
    %56 = arith.truncf %55 : vector<32x32xf32> to vector<32x32xbf16>
    %cst_24 = arith.constant dense<0.000000e+00> : vector<32x32xf32>
    %57 = tpu.matmul %54, %56, %cst_24 {dimension_numbers = #tpu.dot_dimension_numbers<[1], [0], [0], [1], [0, 0, 1, 1], [], []>} : vector<32x32xbf16>, vector<32x32xbf16>, vector<32x32xf32> -> vector<32x32xf32>
    %58 = vector.broadcast %41 : vector<32x1xf32> to vector<32x32xf32>
    %59 = arith.mulf %58, %57 : vector<32x32xf32>
    %60 = arith.truncf %59 : vector<32x32xf32> to vector<32x32xbf16>
    %cst_25 = arith.constant dense<0.000000e+00> : vector<32x32xf32>
    %61 = tpu.matmul %42, %60, %cst_25 {dimension_numbers = #tpu.dot_dimension_numbers<[1], [0], [0], [1], [0, 0, 1, 1], [], []>} : vector<32x32xbf16>, vector<32x32xbf16>, vector<32x32xf32> -> vector<32x32xf32>
    %62 = vector.broadcast %41 : vector<32x1xf32> to vector<32x32xf32>
    %63 = arith.mulf %62, %61 : vector<32x32xf32>
    %c0_26 = arith.constant 0 : index
    %c0_27 = arith.constant 0 : index
    %64 = vector.load %arg10[%c0_26, %c0_27] : memref<1x32xf32, #tpu.memory_space<vmem>>, vector<1x32xf32>
    %65 = vector.broadcast %64 : vector<1x32xf32> to vector<32x32xf32>
    %66 = arith.addf %63, %65 : vector<32x32xf32>
    %cst_28 = arith.constant 0.000000e+00 : f32
    %67 = vector.broadcast %cst_28 : f32 to vector<32x32xf32>
    %68 = arith.maximumf %66, %67 : vector<32x32xf32>
    %69 = arith.truncf %68 : vector<32x32xf32> to vector<32x32xbf16>
    %c0_29 = arith.constant 0 : index
    %c0_30 = arith.constant 0 : index
    %70 = vector.load %arg11[%c0_29, %c0_30] : memref<32x32xf32, #tpu.memory_space<vmem>>, vector<32x32xf32>
    %71 = arith.truncf %70 : vector<32x32xf32> to vector<32x32xbf16>
    %cst_31 = arith.constant dense<0.000000e+00> : vector<32x32xf32>
    %72 = tpu.matmul %69, %71, %cst_31 {dimension_numbers = #tpu.dot_dimension_numbers<[1], [0], [0], [1], [0, 0, 1, 1], [], []>} : vector<32x32xbf16>, vector<32x32xbf16>, vector<32x32xf32> -> vector<32x32xf32>
    %73 = vector.broadcast %41 : vector<32x1xf32> to vector<32x32xf32>
    %74 = arith.mulf %73, %72 : vector<32x32xf32>
    %75 = arith.truncf %74 : vector<32x32xf32> to vector<32x32xbf16>
    %cst_32 = arith.constant dense<0.000000e+00> : vector<32x32xf32>
    %76 = tpu.matmul %42, %75, %cst_32 {dimension_numbers = #tpu.dot_dimension_numbers<[1], [0], [0], [1], [0, 0, 1, 1], [], []>} : vector<32x32xbf16>, vector<32x32xbf16>, vector<32x32xf32> -> vector<32x32xf32>
    %77 = vector.broadcast %41 : vector<32x1xf32> to vector<32x32xf32>
    %78 = arith.mulf %77, %76 : vector<32x32xf32>
    %c0_33 = arith.constant 0 : index
    %c0_34 = arith.constant 0 : index
    %79 = vector.load %arg12[%c0_33, %c0_34] : memref<1x32xf32, #tpu.memory_space<vmem>>, vector<1x32xf32>
    %80 = vector.broadcast %79 : vector<1x32xf32> to vector<32x32xf32>
    %81 = arith.addf %78, %80 : vector<32x32xf32>
    %cst_35 = arith.constant 0.000000e+00 : f32
    %82 = vector.broadcast %cst_35 : f32 to vector<32x32xf32>
    %83 = arith.maximumf %81, %82 : vector<32x32xf32>
    %84 = arith.truncf %68 : vector<32x32xf32> to vector<32x32xbf16>
    %c0_36 = arith.constant 0 : index
    %c0_37 = arith.constant 0 : index
    %85 = vector.load %arg13[%c0_36, %c0_37] : memref<32x128xf32, #tpu.memory_space<vmem>>, vector<32x128xf32>
    %86 = arith.truncf %85 : vector<32x128xf32> to vector<32x128xbf16>
    %cst_38 = arith.constant dense<0.000000e+00> : vector<32x128xf32>
    %87 = tpu.matmul %84, %86, %cst_38 {dimension_numbers = #tpu.dot_dimension_numbers<[1], [0], [0], [1], [0, 0, 1, 1], [], []>} : vector<32x32xbf16>, vector<32x128xbf16>, vector<32x128xf32> -> vector<32x128xf32>
    %88 = arith.truncf %83 : vector<32x32xf32> to vector<32x32xbf16>
    %c0_39 = arith.constant 0 : index
    %c0_40 = arith.constant 0 : index
    %89 = vector.load %arg14[%c0_39, %c0_40] : memref<32x128xf32, #tpu.memory_space<vmem>>, vector<32x128xf32>
    %90 = arith.truncf %89 : vector<32x128xf32> to vector<32x128xbf16>
    %cst_41 = arith.constant dense<0.000000e+00> : vector<32x128xf32>
    %91 = tpu.matmul %88, %90, %cst_41 {dimension_numbers = #tpu.dot_dimension_numbers<[1], [0], [0], [1], [0, 0, 1, 1], [], []>} : vector<32x32xbf16>, vector<32x128xbf16>, vector<32x128xf32> -> vector<32x128xf32>
    %92 = arith.addf %87, %91 : vector<32x128xf32>
    %c0_42 = arith.constant 0 : index
    %c0_43 = arith.constant 0 : index
    %93 = vector.load %arg15[%c0_42, %c0_43] : memref<1x128xf32, #tpu.memory_space<vmem>>, vector<1x128xf32>
    %94 = vector.broadcast %93 : vector<1x128xf32> to vector<32x128xf32>
    %95 = arith.addf %92, %94 : vector<32x128xf32>
    %96 = tpu.iota {dimensions = array<i32: 0>} : vector<8x32xi32>
    %c0_44 = arith.constant 0 : index
    %c0_45 = arith.constant 0 : index
    %97 = vector.load %arg8[%c0_44, %c0_45] : memref<1x32xi32, #tpu.memory_space<vmem>>, vector<1x32xi32>
    %98 = vector.broadcast %97 : vector<1x32xi32> to vector<8x32xi32>
    %99 = arith.cmpi eq, %96, %98 : vector<8x32xi32>
    %100 = vector.broadcast %5 : vector<1x32xi1> to vector<8x32xi1>
    %101 = arith.andi %99, %100 : vector<8x32xi1>
    %102 = arith.extui %101 : vector<8x32xi1> to vector<8x32xi32>
    %103 = arith.sitofp %102 : vector<8x32xi32> to vector<8x32xf32>
    %cst_46 = arith.constant dense<0.000000e+00> : vector<8xf32>
    %104 = vector.multi_reduction <add>, %103, %cst_46 [1] : vector<8x32xf32> to vector<8xf32>
    %105 = vector.shape_cast %104 : vector<8xf32> to vector<8x1xf32>
    %cst_47 = arith.constant 1.000000e+00 : f32
    %106 = vector.broadcast %cst_47 : f32 to vector<8x1xf32>
    %107 = arith.maximumf %105, %106 : vector<8x1xf32>
    %108 = vector.broadcast %107 : vector<8x1xf32> to vector<8x32xf32>
    %109 = arith.divf %103, %108 : vector<8x32xf32>
    %cst_48 = arith.constant dense<0.000000e+00> : vector<8x128xf32>
    %110 = tpu.matmul %109, %95, %cst_48 {dimension_numbers = #tpu.dot_dimension_numbers<[1], [0], [0], [1], [0, 0, 1, 1], [], []>} : vector<8x32xf32>, vector<32x128xf32>, vector<8x128xf32> -> vector<8x128xf32>
    %111 = vector.extract_strided_slice %110 {offsets = [0, 0], sizes = [2, 32], strides = [1, 1]} : vector<8x128xf32> to vector<2x32xf32>
    %c0_49 = arith.constant 0 : index
    %c0_50 = arith.constant 0 : index
    %112 = vector.load %arg19[%c0_49, %c0_50] : memref<1x32xf32, #tpu.memory_space<vmem>>, vector<1x32xf32>
    %c32 = arith.constant 32 : index
    %c0_51 = arith.constant 0 : index
    %113 = vector.load %arg2[%c32, %c0_51] : memref<40x128xf32, #tpu.memory_space<vmem>>, vector<2x32xf32>
    %114 = arith.truncf %113 : vector<2x32xf32> to vector<2x32xbf16>
    %c0_52 = arith.constant 0 : index
    %c0_53 = arith.constant 0 : index
    %115 = vector.load %arg16[%c0_52, %c0_53] : memref<32x32xf32, #tpu.memory_space<vmem>>, vector<32x32xf32>
    %116 = arith.truncf %115 : vector<32x32xf32> to vector<32x32xbf16>
    %cst_54 = arith.constant dense<0.000000e+00> : vector<2x32xf32>
    %117 = tpu.matmul %114, %116, %cst_54 {dimension_numbers = #tpu.dot_dimension_numbers<[1], [0], [0], [1], [0, 0, 1, 1], [], []>} : vector<2x32xbf16>, vector<32x32xbf16>, vector<2x32xf32> -> vector<2x32xf32>
    %118 = vector.broadcast %112 : vector<1x32xf32> to vector<2x32xf32>
    %119 = arith.addf %118, %117 : vector<2x32xf32>
    %c32_55 = arith.constant 32 : index
    %c0_56 = arith.constant 0 : index
    %120 = vector.load %arg3[%c32_55, %c0_56] : memref<40x128xf32, #tpu.memory_space<vmem>>, vector<2x32xf32>
    %121 = arith.truncf %120 : vector<2x32xf32> to vector<2x32xbf16>
    %c0_57 = arith.constant 0 : index
    %c0_58 = arith.constant 0 : index
    %122 = vector.load %arg17[%c0_57, %c0_58] : memref<32x32xf32, #tpu.memory_space<vmem>>, vector<32x32xf32>
    %123 = arith.truncf %122 : vector<32x32xf32> to vector<32x32xbf16>
    %cst_59 = arith.constant dense<0.000000e+00> : vector<2x32xf32>
    %124 = tpu.matmul %121, %123, %cst_59 {dimension_numbers = #tpu.dot_dimension_numbers<[1], [0], [0], [1], [0, 0, 1, 1], [], []>} : vector<2x32xbf16>, vector<32x32xbf16>, vector<2x32xf32> -> vector<2x32xf32>
    %125 = arith.addf %119, %124 : vector<2x32xf32>
    %126 = arith.truncf %111 : vector<2x32xf32> to vector<2x32xbf16>
    %c0_60 = arith.constant 0 : index
    %c0_61 = arith.constant 0 : index
    %127 = vector.load %arg18[%c0_60, %c0_61] : memref<32x32xf32, #tpu.memory_space<vmem>>, vector<32x32xf32>
    %128 = arith.truncf %127 : vector<32x32xf32> to vector<32x32xbf16>
    %cst_62 = arith.constant dense<0.000000e+00> : vector<2x32xf32>
    %129 = tpu.matmul %126, %128, %cst_62 {dimension_numbers = #tpu.dot_dimension_numbers<[1], [0], [0], [1], [0, 0, 1, 1], [], []>} : vector<2x32xbf16>, vector<32x32xbf16>, vector<2x32xf32> -> vector<2x32xf32>
    %130 = arith.addf %125, %129 : vector<2x32xf32>
    %cst_63 = arith.constant 0.000000e+00 : f32
    %131 = vector.broadcast %cst_63 : f32 to vector<2x32xf32>
    %132 = arith.maximumf %130, %131 : vector<2x32xf32>
    %133 = arith.truncf %132 : vector<2x32xf32> to vector<2x32xbf16>
    %c0_64 = arith.constant 0 : index
    %c0_65 = arith.constant 0 : index
    %134 = vector.load %arg20[%c0_64, %c0_65] : memref<32x4xf32, #tpu.memory_space<vmem>>, vector<32x4xf32>
    %135 = arith.truncf %134 : vector<32x4xf32> to vector<32x4xbf16>
    %cst_66 = arith.constant dense<0.000000e+00> : vector<2x4xf32>
    %136 = tpu.matmul %133, %135, %cst_66 {dimension_numbers = #tpu.dot_dimension_numbers<[1], [0], [0], [1], [0, 0, 1, 1], [], []>} : vector<2x32xbf16>, vector<32x4xbf16>, vector<2x4xf32> -> vector<2x4xf32>
    %c0_67 = arith.constant 0 : index
    %c0_68 = arith.constant 0 : index
    %137 = vector.load %arg21[%c0_67, %c0_68] : memref<1x4xf32, #tpu.memory_space<vmem>>, vector<1x4xf32>
    %138 = vector.broadcast %137 : vector<1x4xf32> to vector<2x4xf32>
    %139 = arith.addf %136, %138 : vector<2x4xf32>
    %cst_69 = arith.constant dense<0xFF800000> : vector<2xf32>
    %140 = vector.multi_reduction <maximumf>, %139, %cst_69 [1] : vector<2x4xf32> to vector<2xf32>
    %141 = vector.shape_cast %140 : vector<2xf32> to vector<2x1xf32>
    %142 = vector.broadcast %141 : vector<2x1xf32> to vector<2x4xf32>
    %143 = arith.subf %139, %142 : vector<2x4xf32>
    %144 = math.exp %143 : vector<2x4xf32>
    %cst_70 = arith.constant dense<0.000000e+00> : vector<2xf32>
    %145 = vector.multi_reduction <add>, %144, %cst_70 [1] : vector<2x4xf32> to vector<2xf32>
    %146 = vector.shape_cast %145 : vector<2xf32> to vector<2x1xf32>
    %147 = math.log %146 : vector<2x1xf32>
    %148 = vector.broadcast %147 : vector<2x1xf32> to vector<2x4xf32>
    %149 = arith.subf %143, %148 : vector<2x4xf32>
    %c0_71 = arith.constant 0 : index
    %c0_72 = arith.constant 0 : index
    %150 = vector.load %arg22[%c0_71, %c0_72] : memref<2x4xf32, #tpu.memory_space<vmem>>, vector<2x4xf32>
    tpu.vector_store %arg22[%c0_71, %c0_72], %149 {strides = array<i32>} : memref<2x4xf32, #tpu.memory_space<vmem>>, vector<2x4xf32>,
    return
  }
}

</mosaic_0001>

<bundles_post_ra>
// kernel: edgepool_forward.6
= control target key start
LH: loop header
LB: loop body
LE: loop exit
PB: predicated region body
PF: predicated region fallthrough
CT: control target
= control target key end

     0   :  { %18 = vsyncpa [#allocation4], 0  ;;  %s877_s0 = inlined_call_operand.vmem [shape: s32[1,128], index: 0, kind: input, shape index: {}]   ;;  %s878_s1 = inlined_call_operand.vmem [shape: f32[1,128], index: 1, kind: input, shape index: {}]   ;;  %s879_s2 = inlined_call_operand.vmem [shape: s32[1,128], index: 2, kind: input, shape index: {}]   ;;  %s880_s3 = inlined_call_operand.vmem [shape: s32[1,128], index: 3, kind: input, shape index: {}]   ;;  %s881_s4 = inlined_call_operand.vmem [shape: s32[1,128], index: 4, kind: input, shape index: {}]   ;;  %s882_s5 = inlined_call_operand.vmem [shape: s32[1,32], index: 5, kind: input, shape index: {}]   ;;  %s883_s6 = inlined_call_operand.vmem [shape: s32[1,32], index: 6, kind: input, shape index: {}]   ;;  %s884_s7 = inlined_call_operand.vmem [shape: s32[1,32], index: 7, kind: output, shape index: {0}]   ;;  %s885_s8 = inlined_call_operand.vmem [shape: f32[1,32], index: 8, kind: output, shape index: {1}]   ;;  %s886_s9 = inlined_call_operand.vmem [shape: s32[1,32], index: 9, kind: output, shape index: {2}]   ;;  %s887_s10 = inlined_call_operand.vmem [shape: s32[1,32], index: 10, kind: output, shape index: {3}]   ;;  %s888_s11 = inlined_call_operand.vmem [shape: s32[1,128], index: 11, kind: output, shape index: {4}]   ;;  %s889_s12 = inlined_call_operand.vmem [shape: s32[1,128], index: 12, kind: output, shape index: {5}]  }
   0x1   :  { %19 = vsyncpa [#allocation7], 0 }
   0x2   :  { %20 = vsyncpa [#allocation10], 0 }
   0x3   :  { %21 = vsyncpa [#allocation13], 0 }
   0x4   :  { %22 = vsyncpa [#allocation5], 0 }
   0x5   :  { %23 = vsyncpa [#allocation17], 0 }
   0x6   :  { %24 = vsyncpa [#allocation20], 0  ;;  %s42_s23 = sshll.u32 %s878_s1, 4  ;;  %s43_s23 = int_to_ptr.vmem [resolvable:$true] %s42_s23 }
   0x7   :  { %25 = vsyncpa [#allocation23], 0  ;;  %s62_s26 = sshll.u32 %s880_s3, 4  ;;  %s470_s27 = scalar_lea.vmem %s43_s23, 16  ;;  %s63_s26 = int_to_ptr.vmem [resolvable:$true] %s62_s26 }
   0x8   :  { %p471_p0 = scmp.ne.s32.totalorder %s43_s23, %s470_s27  ;;  %p475_p1 = scmp.lt.s32.totalorder %s43_s23, %s43_s23 }
   0x9   :  { %p476_p2 = scmp.lt.s32.totalorder %s470_s27, %s470_s27 }
   0xb   :  { %p477_p3 = por %p476_p2, %p475_p1 }
   0xd   :  { %p478_p4 = pnand %p477_p3, %p471_p0 }
   0xf   :  { %481 = shalt.err (!%p478_p4)
}
  0x10   :  { %s698_s28 = smov [#allocation6]   ;;  %s482_s29 = scalar_lea.vmem %s63_s26, 16 }
  0x11   :  { %45 = dma.vmem_to_smem %s43_s23, 16, %s698_s28, [#allocation7]  }
  0x12   :  { %p483_p5 = scmp.ne.s32.totalorder %s63_s26, %s482_s29  ;;  %p487_p6 = scmp.lt.s32.totalorder %s63_s26, %s63_s26 }
  0x13   :  { %p488_p7 = scmp.lt.s32.totalorder %s482_s29, %s482_s29 }
  0x15   :  { %p489_p8 = por %p488_p7, %p487_p6 }
  0x17   :  { %p490_p9 = pnand %p489_p8, %p483_p5 }
  0x19   :  { %493 = shalt.err (!%p490_p9)
}
  0x1a   :  { %s699_s1 = smov [#allocation9]   ;;  %s82_s13 = sshll.u32 %s882_s5, 4  ;;  %s83_s13 = int_to_ptr.vmem [resolvable:$true] %s82_s13 }
  0x1b   :  { %65 = dma.vmem_to_smem %s63_s26, 16, %s699_s1, [#allocation10]  }
  0x1c   :  { %s32_s16 = sshll.u32 %s877_s0, 4  ;;  %s494_s17 = scalar_lea.vmem %s83_s13, 16  ;;  %s33_s16 = int_to_ptr.vmem [resolvable:$true] %s32_s16 }
  0x1d   :  { %p495_p10 = scmp.ne.s32.totalorder %s83_s13, %s494_s17  ;;  %p499_p11 = scmp.lt.s32.totalorder %s83_s13, %s83_s13 }
  0x1e   :  { %p500_p12 = scmp.lt.s32.totalorder %s494_s17, %s494_s17 }
  0x20   :  { %p501_p13 = por %p500_p12, %p499_p11 }
  0x22   :  { %p502_p0 = pnand %p501_p13, %p495_p10 }
  0x24   :  { %505 = shalt.err (!%p502_p0)
}
  0x25   :  { %s700_s18 = smov [#allocation12]   ;;  %s506_s19 = scalar_lea.vmem %s33_s16, 16 }
  0x26   :  { %85 = dma.vmem_to_smem %s83_s13, 16, %s700_s18, [#allocation13]  }
  0x27   :  { %p507_p1 = scmp.ne.s32.totalorder %s33_s16, %s506_s19  ;;  %p511_p2 = scmp.lt.s32.totalorder %s33_s16, %s33_s16 }
  0x28   :  { %p512_p3 = scmp.lt.s32.totalorder %s506_s19, %s506_s19 }
  0x2a   :  { %p513_p4 = por %p512_p3, %p511_p2 }
  0x2c   :  { %p514_p5 = pnand %p513_p4, %p507_p1 }
  0x2e   :  { %517 = shalt.err (!%p514_p5)
}
  0x2f   :  { %s701_s5 = smov [#allocation3]   ;;  %s52_s21 = sshll.u32 %s879_s2, 4  ;;  %s53_s21 = int_to_ptr.vmem [resolvable:$true] %s52_s21 }
  0x30   :  { %35 = dma.vmem_to_smem %s33_s16, 16, %s701_s5, [#allocation4]  }
  0x31   :  { %s72_s24 = sshll.u32 %s881_s4, 4  ;;  %s518_s25 = scalar_lea.vmem %s53_s21, 16  ;;  %s73_s24 = int_to_ptr.vmem [resolvable:$true] %s72_s24 }
  0x32   :  { %p519_p6 = scmp.ne.s32.totalorder %s53_s21, %s518_s25  ;;  %p523_p7 = scmp.lt.s32.totalorder %s53_s21, %s53_s21 }
  0x33   :  { %p524_p8 = scmp.lt.s32.totalorder %s518_s25, %s518_s25 }
  0x35   :  { %p525_p9 = por %p524_p8, %p523_p7 }
  0x37   :  { %p526_p10 = pnand %p525_p9, %p519_p6 }
  0x39   :  { %529 = shalt.err (!%p526_p10)
}
  0x3a   :  { %s702_s26 = smov [#allocation8]   ;;  %s530_s27 = scalar_lea.vmem %s73_s24, 16 }
  0x3b   :  { %55 = dma.vmem_to_smem %s53_s21, 16, %s702_s26, [#allocation7]  }
  0x3c   :  { %p531_p11 = scmp.ne.s32.totalorder %s73_s24, %s530_s27  ;;  %p535_p12 = scmp.lt.s32.totalorder %s73_s24, %s73_s24 }
  0x3d   :  { %p536_p13 = scmp.lt.s32.totalorder %s530_s27, %s530_s27 }
  0x3f   :  { %p537_p0 = por %p536_p13, %p535_p12 }
  0x41   :  { %p538_p1 = pnand %p537_p0, %p531_p11 }
  0x43   :  { %541 = shalt.err (!%p538_p1)
}
  0x44   :  { %s703_s2 = smov [#allocation11]   ;;  %s92_s29 = sshll.u32 %s883_s6, 4  ;;  %s93_s29 = int_to_ptr.vmem [resolvable:$true] %s92_s29 }
  0x45   :  { %75 = dma.vmem_to_smem %s73_s24, 16, %s703_s2, [#allocation10]  }
  0x46   :  { %s542_s1 = scalar_lea.vmem %s93_s29, 16  ;;  %p547_p3 = scmp.lt.s32.totalorder %s93_s29, %s93_s29 }
  0x47   :  { %p543_p2 = scmp.ne.s32.totalorder %s93_s29, %s542_s1  ;;  %p548_p4 = scmp.lt.s32.totalorder %s542_s1, %s542_s1 }
  0x49   :  { %p549_p5 = por %p548_p4, %p547_p3 }
  0x4b   :  { %p550_p6 = pnand %p549_p5, %p543_p2 }
  0x4d   :  { %553 = shalt.err (!%p550_p6)
}
  0x4e   :  { %s704_s3 = smov [#allocation14]  }
  0x4f   :  { %95 = dma.vmem_to_smem %s93_s29, 16, %s704_s3, [#allocation13]  }
  0x50   :  { %654 = dma.done.wait [#allocation4], 16  }
  0x51   :  { %655 = vsyncadd [#allocation4], 4294967280 }
  0x52   :  { %656 = dma.done.wait [#allocation7], 32  }
  0x53   :  { %657 = vsyncadd [#allocation7], 4294967264 }
  0x54   :  { %658 = dma.done.wait [#allocation10], 32  }
  0x55   :  { %659 = vsyncadd [#allocation10], 4294967264 }
  0x56   :  { %660 = dma.done.wait [#allocation13], 32  }
  0x57   :  { %661 = vsyncadd [#allocation13], 4294967264 }
  0x58   :  { %117 = sfence }
  0x59   :  { %s670_s6 = smov 0  }
  0x5a LB: > { %s124_s30 = sld [smem:[#allocation12 + %s672_s6]]  ;;  %s127_s13 = scalar_lea.smem [#allocation15], %s672_s6  ;;  %s672_s6 = sphi %s670_s6, %s123_s6  }
  0x5b   : > { %s705_s14 = smov 0   ;;  %s132_s15 = scalar_lea.smem [#allocation18], %s672_s6 }
  0x5c   : > { %128 = sst [smem:[%s127_s13]] %s705_s14  ;;  %s134_s16 = scalar_lea.smem [#allocation19], %s672_s6 }
  0x5d   : > { %133 = sst [smem:[%s132_s15]] %s705_s14  ;;  %s125_s17 = scalar_lea.smem [#allocation2], %s672_s6 }
  0x5e   : > { %135 = sst [smem:[%s134_s16]] %s705_s14  ;;  %s130_s19 = scalar_lea.smem [#allocation16], %s672_s6 }
  0x5f   : > { %s123_s6 = sadd.s32 1, %s672_s6  }
  0x60   : > { %126 = sst [smem:[%s125_s17]] %s124_s30  ;;  %s129_s18 = scvt.s32.f32 %s124_s30 }
  0x61   : > { %p120_p7 = scmp.ge.s32.totalorder %s123_s6, 32  }
  0x62   : > { %131 = sst [smem:[%s130_s19]] %s129_s18  ;;  %s800_s5 = smov (%p120_p7), 0  }
  0x63   :  { %122 = sbr.rel (!%p120_p7) target bundleno = 90 (0x5a), region = 181  ;;  %s802_s0 = smov (%p120_p7), 0  }
  0x68 LB: > { %s143_s20 = sld [smem:[#allocation3 + %s680_s0]]  ;;  %s706_s28 = smov 0   ;;  %s680_s0 = sphi %s802_s0, %s141_s0   ;;  %s676_s5 = sphi %s800_s5, %s891_s5  }
  0x69   : > { %s166_s17 = scalar_lea.smem [#allocation18], %s676_s5  ;;  %s141_s0 = sadd.s32 1, %s680_s0  }
  0x6a   : > { %p138_p3 = scmp.ge.s32.totalorder %s141_s0, 128  }
  0x6e   : > { %s811_s21 = sld [smem:[#allocation8 + %s143_s20]] }
  0x6f   : > { %s813_s22 = sld [smem:[#allocation9 + %s143_s20]] }
  0x70   : > { %s146_s23 = sld [smem:[#allocation11 + %s143_s20]] }
  0x74   : > { %s148_s24 = sld [smem:[#allocation2 + %s811_s21]]  ;;  %s159_s27 = scalar_lea.smem [#allocation15], %s811_s21 }
  0x75   : > { %s152_s25 = sld [smem:[#allocation2 + %s813_s22]]  ;;  %p396_p0 = scmp.ne.s32.totalorder %s811_s21, %s813_s22 }
  0x76   : > { %p147_p8 = scmp.eq.s32.totalorder %s146_s23, 1  ;;  %s163_s4 = scalar_lea.smem [#allocation2], %s811_s21 }
  0x77   : > { %s172_s6 = scalar_lea.smem [#allocation15], %s813_s22  ;;  %s176_s13 = scalar_lea.smem [#allocation2], %s813_s22 }
  0x78   : > { %s161_s14 = scalar_lea.smem [#allocation16], %s811_s21  ;;  %s174_s15 = scalar_lea.smem [#allocation16], %s813_s22 }
  0x7a   : > { %p149_p9 = scmp.eq.s32.totalorder %s148_s24, 1 }
  0x7b   : > { %p153_p11 = scmp.eq.s32.totalorder %s152_s25, 1 }
  0x7c   : > { %p150_p10 = pnand %p149_p9, %p147_p8 }
  0x7e   : > { %p151_p12 = pneg %p150_p10 }
  0x80   : > { %p817_p13 = pnand %p153_p11, %p151_p12 }
  0x82   : > { %p374_p1 = pneg %p817_p13  ;;  %377 = sst [smem:[%s159_s27]] (!%p817_p13), %s676_s5 }
  0x83   : > { %s392_s2 = scalar_select %p817_p13, [#allocation25], [#allocation6] }
  0x84   : > { %s893_s20 = smov (%p817_p13, %s143_s20), 0  ;;  %379 = sst [smem:[%s163_s4]] (!%p817_p13), %s706_s28 }
  0x85   : > { %p383_p2 = pnand %p396_p0, %p374_p1  ;;  %s158_s29 = sld [smem:[%s392_s2 + %s893_s20]] }
  0x86   : > { %s394_s1 = scalar_select %p817_p13, [#allocation26], [#allocation14] }
  0x87   : > { %s395_s3 = scalar_select %p817_p13, 0, %s811_s21 }
  0x88   : > { %385 = sst [smem:[%s172_s6]] (!%p383_p2), %s676_s5  ;;  %s686_s20 = smov (%p138_p3), 0  }
  0x89   : > { %s165_s30 = sld [smem:[%s394_s1 + %s395_s3]] }
  0x8a   : > { %391 = sst [smem:[%s176_s13]] (!%p383_p2), %s706_s28 }
  0x8b   : > { %378 = sst [smem:[%s161_s14]] (!%p817_p13), %s158_s29 }
  0x8c   : > { %388 = sst [smem:[%s174_s15]] (!%p383_p2), %s158_s29  ;;  %140 = sbr.rel (!%p138_p3) target bundleno = 104 (0x68), region = 192 }
  0x8d   : > { %s362_s16 = scalar_select %p817_p13, 0, 1 }
  0x8f   : > { %382 = sst [smem:[%s166_s17]] (!%p817_p13), %s165_s30  ;;  %s179_s18 = sadd.s32 %s676_s5, %s362_s16  }
  0x90   : > { %s891_s5 = smov %s179_s18  ;;  %s682_s19 = smov (%p138_p3), %s179_s18  }
  0x91 LB: > { %s187_s21 = sld [smem:[#allocation2 + %s688_s20]]  ;;  %s192_s22 = scalar_lea.smem [#allocation15], %s688_s20  ;;  %s688_s20 = sphi %s686_s20, %s185_s20   ;;  %s684_s19 = sphi %s682_s19, %s683_s19  }
  0x92   : > { %s197_s25 = scalar_lea.smem [#allocation2], %s688_s20  ;;  %s707_s26 = smov 0  }
  0x93   : > { %s195_s0 = scalar_lea.smem [#allocation18], %s684_s19 }
  0x97   : > { %p188_p4 = scmp.eq.s32.totalorder %s187_s21, 1 }
  0x99   : > { %369 = sst [smem:[%s192_s22]] (%p188_p4), %s684_s19 }
  0x9a   : > { %s370_s23 = scalar_select %p188_p4, [#allocation14], [#allocation24] }
  0x9b   : > { %s371_s24 = scalar_select %p188_p4, %s688_s20, 0 }
  0x9c   : > { %373 = sst [smem:[%s197_s25]] (%p188_p4), %s707_s26  ;;  %s185_s20 = sadd.s32 1, %s688_s20  }
  0x9d   : > { %s194_s27 = sld [smem:[%s370_s23 + %s371_s24]]  ;;  %p182_p5 = scmp.ge.s32.totalorder %s185_s20, 32  }
  0x9e   : > { %s199_s2 = scalar_select %p188_p4, 1, 0 }
  0x9f   :  { %184 = sbr.rel (!%p182_p5) target bundleno = 145 (0x91), region = 203  ;;  %s690_s5 = smov (%p182_p5), 0  }
  0xa0   : > { %s200_s4 = sadd.s32 %s684_s19, %s199_s2  }
  0xa1   : > { %s683_s19 = smov %s200_s4  }
  0xa3   : > { %372 = sst [smem:[%s195_s0]] (%p188_p4), %s194_s27 }
  0xa4 LB: > { %p207_p6 = scmp.lt.s32.totalorder %s692_s5, %s200_s4  ;;  %s209_s29 = scalar_lea.smem [#allocation19], %s692_s5  ;;  %s692_s5 = sphi %s690_s5, %s206_s5  }
  0xa5   : > { %s206_s5 = sadd.s32 1, %s692_s5  }
  0xa6   : > { %s208_s28 = scalar_select %p207_p6, 1, 0 }
  0xa7   : > { %p203_p7 = scmp.ge.s32.totalorder %s206_s5, 32  }
  0xa8   : > { %210 = sst [smem:[%s209_s29]] %s208_s28  ;;  %s694_s1 = smov (%p203_p7), 0  }
  0xa9   :  { %205 = sbr.rel (!%p203_p7) target bundleno = 164 (0xa4), region = 214 }
  0xae LB: > { %s217_s3 = sld [smem:[#allocation8 + %s696_s1]]  ;;  %s219_s14 = scalar_lea.smem [#allocation21], %s696_s1  ;;  %s696_s1 = sphi %s694_s1, %s216_s1  }
  0xaf   : > { %s221_s6 = sld [smem:[#allocation9 + %s696_s1]]  ;;  %s223_s15 = scalar_lea.smem [#allocation22], %s696_s1 }
  0xb0   : > { %s216_s1 = sadd.s32 1, %s696_s1  }
  0xb1   : > { %p213_p8 = scmp.ge.s32.totalorder %s216_s1, 128  }
  0xb2   :  { %s241_s18 = sshll.u32 (%p213_p8), %s885_s8, 4  ;;  %s261_s21 = sshll.u32 (%p213_p8), %s887_s10, 4  ;;  %s242_s18 = int_to_ptr.vmem [resolvable:$true] %s241_s18  ;;  %s262_s21 = int_to_ptr.vmem [resolvable:$true] %s261_s21 }
  0xb3   :  { %s554_s22 = scalar_lea.vmem (%p213_p8), %s242_s18, 16  ;;  %p559_p10 = scmp.lt.s32.totalorder (%p213_p8), %s242_s18, %s242_s18 }
  0xb4   : > { %s218_s30 = sld [smem:[#allocation15 + %s217_s3]]  ;;  %p555_p9 = scmp.ne.s32.totalorder (%p213_p8), %s242_s18, %s554_s22 }
  0xb5   : > { %s222_s13 = sld [smem:[#allocation15 + %s221_s6]]  ;;  %p560_p11 = scmp.lt.s32.totalorder (%p213_p8), %s554_s22, %s554_s22 }
  0xb7   :  { %215 = sbr.rel (!%p213_p8) target bundleno = 174 (0xae), region = 225  ;;  %p561_p12 = por (%p213_p8), %p560_p11, %p559_p10 }
  0xb9   :  { %p562_p13 = pnand (%p213_p8), %p561_p12, %p555_p9 }
  0xba   : > { %220 = sst [smem:[%s219_s14]] %s218_s30 }
  0xbb   : > { %224 = sst [smem:[%s223_s15]] %s222_s13 }
  0xbc   :  { %565 = shalt.err (!%p562_p13)
}
  0xbd   :  { %s708_s23 = smov [#allocation16]   ;;  %s566_s24 = scalar_lea.vmem %s262_s21, 16 }
  0xbe   :  { %244 = dma.smem_to_vmem %s708_s23, 16, %s242_s18, [#allocation17]  }
  0xbf   :  { %p567_p0 = scmp.ne.s32.totalorder %s262_s21, %s566_s24  ;;  %p571_p1 = scmp.lt.s32.totalorder %s262_s21, %s262_s21 }
  0xc0   :  { %p572_p2 = scmp.lt.s32.totalorder %s566_s24, %s566_s24 }
  0xc2   :  { %p573_p3 = por %p572_p2, %p571_p1 }
  0xc4   :  { %p574_p4 = pnand %p573_p3, %p567_p0 }
  0xc6   :  { %577 = shalt.err (!%p574_p4)
}
  0xc7   :  { %s709_s8 = smov [#allocation19]   ;;  %s231_s26 = sshll.u32 %s884_s7, 4  ;;  %s232_s26 = int_to_ptr.vmem [resolvable:$true] %s231_s26 }
  0xc8   :  { %264 = dma.smem_to_vmem %s709_s8, 16, %s262_s21, [#allocation20]  }
  0xc9   :  { %s251_s4 = sshll.u32 %s886_s9, 4  ;;  %s578_s0 = scalar_lea.vmem %s232_s26, 16  ;;  %s252_s4 = int_to_ptr.vmem [resolvable:$true] %s251_s4 }
  0xca   :  { %p579_p5 = scmp.ne.s32.totalorder %s232_s26, %s578_s0  ;;  %p583_p6 = scmp.lt.s32.totalorder %s232_s26, %s232_s26 }
  0xcb   :  { %p584_p7 = scmp.lt.s32.totalorder %s578_s0, %s578_s0 }
  0xcd   :  { %p585_p8 = por %p584_p7, %p583_p6 }
  0xcf   :  { %p586_p9 = pnand %p585_p8, %p579_p5 }
  0xd1   :  { %589 = shalt.err (!%p586_p9)
}
  0xd2   :  { %s710_s5 = smov [#allocation15]   ;;  %s590_s28 = scalar_lea.vmem %s252_s4, 16 }
  0xd3   :  { %234 = dma.smem_to_vmem %s710_s5, 16, %s232_s26, [#allocation5]  }
  0xd4   :  { %p591_p10 = scmp.ne.s32.totalorder %s252_s4, %s590_s28  ;;  %p595_p11 = scmp.lt.s32.totalorder %s252_s4, %s252_s4 }
  0xd5   :  { %p596_p12 = scmp.lt.s32.totalorder %s590_s28, %s590_s28 }
  0xd7   :  { %p597_p13 = por %p596_p12, %p595_p11 }
  0xd9   :  { %p598_p0 = pnand %p597_p13, %p591_p10 }
  0xdb   :  { %601 = shalt.err (!%p598_p0)
}
  0xdc   :  { %s711_s7 = smov [#allocation18]   ;;  %s271_s1 = sshll.u32 %s888_s11, 4  ;;  %s272_s1 = int_to_ptr.vmem [resolvable:$true] %s271_s1 }
  0xdd   :  { %254 = dma.smem_to_vmem %s711_s7, 16, %s252_s4, [#allocation17]  }
  0xde   :  { %s281_s30 = sshll.u32 %s889_s12, 4  ;;  %s602_s13 = scalar_lea.vmem %s272_s1, 16  ;;  %s282_s30 = int_to_ptr.vmem [resolvable:$true] %s281_s30 }
  0xdf   :  { %p603_p1 = scmp.ne.s32.totalorder %s272_s1, %s602_s13  ;;  %p607_p2 = scmp.lt.s32.totalorder %s272_s1, %s272_s1 }
  0xe0   :  { %p608_p3 = scmp.lt.s32.totalorder %s602_s13, %s602_s13 }
  0xe2   :  { %p609_p4 = por %p608_p3, %p607_p2 }
  0xe4   :  { %p610_p5 = pnand %p609_p4, %p603_p1 }
  0xe6   :  { %613 = shalt.err (!%p610_p5)
}
  0xe7   :  { %s712_s14 = smov [#allocation21]   ;;  %s614_s15 = scalar_lea.vmem %s282_s30, 16 }
  0xe8   :  { %274 = dma.smem_to_vmem %s712_s14, 16, %s272_s1, [#allocation20]  }
  0xe9   :  { %p615_p6 = scmp.ne.s32.totalorder %s282_s30, %s614_s15  ;;  %p619_p7 = scmp.lt.s32.totalorder %s282_s30, %s282_s30 }
  0xea   :  { %p620_p8 = scmp.lt.s32.totalorder %s614_s15, %s614_s15 }
  0xec   :  { %p621_p9 = por %p620_p8, %p619_p7 }
  0xee   :  { %p622_p10 = pnand %p621_p9, %p615_p6 }
  0xf0   :  { %625 = shalt.err (!%p622_p10)
}
  0xf1   :  { %s713_s11 = smov [#allocation22]  }
  0xf2   :  { %284 = dma.smem_to_vmem %s713_s11, 16, %s282_s30, [#allocation23]  }
  0xf3   :  { %662 = dma.done.wait [#allocation5], 16  }
  0xf4   :  { %663 = vsyncadd [#allocation5], 4294967280 }
  0xf5   :  { %664 = dma.done.wait [#allocation17], 32  }
  0xf6   :  { %665 = vsyncadd [#allocation17], 4294967264 }
  0xf7   :  { %666 = dma.done.wait [#allocation20], 32  }
  0xf8   :  { %667 = vsyncadd [#allocation20], 4294967264 }
  0xf9   :  { %668 = dma.done.wait [#allocation23], 16  }
  0xfa   :  { %669 = vsyncadd [#allocation23], 4294967280 }
  0xfb   :  { %303 = sfence }
  0xfc   :  { %304 = vsyncpa [#allocation4], 1 }
  0xfd   :  { %305 = vsyncpa [#allocation7], 1 }
  0xfe   :  { %306 = vsyncpa [#allocation10], 1 }
  0xff   :  { %307 = vsyncpa [#allocation13], 1 }
 0x100   :  { %308 = vsyncpa [#allocation5], 1 }
 0x101   :  { %309 = vsyncpa [#allocation17], 1 }
 0x102   :  { %310 = vsyncpa [#allocation20], 1 }
 0x103   :  { %311 = vsyncpa [#allocation23], 1 }

// kernel: edgepool_forward.5
= control target key start
LH: loop header
LB: loop body
LE: loop exit
PB: predicated region body
PF: predicated region fallthrough
CT: control target
= control target key end

     0   :  { %v62_v0 = vlaneseq  ;;  %v1198_v2 = vmov 0   ;;  %v1199_v14 = vmov 1.0   ;;  %v1200_v33 = vmov 0.0   ;;  %s1687_s1 = inlined_call_operand.vmem [shape: s32[1,128], index: 1, kind: input, shape index: {}]   ;;  %s1688_s3 = inlined_call_operand.vmem [shape: s32[1,128], index: 3, kind: input, shape index: {}]   ;;  %s1689_s2 = inlined_call_operand.vmem [shape: s32[1,128], index: 2, kind: input, shape index: {}]   ;;  %s1690_s6 = inlined_call_operand.vmem [shape: f32[16,32], index: 6, kind: input, shape index: {}]   ;;  %s1691_s0 = inlined_call_operand.vmem [shape: f32[32,16], index: 0, kind: input, shape index: {}]   ;;  %s1692_s4 = inlined_call_operand.vmem [shape: s32[1,32], index: 4, kind: input, shape index: {}]   ;;  %s1693_s8 = inlined_call_operand.vmem [shape: f32[32,32], index: 8, kind: input, shape index: {}]   ;;  %s1694_s7 = inlined_call_operand.vmem [shape: f32[1,32], index: 7, kind: input, shape index: {}]   ;;  %s1695_s10 = inlined_call_operand.vmem [shape: f32[32,128], index: 10, kind: input, shape index: {}]   ;;  %s1696_s11 = inlined_call_operand.vmem [shape: f32[32,128], index: 11, kind: input, shape index: {}]   ;;  %s1697_s13 = inlined_call_operand.vmem [shape: f32[128,2], index: 13, kind: input, shape index: {}]   ;;  %s1698_s9 = inlined_call_operand.vmem [shape: f32[1,32], index: 9, kind: input, shape index: {}]   ;;  %s1699_s12 = inlined_call_operand.vmem [shape: f32[1,128], index: 12, kind: input, shape index: {}]   ;;  %s1700_s15 = inlined_call_operand.vmem [shape: f32[40,128], index: 15, kind: output, shape index: {0}]   ;;  %s1701_s14 = inlined_call_operand.<no memory space> [shape: f32[1,1], index: 14, kind: input, shape index: {}]   ;;  %s1702_s5 = inlined_call_operand.vmem [shape: s32[1,32], index: 5, kind: input, shape index: {}]   ;;  %s1703_s16 = inlined_call_operand.vmem [shape: f32[1,128], index: 16, kind: output, shape index: {1}]   ;;  %s1704_s17 = inlined_call_operand.vmem [shape: f32[1,128], index: 17, kind: output, shape index: {2}]  }
   0x1   :  { %1705 = sst [smem:[#allocation3_spill]] %s1687_s1  ;;  %1178 = vset.pattern.permute.xlu1 %v1198_v2  ;;  %1180 = vset.pattern.permute.xlu0 %v1198_v2  ;;  %v1000_v11 = vld [vmem:[%s1689_s2] ss:$0 sm:$0xff]  ;;  %v262_v20 = vld [vmem:[%s1690_s6 + $0x8] sm:$0xff]  ;;  %v257_v27 = vld [vmem:[%s1691_s0 + $0x10] sm:$0xff] }
   0x2   :  { %1706 = sst [smem:[#allocation4_spill]] %s1688_s3  ;;  %v1302_v3 = vshrl.u32 %v62_v0, 7  ;;  %v261_v19 = vld [vmem:[%s1690_s6] sm:$0xff]  ;;  %v256_v25 = vld [vmem:[%s1691_s0 + $0x8] sm:$0xff]  ;;  %v258_v28 = vld [vmem:[%s1691_s0 + $0x18] sm:$0xff]  ;;  %v205_v32 = vand.u32 127, %v62_v0 }
   0x3   :  { %s1707_s26 = sld [smem:[#allocation4_spill]]  ;;  %v263_v21 = vpack.c.bf16 %v262_v20, %v261_v19  ;;  %v255_v24 = vld [vmem:[%s1691_s0] sm:$0xff]  ;;  %v260_v30 = vpack.c.bf16 %v258_v28, %v257_v27 }
   0x4   :  { %s1708_s29 = sld [smem:[#allocation3_spill]]  ;;  %v1311_v6 = vadd.s32 24, %v1302_v3  ;;  %v1314_v7 = vsub.s32 0, %v1302_v3  ;;  %v1317_v8 = vadd.s32 16, %v1302_v3  ;;  %v64_v9 = vadd.s32 8, %v1302_v3 }
   0x5   :  { %vm72_vm7 = vcmp.eq.s32.totalorder %v1302_v3, %v1000_v11  ;;  %v259_v29 = vpack.c.bf16 %v256_v25, %v255_v24  ;;  %v1427_v31 = vld [vmem:[%s1692_s4] sm:$0x1] }
   0x6   :  { %vm73_vm12 = vcmp.eq.s32.totalorder %v64_v9, %v1000_v11  ;;  %vm74_vm13 = vcmp.eq.s32.totalorder %v1317_v8, %v1000_v11 }
   0x9   :  { %v1296_v1 = vld [vmem:[%s1707_s26] sm:$0x1] }
   0xa   :  { %vm57_vm0 = vcmp.ne.s32.totalorder %v1296_v1, 0  ;;  %v1001_v5 = vld [vmem:[%s1708_s29] ss:$0 sm:$0xff] }
   0xb   :  { %v76_v4 = vsel %vm57_vm0, 1, %v1198_v2  ;;  %vm94_vm1 = vcmp.eq.s32.totalorder %v1311_v6, %v1001_v5  ;;  %vm93_vm2 = vcmp.eq.s32.totalorder %v1317_v8, %v1001_v5  ;;  %vm92_vm5 = vcmp.eq.s32.totalorder %v64_v9, %v1001_v5 }
   0xc   :  { %v80_v10 = vrot.slane %v76_v4, %v1314_v7  ;;  %vm91_vm10 = vcmp.eq.s32.totalorder %v1302_v3, %v1001_v5 }
   0xe   :  { %vm1326_vm3 = vcmp.eq.s32.totalorder %v80_v10, 1 }
   0xf   :  { %vm1332_vm4 = vmand %vm94_vm1, %vm1326_vm3  ;;  %vm75_vm1 = vcmp.eq.s32.totalorder %v1311_v6, %v1000_v11 }
  0x10   :  { %1082 = vmatprep.subr.msk.mxu1 %vm1332_vm4, %v1199_v14  ;;  %vm1340_vm6 = vmand %vm93_vm2, %vm1326_vm3 }
  0x11   :  { %1083 = vmatpush3.xpose.msk.msra.mxu1 %vm1332_vm4, %v1199_v14  ;;  %vm1351_vm8 = vmand %vm92_vm5, %vm1326_vm3  ;;  %vm264_vm5 = vcmask 130048  }
  0x12   :  { %1084 = vmatprep.subr.msk.mxu1 %vm1340_vm6, %v1199_v14  ;;  %vm1357_vm9 = vmand %vm72_vm7, %vm1326_vm3  ;;  %vm207_vm7 = vcmp.eq.s32.totalorder %v64_v9, %v205_v32 }
  0x13   :  { %1090 = vmatprep.mubr.msk.f32.mxu1 %vm1357_vm9, %v1199_v14  ;;  %vm1370_vm11 = vmand %vm91_vm10, %vm1326_vm3  ;;  %vm206_vm10 = vcmp.eq.s32.totalorder %v1302_v3, %v205_v32  ;;  %v211_v36 = vsel %vm207_vm7, 1.0, %v1200_v33  ;;  %v1623_v18 = vsel %vm1357_vm9, 1.0, %v1200_v33 }
  0x14   :  { %vm1389_vm14 = vmand %vm73_vm12, %vm1326_vm3  ;;  %v210_v37 = vsel %vm206_vm10, 1.0, %v1200_v33  ;;  %vm209_vm12 = vcmp.eq.s32.totalorder %v1311_v6, %v205_v32 }
  0x15   :  { %1085 = vmatpush3.xpose.msk.msra.mxu1 %vm1340_vm6, %v1199_v14  ;;  %vm1395_vm15 = vmand %vm74_vm13, %vm1326_vm3  ;;  %vm208_vm13 = vcmp.eq.s32.totalorder %v1317_v8, %v205_v32  ;;  %v213_v42 = vsel %vm209_vm12, 1.0, %v1200_v33  ;;  %v1628_v16 = vsel %vm1389_vm14, 1.0, %v1200_v33 }
  0x16   :  { %1086 = vmatprep.subr.msk.mxu1 %vm1351_vm8, %v1199_v14  ;;  %vm1412_vm2 = vmand %vm75_vm1, %vm1326_vm3  ;;  %vm59_vm3 = vcmp.ne.s32.totalorder %v1427_v31, 0  ;;  %v212_v44 = vsel %vm208_vm13, 1.0, %v1200_v33  ;;  %vm228_vm1 = vcmask 261120   ;;  %v1633_v15 = vsel %vm1395_vm15, 1.0, %v1200_v33 }
  0x17   :  { %v999_v34 = vsel %vm59_vm3, 1.0, %v1200_v33 }
  0x18   :  { %v218_v35 = vrot.slane %v999_v34, %v1314_v7  ;;  %v404_v34 = vld [vmem:[%s1693_s8 + $0x10] sm:$0xff] }
  0x19   :  { %1087 = vmatpush3.xpose.msk.msra.mxu1 %vm1351_vm8, %v1199_v14 }
  0x1a   :  { %1088 = vmatprep.subr.msk.mxu1 %vm1370_vm11, %v1199_v14  ;;  %v221_v40 = vmul.f32 %v218_v35, %v211_v36  ;;  %v220_v41 = vmul.f32 %v218_v35, %v210_v37  ;;  %v223_v47 = vmul.f32 %v218_v35, %v213_v42  ;;  %v222_v51 = vmul.f32 %v218_v35, %v212_v44  ;;  %v405_v35 = vld [vmem:[%s1693_s8 + $0x18] sm:$0xff]  ;;  %v402_v37 = vld [vmem:[%s1693_s8] sm:$0xff] }
  0x1b   :  { %v407_v36 = vpack.c.bf16 %v405_v35, %v404_v34  ;;  %v779_v35 = vld [vmem:[%s1697_s13 + $0x70] sm:$0xff] }
  0x1d   :  { %1089 = vmatpush3.xpose.msk.msra.mxu1 %vm1370_vm11, %v1199_v14 }
  0x1e   :  { %1096 = vmatprep.subr.bf16.mxu1 %v263_v21 }
  0x20   :  { %1091 = vmatmul.mubr.msk.f32.vlgmr.msra.gmra.mxu1 %vm1389_vm14, %v1199_v14 }
  0x21   :  { %1093 = vmatprep.mubr.msk.f32.mxu1 %vm1395_vm15, %v1199_v14  ;;  %1097 = vmatpush3.bf16.msra.mxu1 %v263_v21 }
  0x24   :  { %1094 = vmatmul.mubr.msk.f32.gmra.mxu1 %vm1412_vm2, %v1199_v14 }
  0x25   :  { %1098 = vmatprep.mubr.msk.bf16.mxu1 %vm264_vm5, %v259_v29 }
  0x28   :  { %1099 = vmatmul.mubr.msk.bf16.vlgmr.msra.gmra.mxu1 %vm264_vm5, %v260_v30 }
  0xe0   :  { %v1092_v38 = vpop.f32.mrf.mxu1 }
  0xe1   :  { %v201_v39 = vmin.f32 %v1092_v38, 1.0  ;;  %v403_v38 = vld [vmem:[%s1693_s8 + $0x8] sm:$0xff] }
  0xe2   :  { %v181_v43 = vpop.f32.mrf.mxu1 }
  0xe3   :  { %v200_v45 = vmin.f32 %v181_v43, 1.0  ;;  %v225_v48 = vmax.f32 %v201_v39, %v221_v40  ;;  %v406_v39 = vpack.c.bf16 %v403_v38, %v402_v37  ;;  %v777_v37 = vld [vmem:[%s1697_s13 + $0x60] sm:$0xff] }
  0xe4   :  { %v1095_v46 = vpop.f32.mrf.mxu1 }
  0xe5   :  { %v203_v49 = vmin.f32 %v1095_v46, 1.0  ;;  %v224_v50 = vmax.f32 %v200_v45, %v220_v41  ;;  %v232_v58 = vsel %vm228_vm1, %v225_v48, 0.0  ;;  %v1022_v45 = vld [vmem:[%s1694_s7] ss:$0 sm:$0xff] }
  0xe6   :  { %v191_v52 = vpop.f32.mrf.mxu1 }
  0xe7   :  { %v202_v53 = vmin.f32 %v191_v52, 1.0  ;;  %v229_v54 = vsel %vm228_vm1, %v224_v50, 0.0  ;;  %v253_v55 = vpack.c.bf16 %v225_v48, %v224_v50  ;;  %v227_v57 = vmax.f32 %v203_v49, %v223_v47 }
  0xe8   :  { %230 = vadd.xlane.f32.xlu1 %v229_v54  ;;  %v1100_v5 = vpop.f32.mrf.mxu1 }
  0xe9   :  { %1106 = vmatprep.mubr.msk.bf16.mxu1 %vm228_vm1, %v253_v55  ;;  %1122 = vmatprep.mubr.msk.bf16.mxu0 %vm228_vm1, %v253_v55  ;;  %v226_v56 = vmax.f32 %v202_v53, %v222_v51  ;;  %v238_v61 = vsel %vm228_vm1, %v227_v57, 0.0 }
  0xea   :  { %v305_v6 = vpop.f32.mrf.mxu1 }
  0xeb   :  { %v235_v59 = vsel %vm228_vm1, %v226_v56, 0.0  ;;  %v1447_v60 = vpack.c.bf16 %v227_v57, %v226_v56 }
  0xec   :  { %233 = vadd.xlane.f32.xlu1 %v232_v58  ;;  %236 = vadd.xlane.f32.xlu0 %v235_v59  ;;  %v1101_v8 = vpop.f32.mrf.mxu1 }
  0xee   :  { %v308_v19 = vpop.f32.mrf.mxu1 }
  0xf0   :  { %239 = vadd.xlane.f32.xlu0 %v238_v61 }
 0x171   :  { %v231_v62 = vpop.xlane.xlu1 %230 }
 0x172   :  { %vm241_vm10 = vcmp.gt.f32.partialorder %v231_v62, 0.0 }
 0x175   :  { %v234_v63 = vpop.xlane.xlu1 %233  ;;  %v237_v0 = vpop.xlane.xlu0 %236 }
 0x176   :  { %1184 = vrsqrt.f32 %v234_v63  ;;  %vm242_vm5 = vcmp.gt.f32.partialorder %v234_v63, 0.0  ;;  %vm243_vm7 = vcmp.gt.f32.partialorder %v237_v0, 0.0 }
 0x177   :  { %1186 = vrsqrt.f32 %v237_v0 }
 0x178   :  { %1188 = vrsqrt.f32 %v231_v62 }
 0x179   :  { %v240_v4 = vpop.xlane.xlu0 %239 }
 0x17a   :  { %1190 = vrsqrt.f32 %v240_v4  ;;  %vm244_vm12 = vcmp.gt.f32.partialorder %v240_v4, 0.0 }
 0x183   :  { %v1185_v9 = vpop.eup %1184 }
 0x184   :  { %v1187_v10 = vpop.eup %1186  ;;  %v1450_v12 = vsel %vm242_vm5, %v1185_v9, 0.0  ;;  %v539_v9 = vld [vmem:[%s1695_s10 + $0x10] sm:$0xff] }
 0x185   :  { %v1189_v11 = vpop.eup %1188  ;;  %v1452_v14 = vsel %vm243_vm7, %v1187_v10, 0.0  ;;  %v321_v28 = vmul.f32 %v308_v19, %v1450_v12  ;;  %v540_v10 = vld [vmem:[%s1695_s10 + $0x18] sm:$0xff] }
 0x186   :  { %v1454_v21 = vsel %vm241_vm10, %v1189_v11, 0.0  ;;  %v322_v25 = vmul.f32 %v1100_v5, %v1452_v14  ;;  %v542_v19 = vpack.c.bf16 %v540_v10, %v539_v9  ;;  %v767_v9 = vld [vmem:[%s1697_s13 + $0x10] sm:$0xff]  ;;  %v768_v10 = vld [vmem:[%s1697_s13 + $0x18] sm:$0xff] }
 0x187   :  { %v1191_v20 = vpop.eup %1190  ;;  %v320_v29 = vmul.f32 %v305_v6, %v1454_v21 }
 0x188   :  { %v1456_v24 = vsel %vm244_vm12, %v1191_v20, 0.0  ;;  %v537_v20 = vld [vmem:[%s1695_s10] sm:$0xff] }
 0x189   :  { %v323_v27 = vmul.f32 %v1101_v8, %v1456_v24  ;;  %v324_v32 = vpack.c.bf16 %v321_v28, %v320_v29  ;;  %v547_v28 = vld [vmem:[%s1696_s11 + $0x10] sm:$0xff]  ;;  %v548_v29 = vld [vmem:[%s1696_s11 + $0x18] sm:$0xff] }
 0x18b   :  { %v325_v30 = vpack.c.bf16 %v323_v27, %v322_v25  ;;  %v538_v25 = vld [vmem:[%s1695_s10 + $0x8] sm:$0xff] }
 0x18c   :  { %v541_v27 = vpack.c.bf16 %v538_v25, %v537_v20  ;;  %v766_v20 = vld [vmem:[%s1697_s13 + $0x8] sm:$0xff] }
 0x18d   :  { %1102 = vmatprep.subr.bf16.mxu1 %v325_v30 }
 0x18e   :  { %1103 = vmatpush3.bf16.msra.mxu1 %v325_v30  ;;  %v550_v30 = vpack.c.bf16 %v548_v29, %v547_v28 }
 0x18f   :  { %1104 = vmatprep.subr.bf16.mxu1 %v324_v32 }
 0x192   :  { %1105 = vmatpush3.bf16.msra.mxu1 %v324_v32  ;;  %v546_v32 = vld [vmem:[%s1696_s11 + $0x8] sm:$0xff] }
 0x193   :  { %1110 = vmatprep.subr.bf16.mxu1 %v407_v36 }
 0x195   :  { %1107 = vmatmul.mubr.msk.bf16.vlgmr.msra.gmra.mxu1 %vm228_vm1, %v1447_v60 }
 0x196   :  { %1111 = vmatpush3.bf16.msra.mxu1 %v407_v36  ;;  %v780_v36 = vld [vmem:[%s1697_s13 + $0x78] sm:$0xff] }
 0x197   :  { %1112 = vmatprep.subr.bf16.mxu1 %v406_v39  ;;  %v788_v38 = vpack.c.bf16 %v780_v36, %v779_v35 }
 0x19a   :  { %1113 = vmatpush3.bf16.msra.mxu1 %v406_v39  ;;  %v778_v39 = vld [vmem:[%s1697_s13 + $0x68] sm:$0xff] }
 0x19b   :  { %1126 = vmatprep.subr.bf16.mxu1 %v550_v30 }
 0x255   :  { %v1108_v40 = vpop.f32.mrf.mxu1 }
 0x256   :  { %v383_v43 = vmul.f32 %v1108_v40, %v1452_v14  ;;  %v787_v40 = vpack.c.bf16 %v778_v39, %v777_v37 }
 0x257   :  { %v366_v41 = vpop.f32.mrf.mxu1 }
 0x258   :  { %v381_v42 = vmul.f32 %v366_v41, %v1454_v21  ;;  %v394_v51 = vadd.f32 %v1022_v45, %v383_v43  ;;  %v775_v41 = vld [vmem:[%s1697_s13 + $0x50] sm:$0xff] }
 0x259   :  { %v1109_v44 = vpop.f32.mrf.mxu1 }
 0x25a   :  { %v384_v46 = vmul.f32 %v1109_v44, %v1456_v24  ;;  %v392_v48 = vadd.f32 %v1022_v45, %v381_v42  ;;  %v398_v56 = vmax.f32 %v394_v51, 0.0  ;;  %v776_v42 = vld [vmem:[%s1697_s13 + $0x58] sm:$0xff]  ;;  %v773_v44 = vld [vmem:[%s1697_s13 + $0x40] sm:$0xff] }
 0x25b   :  { %v369_v47 = vpop.f32.mrf.mxu1  ;;  %v786_v43 = vpack.c.bf16 %v776_v42, %v775_v41 }
 0x25c   :  { %v395_v49 = vadd.f32 %v1022_v45, %v384_v46  ;;  %v382_v50 = vmul.f32 %v369_v47, %v1450_v12  ;;  %v396_v54 = vmax.f32 %v392_v48, 0.0 }
 0x25e   :  { %v393_v52 = vadd.f32 %v1022_v45, %v382_v50  ;;  %v399_v53 = vmax.f32 %v395_v49, 0.0  ;;  %v774_v45 = vld [vmem:[%s1697_s13 + $0x48] sm:$0xff] }
 0x25f   :  { %v785_v46 = vpack.c.bf16 %v774_v45, %v773_v44 }
 0x260   :  { %v397_v55 = vmax.f32 %v393_v52, 0.0  ;;  %v401_v58 = vpack.c.bf16 %v399_v53, %v398_v56  ;;  %v1027_v52 = vld [vmem:[%s1698_s9] ss:$0 sm:$0xff] }
 0x262   :  { %v400_v57 = vpack.c.bf16 %v397_v55, %v396_v54 }
 0x264   :  { %1114 = vmatprep.mubr.msk.bf16.mxu1 %vm228_vm1, %v400_v57 }
 0x265   :  { %1115 = vmatmul.mubr.msk.bf16.vlgmr.msra.gmra.mxu1 %vm228_vm1, %v401_v58 }
 0x266   :  { %1127 = vmatpush3.bf16.msra.mxu1 %v550_v30  ;;  %v1032_v30 = vld [vmem:[%s1699_s12] ss:$0 sm:$0xff] }
 0x325   :  { %v1116_v59 = vpop.f32.mrf.mxu1 }
 0x326   :  { %v465_v63 = vmul.f32 %v1116_v59, %v1452_v14 }
 0x327   :  { %v448_v61 = vpop.f32.mrf.mxu1 }
 0x328   :  { %v463_v5 = vmul.f32 %v448_v61, %v1454_v21 }
 0x329   :  { %v1117_v62 = vpop.f32.mrf.mxu1 }
 0x32a   :  { %v466_v0 = vmul.f32 %v1117_v62, %v1456_v24 }
 0x32b   :  { %v451_v4 = vpop.f32.mrf.mxu1 }
 0x32c   :  { %v464_v6 = vmul.f32 %v451_v4, %v1450_v12  ;;  %v468_v8 = vpack.c.bf16 %v466_v0, %v465_v63 }
 0x32e   :  { %v467_v11 = vpack.c.bf16 %v464_v6, %v463_v5  ;;  %1118 = vmatprep.subr.bf16.mxu0 %v468_v8  ;;  %v769_v5 = vld [vmem:[%s1697_s13 + $0x20] sm:$0xff]  ;;  %v770_v6 = vld [vmem:[%s1697_s13 + $0x28] sm:$0xff] }
 0x32f   :  { %1119 = vmatpush3.bf16.msra.mxu0 %v468_v8  ;;  %v783_v8 = vpack.c.bf16 %v770_v6, %v769_v5 }
 0x330   :  { %1120 = vmatprep.subr.bf16.mxu0 %v467_v11 }
 0x333   :  { %1121 = vmatpush3.bf16.msra.mxu0 %v467_v11  ;;  %v782_v11 = vpack.c.bf16 %v768_v10, %v767_v9 }
 0x334   :  { %1134 = vmatprep.subr.bf16.mxu0 %v542_v19 }
 0x336   :  { %1123 = vmatmul.mubr.msk.bf16.vlgmr.msra.gmra.mxu0 %vm228_vm1, %v1447_v60  ;;  %v545_v60 = vld [vmem:[%s1696_s11] sm:$0xff] }
 0x337   :  { %1135 = vmatpush3.bf16.msra.mxu0 %v542_v19  ;;  %1138 = vmatprep.mubr.msk.bf16.mxu0 %vm228_vm1, %v400_v57  ;;  %v549_v34 = vpack.c.bf16 %v546_v32, %v545_v60  ;;  %v765_v19 = vld [vmem:[%s1697_s13] sm:$0xff] }
 0x338   :  { %1136 = vmatprep.subr.bf16.mxu0 %v541_v27  ;;  %v781_v25 = vpack.c.bf16 %v766_v20, %v765_v19 }
 0x339   :  { %1128 = vmatprep.subr.bf16.mxu1 %v549_v34 }
 0x33a   :  { %1129 = vmatpush3.bf16.msra.mxu1 %v549_v34 }
 0x33b   :  { %1137 = vmatpush3.bf16.msra.mxu0 %v541_v27  ;;  %1142 = vmatprep.subr.mxu1 %v1200_v33 }
 0x33c   :  { %1153 = vmatprep.subr.bf16.mxu0 %v788_v38 }
 0x33e   :  { %1139 = vmatmul.mubr.msk.bf16.vlgmr.msra.gmra.mxu0 %vm228_vm1, %v401_v58 }
 0x33f   :  { %1154 = vmatpush3.bf16.msra.mxu0 %v788_v38 }
 0x340   :  { %1155 = vmatprep.subr.bf16.mxu0 %v787_v40 }
 0x343   :  { %1156 = vmatpush3.bf16.msra.mxu0 %v787_v40 }
 0x344   :  { %1157 = vmatprep.subr.bf16.mxu0 %v786_v43 }
 0x347   :  { %1158 = vmatpush3.bf16.msra.mxu0 %v786_v43 }
 0x348   :  { %1159 = vmatprep.subr.bf16.mxu0 %v785_v46 }
 0x34b   :  { %1160 = vmatpush3.bf16.msra.mxu0 %v785_v46 }
 0x3f6   :  { %v1124_v47 = vpop.f32.mrf.mxu0 }
 0x3f7   :  { %v520_v50 = vmul.f32 %v1124_v47, %v1452_v14 }
 0x3f8   :  { %v503_v48 = vpop.f32.mrf.mxu0 }
 0x3f9   :  { %v518_v49 = vmul.f32 %v503_v48, %v1454_v21  ;;  %v531_v58 = vadd.f32 %v1027_v52, %v520_v50 }
 0x3fa   :  { %v1125_v51 = vpop.f32.mrf.mxu0 }
 0x3fb   :  { %v521_v53 = vmul.f32 %v1125_v51, %v1456_v24  ;;  %v529_v55 = vadd.f32 %v1027_v52, %v518_v49  ;;  %v535_v21 = vmax.f32 %v531_v58, 0.0  ;;  %v771_v24 = vld [vmem:[%s1697_s13 + $0x30] sm:$0xff]  ;;  %v23_v51 = vstv %s1701_s14 }
 0x3fc   :  { %v506_v54 = vpop.f32.mrf.mxu0  ;;  %24 = vst [vmem:[#allocation2] sm:$0x1] %v23_v51  ;;  %v60_v58 = vsel %vm59_vm3, 1, %v1198_v2 }
 0x3fd   :  { %v532_v56 = vadd.f32 %v1027_v52, %v521_v53  ;;  %v519_v57 = vmul.f32 %v506_v54, %v1450_v12  ;;  %v533_v62 = vmax.f32 %v529_v55, 0.0  ;;  %v772_v12 = vld [vmem:[%s1697_s13 + $0x38] sm:$0xff]  ;;  %v1201_v54 = vmov 1  }
 0x3fe   :  { %v784_v4 = vpack.c.bf16 %v772_v12, %v771_v24  ;;  %v1140_v27 = vpop.f32.mrf.mxu0  ;;  %v1008_v12 = vsel %vm1340_vm6, 1.0, %v1200_v33 }
 0x3ff   :  { %v530_v59 = vadd.f32 %v1027_v52, %v519_v57  ;;  %v536_v61 = vmax.f32 %v532_v56, 0.0 }
 0x400   :  { %1161 = vmatprep.subr.bf16.mxu0 %v784_v4  ;;  %v640_v28 = vpop.f32.mrf.mxu0 }
 0x401   :  { %v534_v63 = vmax.f32 %v530_v59, 0.0  ;;  %v544_v14 = vpack.c.bf16 %v536_v61, %v535_v21  ;;  %1162 = vmatpush3.bf16.msra.mxu0 %v784_v4  ;;  %v679_v59 = vrot.slane %v60_v58, %v1314_v7  ;;  %v1033_v61 = vld [vmem:[%s1702_s5] ss:$0 sm:$0xff] }
 0x402   :  { %1163 = vmatprep.subr.bf16.mxu0 %v783_v8  ;;  %v1141_v32 = vpop.f32.mrf.mxu0  ;;  %vm675_vm13 = vcmp.eq.s32.totalorder %v1302_v3, %v1033_v61  ;;  %v1007_v3 = vsel %vm1351_vm8, 1.0, %v1200_v33 }
 0x403   :  { %v543_v0 = vpack.c.bf16 %v534_v63, %v533_v62  ;;  %v901_v57 = vld [vmem:[#allocation2] sm:$0x1]  ;;  %vm680_vm5 = vcmp.eq.s32.totalorder %v679_v59, 1 }
 0x404   :  { %v643_v41 = vpop.f32.mrf.mxu0  ;;  %vm681_vm7 = vmand %vm675_vm13, %vm680_vm5 }
 0x405   :  { %1130 = vmatprep.mubr.msk.bf16.mxu1 %vm228_vm1, %v543_v0  ;;  %1164 = vmatpush3.bf16.msra.mxu0 %v783_v8  ;;  %v1034_v62 = vsel %vm681_vm7, 1.0, %v1200_v33  ;;  %v1009_v8 = vsel %vm1332_vm4, 1.0, %v1200_v33  ;;  %vm1202_vm4 = vmmov 0  }
 0x406   :  { %1131 = vmatmul.mubr.msk.bf16.vlgmr.msra.gmra.mxu1 %vm228_vm1, %v544_v14  ;;  %1165 = vmatprep.subr.bf16.mxu0 %v782_v11  ;;  %v684_v63 = vsel %vm228_vm1, %v1034_v62, 0.0 }
 0x407   :  { %1150 = vmatprep.mubr.msk.f32.mxu1 %vm1202_vm4, %v1200_v33 }
 0x409   :  { %1166 = vmatpush3.bf16.msra.mxu0 %v782_v11 }
 0x40a   :  { %1167 = vmatprep.subr.bf16.mxu0 %v781_v25 }
 0x40d   :  { %1168 = vmatpush3.bf16.msra.mxu0 %v781_v25 }
 0x4c6   :  { %v1132_v29 = vpop.f32.mrf.mxu1 }
 0x4c7   :  { %v649_v60 = vadd.f32 %v1140_v27, %v1132_v29 }
 0x4c8   :  { %v591_v34 = vpop.f32.mrf.mxu1 }
 0x4c9   :  { %v664_v35 = vadd.f32 %v1032_v30, %v649_v60  ;;  %v641_v36 = vadd.f32 %v640_v28, %v591_v34  ;;  %v1640_v28 = vsel %vm1412_vm2, 1.0, %v1200_v33 }
 0x4ca   :  { %v1133_v37 = vpop.f32.mrf.mxu1 }
 0x4cb   :  { %v668_v38 = vmax.f32 %v664_v35, 0.0  ;;  %v662_v39 = vadd.f32 %v1032_v30, %v641_v36  ;;  %v652_v40 = vadd.f32 %v1141_v32, %v1133_v37 }
 0x4cc   :  { %v594_v42 = vpop.f32.mrf.mxu1 }
 0x4cd   :  { %v666_v43 = vmax.f32 %v662_v39, 0.0  ;;  %v665_v44 = vadd.f32 %v1032_v30, %v652_v40  ;;  %v644_v45 = vadd.f32 %v643_v41, %v594_v42  ;;  %984 = vst [vmem:[%s1700_s15 + $0x10] sm:$0xff] %v668_v38 }
 0x4cf   :  { %v669_v46 = vmax.f32 %v665_v44, 0.0  ;;  %v663_v47 = vadd.f32 %v1032_v30, %v644_v45  ;;  %982 = vst [vmem:[%s1700_s15] sm:$0xff] %v666_v43 }
 0x4d1   :  { %v667_v48 = vmax.f32 %v663_v47, 0.0  ;;  %1143 = vmatpush3.msra.mxu1 %v669_v46  ;;  %985 = vst [vmem:[%s1700_s15 + $0x18] sm:$0xff] %v669_v46  ;;  %v764_v50 = vpack.c.bf16 %v669_v46, %v668_v38 }
 0x4d2   :  { %1144 = vmatprep.subr.mxu1 %v1200_v33 }
 0x4d3   :  { %1145 = vmatpush3.msra.mxu1 %v668_v38  ;;  %v763_v49 = vpack.c.bf16 %v667_v48, %v666_v43  ;;  %983 = vst [vmem:[%s1700_s15 + $0x8] sm:$0xff] %v667_v48 }
 0x4d4   :  { %1146 = vmatprep.subr.mxu1 %v1200_v33 }
 0x4d5   :  { %1147 = vmatpush3.msra.mxu1 %v667_v48  ;;  %1169 = vmatprep.mubr.bf16.mxu0 %v763_v49 }
 0x4d6   :  { %1148 = vmatprep.subr.mxu1 %v1200_v33  ;;  %1170 = vmatmul.mubr.bf16.vlgmr.msra.gmra.mxu0 %v764_v50 }
 0x4d7   :  { %1149 = vmatpush3.msra.mxu1 %v666_v43 }
 0x596   :  { %v1171_v52 = vpop.f32.mrf.mxu0 }
 0x597   :  { %850 = vperm.xlu1 %1178, %v1171_v52  }
 0x598   :  { %v823_v53 = vpop.f32.mrf.mxu0 }
 0x599   :  { %840 = vperm.xlu0 %1180, %v823_v53  }
 0x59a   :  { %v1172_v55 = vpop.f32.mrf.mxu0 }
 0x59b   :  { %1179 = vset.pattern.permute.xlu1 %v1201_v54 }
 0x59c   :  { %880 = vperm.xlu1 %1179, %v1171_v52   ;;  %v826_v56 = vpop.f32.mrf.mxu0 }
 0x5a0   :  { %872 = vperm.xlu1 %1179, %v823_v53  }
 0x5a4   :  { %1181 = vset.pattern.permute.xlu1 %v1198_v2 }
 0x5a5   :  { %855 = vperm.xlu1 %1181, %v1172_v55  }
 0x5a9   :  { %845 = vperm.xlu1 %1181, %v826_v56  }
 0x5ad   :  { %1182 = vset.pattern.permute.xlu1 %v1201_v54 }
 0x5ae   :  { %876 = vperm.xlu1 %1182, %v826_v56  }
 0x5b2   :  { %884 = vperm.xlu1 %1182, %v1172_v55  }
 0x5b6   :  { %1183 = vset.pattern.permute.xlu1 %v1198_v2  ;;  %v1006_v2 = vsel %vm1370_vm11, 1.0, %v1200_v33 }
 0x5b7   :  { %904 = vperm.xlu1 %1183, %v901_v57  }
 0x5b8   :  { %685 = vadd.xlane.f32.xlu0 %v684_v63 }
 0x612   :  { %v851_v21 = vpop.permute.xlu1 %850 }
 0x613   :  { %v860_v9 = vmul.f32 %v1008_v12, %v851_v21 }
 0x614   :  { %v841_v24 = vpop.permute.xlu0 %840 }
 0x615   :  { %v858_v5 = vmul.f32 %v1006_v2, %v841_v24 }
 0x617   :  { %v881_v0 = vpop.permute.xlu1 %880 }
 0x618   :  { %v889_v29 = vmul.f32 %v1633_v15, %v881_v0 }
 0x61b   :  { %v873_v14 = vpop.permute.xlu1 %872 }
 0x61c   :  { %v887_v20 = vmul.f32 %v1623_v18, %v873_v14 }
 0x620   :  { %v856_v31 = vpop.permute.xlu1 %855 }
 0x621   :  { %v861_v11 = vmul.f32 %v1009_v8, %v856_v31 }
 0x624   :  { %v846_v4 = vpop.permute.xlu1 %845 }
 0x625   :  { %v859_v6 = vmul.f32 %v1007_v3, %v846_v4 }
 0x627   :  { %v862_v10 = vadd.f32 %v859_v6, %v858_v5 }
 0x629   :  { %v863_v13 = vadd.f32 %v862_v10, %v860_v9  ;;  %v877_v19 = vpop.permute.xlu1 %876 }
 0x62a   :  { %v888_v25 = vmul.f32 %v1628_v16, %v877_v19 }
 0x62b   :  { %v864_v27 = vadd.f32 %v863_v13, %v861_v11 }
 0x62c   :  { %v891_v30 = vadd.f32 %v888_v25, %v887_v20 }
 0x62d   :  { %v865_v60 = vrot.slane %v864_v27, 4  ;;  %v885_v32 = vpop.permute.xlu1 %884 }
 0x62e   :  { %v892_v34 = vadd.f32 %v891_v30, %v889_v29  ;;  %v890_v35 = vmul.f32 %v1640_v28, %v885_v32 }
 0x62f   :  { %v866_v36 = vadd.f32 %v865_v60, %v864_v27 }
 0x630   :  { %v893_v37 = vadd.f32 %v892_v34, %v890_v35 }
 0x631   :  { %v867_v38 = vrot.slane %v866_v36, 2 }
 0x632   :  { %v894_v39 = vrot.slane %v893_v37, 4  ;;  %v905_v45 = vpop.permute.xlu1 %904 }
 0x633   :  { %v868_v41 = vadd.f32 %v867_v38, %v866_v36  ;;  %v910_v49 = vrot.slane %v905_v45, %v1314_v7 }
 0x634   :  { %v895_v40 = vadd.f32 %v894_v39, %v893_v37 }
 0x635   :  { %v869_v44 = vrot.slane %v868_v41, 1 }
 0x636   :  { %v896_v42 = vrot.slane %v895_v40, 2 }
 0x637   :  { %v870_v47 = vadd.f32 %v869_v44, %v868_v41 }
 0x638   :  { %v897_v43 = vadd.f32 %v896_v42, %v895_v40 }
 0x63a   :  { %v898_v46 = vrot.slane %v897_v43, 1 }
 0x63c   :  { %v899_v48 = vadd.f32 %v898_v46, %v897_v43 }
 0x63e   :  { %v900_v50 = vadd.f32 %v899_v48, %v870_v47 }
 0x640   :  { %v911_v51 = vadd.f32 %v910_v49, %v900_v50 }
 0x641   :  { %v686_v56 = vpop.xlane.xlu0 %685 }
 0x642   :  { %v914_v52 = vsel %vm1389_vm14, %v911_v51, -1e+30  ;;  %v913_v53 = vsel %vm1357_vm9, %v911_v51, -1e+30  ;;  %v915_v54 = vsel %vm1395_vm15, %v911_v51, -1e+30 }
 0x643   :  { %919 = vmax.xlane.f32.xlu0 %v914_v52  ;;  %917 = vmax.xlane.f32.xlu1 %v913_v53  ;;  %v916_v55 = vsel %vm1412_vm2, %v911_v51, -1e+30  ;;  %v687_v57 = vmax.f32 %v686_v56, 1.0  ;;  %v912_v10 = vsel %vm57_vm0, %v911_v51, -1e+30 }
 0x645   :  { %1192 = vrcp.f32 %v687_v57 }
 0x647   :  { %921 = vmax.xlane.f32.xlu0 %v915_v54  ;;  %923 = vmax.xlane.f32.xlu1 %v916_v55 }
 0x652   :  { %v1193_v58 = vpop.eup %1192 }
 0x653   :  { %v689_v59 = vmul.f32 %v1193_v58, %v1034_v62 }
 0x655   :  { %1151 = vmatmul.mubr.msk.f32.vlgmr.msra.gmra.mxu1 %vm228_vm1, %v689_v59 }
 0x6cc   :  { %v920_v61 = vpop.xlane.xlu0 %919  ;;  %v918_v63 = vpop.xlane.xlu1 %917 }
 0x6cd   :  { %v926_v21 = vmul.f32 %v1628_v16, %v920_v61  ;;  %v925_v0 = vmul.f32 %v1623_v18, %v918_v63 }
 0x6cf   :  { %v929_v2 = vadd.f32 %v926_v21, %v925_v0 }
 0x6d0   :  { %v922_v14 = vpop.xlane.xlu0 %921  ;;  %v924_v31 = vpop.xlane.xlu1 %923 }
 0x6d1   :  { %v927_v24 = vmul.f32 %v1633_v15, %v922_v14  ;;  %v928_v12 = vmul.f32 %v1640_v28, %v924_v31 }
 0x6d3   :  { %v930_v3 = vadd.f32 %v929_v2, %v927_v24 }
 0x6d5   :  { %v931_v62 = vadd.f32 %v930_v3, %v928_v12 }
 0x6d7   :  { %v932_v4 = vrot.slane %v931_v62, 4 }
 0x6d9   :  { %v933_v5 = vadd.f32 %v932_v4, %v931_v62 }
 0x6db   :  { %v934_v33 = vrot.slane %v933_v5, 2 }
 0x6dd   :  { %v935_v6 = vadd.f32 %v934_v33, %v933_v5 }
 0x6df   :  { %v936_v8 = vrot.slane %v935_v6, 1 }
 0x6e1   :  { %v937_v9 = vadd.f32 %v936_v8, %v935_v6 }
 0x6e3   :  { %v938_v11 = vsel %vm57_vm0, %v937_v9, 0.0 }
 0x6e4   :  { %v939_v13 = vsub.f32 %v912_v10, %v938_v11 }
 0x6e6   :  { %v940_v19 = vmul.f32 1.442695, %v939_v13 }
 0x6e8   :  { %1194 = vpow2.f32 %v940_v19 }
 0x6f5   :  { %v1195_v20 = vpop.eup %1194 }
 0x6f6   :  { %v946_v25 = vrot.slane %v1195_v20, %v1314_v7 }
 0x6f8   :  { %v949_v27 = vsel %vm1389_vm14, %v946_v25, 0.0  ;;  %v948_v29 = vsel %vm1357_vm9, %v946_v25, 0.0  ;;  %v951_v30 = vsel %vm1412_vm2, %v946_v25, 0.0  ;;  %v950_v60 = vsel %vm1395_vm15, %v946_v25, 0.0 }
 0x6f9   :  { %954 = vadd.xlane.f32.xlu1 %v949_v27  ;;  %952 = vadd.xlane.f32.xlu0 %v948_v29 }
 0x6fd   :  { %958 = vadd.xlane.f32.xlu1 %v951_v30  ;;  %956 = vadd.xlane.f32.xlu0 %v950_v60 }
 0x715   :  { %v759_v32 = vpop.f32.mrf.mxu1 }
 0x716   :  { %986 = vst [vmem:[%s1700_s15 + $0x20] sm:$0xff] %v759_v32 }
 0x717   :  { %v1152_v7 = vpop.f32.mrf.mxu1 }
 0x782   :  { %v955_v22 = vpop.xlane.xlu1 %954  ;;  %v953_v34 = vpop.xlane.xlu0 %952 }
 0x783   :  { %v961_v17 = vmul.f32 %v1628_v16, %v955_v22  ;;  %v960_v35 = vmul.f32 %v1623_v18, %v953_v34 }
 0x785   :  { %v964_v37 = vadd.f32 %v961_v17, %v960_v35 }
 0x786   :  { %v959_v36 = vpop.xlane.xlu1 %958  ;;  %v957_v26 = vpop.xlane.xlu0 %956 }
 0x787   :  { %v962_v23 = vmul.f32 %v1633_v15, %v957_v26  ;;  %v963_v38 = vmul.f32 %v1640_v28, %v959_v36 }
 0x789   :  { %v965_v39 = vadd.f32 %v964_v37, %v962_v23 }
 0x78b   :  { %v966_v40 = vadd.f32 %v965_v39, %v963_v38 }
 0x78d   :  { %v967_v41 = vrot.slane %v966_v40, 4 }
 0x78f   :  { %v968_v42 = vadd.f32 %v967_v41, %v966_v40 }
 0x791   :  { %v969_v43 = vrot.slane %v968_v42, 2 }
 0x793   :  { %v970_v44 = vadd.f32 %v969_v43, %v968_v42 }
 0x795   :  { %v971_v45 = vrot.slane %v970_v44, 1 }
 0x797   :  { %v972_v46 = vadd.f32 %v971_v45, %v970_v44 }
 0x799   :  { %vm973_vm6 = vcmp.gt.f32.partialorder %v972_v46, 0.0 }
 0x79a   :  { %v974_v47 = vsel %vm973_vm6, %v972_v46, 1.0 }
 0x79b   :  { %1196 = vrcp.f32 %v974_v47 }
 0x7a8   :  { %v1197_v16 = vpop.eup %1196 }
 0x7a9   :  { %v976_v18 = vmul.f32 %v1197_v16, %v1195_v20 }
 0x7ab   :  { %v977_v48 = vadd.f32 0.5, %v976_v18 }
 0x7ad   :  { %v978_v49 = vsub.f32 0.0, %v977_v48  ;;  %980 = vst [vmem:[%s1703_s16] sm:$0x1] %v977_v48 }
 0x7af   :  { %v979_v15 = vsel %vm57_vm0, %v978_v49, 1e+30 }
 0x7b0   :  { %981 = vst [vmem:[%s1704_s17] sm:$0x1] %v979_v15 }

// kernel: edgepool_forward.7
= control target key start
LH: loop header
LB: loop body
LE: loop exit
PB: predicated region body
PF: predicated region fallthrough
CT: control target
= control target key end

     0   :  { %v68_v0 = vlaneseq  ;;  %v1354_v2 = vmov 0   ;;  %v1355_v14 = vmov 1.0   ;;  %v1356_v40 = vmov 0.0   ;;  %s1880_s3 = inlined_call_operand.vmem [shape: s32[1,128], index: 3, kind: input, shape index: {}]   ;;  %s1881_s5 = inlined_call_operand.vmem [shape: s32[1,128], index: 5, kind: input, shape index: {}]   ;;  %s1882_s4 = inlined_call_operand.vmem [shape: s32[1,128], index: 4, kind: input, shape index: {}]   ;;  %s1883_s2 = inlined_call_operand.vmem [shape: f32[40,128], index: 2, kind: input, shape index: {}]   ;;  %s1884_s0 = inlined_call_operand.vmem [shape: s32[1,32], index: 0, kind: input, shape index: {}]   ;;  %s1885_s1 = inlined_call_operand.vmem [shape: f32[1,32], index: 1, kind: input, shape index: {}]   ;;  %s1886_s8 = inlined_call_operand.vmem [shape: f32[32,32], index: 8, kind: input, shape index: {}]   ;;  %s1887_s6 = inlined_call_operand.vmem [shape: s32[1,32], index: 6, kind: input, shape index: {}]   ;;  %s1888_s10 = inlined_call_operand.vmem [shape: f32[32,32], index: 10, kind: input, shape index: {}]   ;;  %s1889_s9 = inlined_call_operand.vmem [shape: f32[1,32], index: 9, kind: input, shape index: {}]   ;;  %s1890_s12 = inlined_call_operand.vmem [shape: f32[32,128], index: 12, kind: input, shape index: {}]   ;;  %s1891_s13 = inlined_call_operand.vmem [shape: f32[32,128], index: 13, kind: input, shape index: {}]   ;;  %s1892_s15 = inlined_call_operand.vmem [shape: f32[128,2], index: 15, kind: input, shape index: {}]   ;;  %s1893_s11 = inlined_call_operand.vmem [shape: f32[1,32], index: 11, kind: input, shape index: {}]   ;;  %s1894_s14 = inlined_call_operand.vmem [shape: f32[1,128], index: 14, kind: input, shape index: {}]   ;;  %s1895_s17 = inlined_call_operand.vmem [shape: f32[40,128], index: 17, kind: output, shape index: {0}]   ;;  %s1896_s16 = inlined_call_operand.<no memory space> [shape: f32[1,1], index: 16, kind: input, shape index: {}]   ;;  %s1897_s7 = inlined_call_operand.vmem [shape: s32[1,32], index: 7, kind: input, shape index: {}]   ;;  %s1898_s18 = inlined_call_operand.vmem [shape: f32[1,128], index: 18, kind: output, shape index: {1}]   ;;  %s1899_s19 = inlined_call_operand.vmem [shape: f32[1,128], index: 19, kind: output, shape index: {2}]  }
   0x1   :  { %1901 = sst [smem:[#allocation3_spill]] %s1880_s3  ;;  %1334 = vset.pattern.permute.xlu1 %v1354_v2  ;;  %1336 = vset.pattern.permute.xlu0 %v1354_v2  ;;  %v1143_v20 = vld [vmem:[%s1884_s0] ss:$0 sm:$0xff]  ;;  %v386_v32 = vld [vmem:[%s1886_s8 + $0x10] sm:$0xff]  ;;  %v387_v33 = vld [vmem:[%s1886_s8 + $0x18] sm:$0xff] }
   0x2   :  { %1902 = sst [smem:[#allocation4_spill]] %s1881_s5  ;;  %v1468_v3 = vshrl.u32 %v68_v0, 7  ;;  %v1144_v24 = vld [vmem:[%s1885_s1] ss:$0 sm:$0xff]  ;;  %v389_v34 = vpack.c.bf16 %v387_v33, %v386_v32  ;;  %v385_v36 = vld [vmem:[%s1886_s8 + $0x8] sm:$0xff]  ;;  %v211_v39 = vand.u32 127, %v68_v0 }
   0x3   :  { %1903 = sst [smem:[#allocation5_spill]] %s1882_s4  ;;  %v384_v35 = vld [vmem:[%s1886_s8] sm:$0xff] }
   0x4   :  { %1904 = sst [smem:[#allocation6_spill]] %s1883_s2  ;;  %v1477_v6 = vadd.s32 24, %v1468_v3  ;;  %v1480_v7 = vsub.s32 0, %v1468_v3  ;;  %v1483_v8 = vadd.s32 16, %v1468_v3  ;;  %v1486_v9 = vadd.s32 8, %v1468_v3 }
   0x5   :  { %s1905_s20 = sld [smem:[#allocation4_spill]]  ;;  %v388_v37 = vpack.c.bf16 %v385_v36, %v384_v35  ;;  %v1617_v38 = vld [vmem:[%s1887_s6] sm:$0x1] }
   0x6   :  { %s1906_s22 = sld [smem:[#allocation3_spill]] }
   0x7   :  { %s1907_s24 = sld [smem:[#allocation5_spill]] }
   0x8   :  { %s1920_s26 = sld [smem:[#allocation6_spill]] }
   0xb   :  { %v1462_v1 = vld [vmem:[%s1905_s20] sm:$0x1] }
   0xc   :  { %vm63_vm0 = vcmp.ne.s32.totalorder %v1462_v1, 0  ;;  %v1126_v5 = vld [vmem:[%s1906_s22] ss:$0 sm:$0xff] }
   0xd   :  { %v82_v4 = vsel %vm63_vm0, 1, %v1354_v2  ;;  %vm100_vm1 = vcmp.eq.s32.totalorder %v1477_v6, %v1126_v5  ;;  %vm99_vm2 = vcmp.eq.s32.totalorder %v1483_v8, %v1126_v5  ;;  %v1125_v11 = vld [vmem:[%s1907_s24] ss:$0 sm:$0xff]  ;;  %vm98_vm5 = vcmp.eq.s32.totalorder %v1486_v9, %v1126_v5 }
   0xe   :  { %v86_v10 = vrot.slane %v82_v4, %v1480_v7  ;;  %vm78_vm7 = vcmp.eq.s32.totalorder %v1468_v3, %v1125_v11  ;;  %vm97_vm10 = vcmp.eq.s32.totalorder %v1468_v3, %v1126_v5  ;;  %vm79_vm12 = vcmp.eq.s32.totalorder %v1486_v9, %v1125_v11  ;;  %v284_v19 = vld [vmem:[%s1920_s26 + $0x18] sm:$0xff]  ;;  %v283_v23 = vld [vmem:[%s1920_s26 + $0x10] sm:$0xff]  ;;  %v282_v26 = vld [vmem:[%s1920_s26 + $0x8] sm:$0xff] }
   0xf   :  { %vm80_vm13 = vcmp.eq.s32.totalorder %v1483_v8, %v1125_v11  ;;  %v281_v28 = vld [vmem:[%s1920_s26] sm:$0xff] }
  0x10   :  { %vm1494_vm3 = vcmp.eq.s32.totalorder %v86_v10, 1 }
  0x11   :  { %vm1500_vm4 = vmand %vm100_vm1, %vm1494_vm3  ;;  %vm81_vm1 = vcmp.eq.s32.totalorder %v1477_v6, %v1125_v11 }
  0x12   :  { %1222 = vmatprep.subr.msk.mxu1 %vm1500_vm4, %v1355_v14  ;;  %vm1509_vm6 = vmand %vm99_vm2, %vm1494_vm3  ;;  %vm266_vm2 = vcmp.eq.s32.totalorder %v1468_v3, %v1143_v20 }
  0x13   :  { %1223 = vmatpush3.xpose.msk.msra.mxu1 %vm1500_vm4, %v1355_v14  ;;  %vm1520_vm8 = vmand %vm98_vm5, %vm1494_vm3  ;;  %v277_v27 = vsel %vm266_vm2, %v1144_v24, 0.0  ;;  %vm212_vm2 = vcmp.eq.s32.totalorder %v1468_v3, %v211_v39 }
  0x14   :  { %1224 = vmatprep.subr.msk.mxu1 %vm1509_vm6, %v1355_v14  ;;  %vm1526_vm9 = vmand %vm78_vm7, %vm1494_vm3  ;;  %vm234_vm7 = vcmask 261120   ;;  %v216_v44 = vsel %vm212_vm2, 1.0, %v1356_v40 }
  0x15   :  { %1230 = vmatprep.mubr.msk.f32.mxu1 %vm1526_vm9, %v1355_v14  ;;  %vm1539_vm11 = vmand %vm97_vm10, %vm1494_vm3  ;;  %vm267_vm10 = vcmp.eq.s32.totalorder %v1486_v9, %v1143_v20  ;;  %v1816_v18 = vsel %vm1526_vm9, 1.0, %v1356_v40 }
  0x16   :  { %vm1559_vm14 = vmand %vm79_vm12, %vm1494_vm3  ;;  %vm268_vm12 = vcmp.eq.s32.totalorder %v1483_v8, %v1143_v20  ;;  %v278_v29 = vsel %vm267_vm10, %v1144_v24, 0.0  ;;  %vm215_vm10 = vcmp.eq.s32.totalorder %v1477_v6, %v211_v39 }
  0x17   :  { %1225 = vmatpush3.xpose.msk.msra.mxu1 %vm1509_vm6, %v1355_v14  ;;  %vm1565_vm15 = vmand %vm80_vm13, %vm1494_vm3  ;;  %v279_v30 = vsel %vm268_vm12, %v1144_v24, 0.0  ;;  %vm65_vm13 = vcmp.ne.s32.totalorder %v1617_v38, 0  ;;  %vm214_vm12 = vcmp.eq.s32.totalorder %v1483_v8, %v211_v39  ;;  %v219_v49 = vsel %vm215_vm10, 1.0, %v1356_v40 }
  0x18   :  { %1226 = vmatprep.subr.msk.mxu1 %vm1520_vm8, %v1355_v14  ;;  %vm1583_vm5 = vmand %vm81_vm1, %vm1494_vm3  ;;  %vm269_vm3 = vcmp.eq.s32.totalorder %v1477_v6, %v1143_v20  ;;  %v1124_v41 = vsel %vm65_vm13, 1.0, %v1356_v40  ;;  %vm213_vm1 = vcmp.eq.s32.totalorder %v1486_v9, %v211_v39  ;;  %v218_v51 = vsel %vm214_vm12, 1.0, %v1356_v40 }
  0x19   :  { %v280_v31 = vsel %vm269_vm3, %v1144_v24, 0.0  ;;  %v224_v42 = vrot.slane %v1124_v41, %v1480_v7  ;;  %v217_v43 = vsel %vm213_vm1, 1.0, %v1356_v40  ;;  %v1821_v16 = vsel %vm1559_vm14, 1.0, %v1356_v40 }
  0x1a   :  { %v1826_v15 = vsel %vm1565_vm15, 1.0, %v1356_v40 }
  0x1b   :  { %1227 = vmatpush3.xpose.msk.msra.mxu1 %vm1520_vm8, %v1355_v14  ;;  %v227_v47 = vmul.f32 %v224_v42, %v217_v43  ;;  %v226_v48 = vmul.f32 %v224_v42, %v216_v44  ;;  %v229_v54 = vmul.f32 %v224_v42, %v219_v49  ;;  %v228_v58 = vmul.f32 %v224_v42, %v218_v51  ;;  %v528_v51 = vld [vmem:[%s1888_s10 + $0x8] sm:$0xff] }
  0x1c   :  { %1228 = vmatprep.subr.msk.mxu1 %vm1539_vm11, %v1355_v14 }
  0x1f   :  { %1229 = vmatpush3.xpose.msk.msra.mxu1 %vm1539_vm11, %v1355_v14 }
  0x20   :  { %1236 = vmatprep.subr.mxu1 %v284_v19 }
  0x22   :  { %1231 = vmatmul.mubr.msk.f32.vlgmr.msra.gmra.mxu1 %vm1559_vm14, %v1355_v14 }
  0x23   :  { %1237 = vmatpush3.msra.mxu1 %v284_v19  ;;  %1233 = vmatprep.mubr.msk.f32.mxu1 %vm1565_vm15, %v1355_v14 }
  0x24   :  { %1238 = vmatprep.subr.mxu1 %v283_v23 }
  0x25   :  { %1239 = vmatpush3.msra.mxu1 %v283_v23 }
  0x26   :  { %1234 = vmatmul.mubr.msk.f32.gmra.mxu1 %vm1583_vm5, %v1355_v14  ;;  %1240 = vmatprep.subr.mxu1 %v282_v26 }
  0x27   :  { %1241 = vmatpush3.msra.mxu1 %v282_v26  ;;  %1244 = vmatprep.mubr.msk.f32.mxu1 %vm234_vm7, %v277_v27 }
  0x28   :  { %1242 = vmatprep.subr.mxu1 %v281_v28 }
  0x29   :  { %1243 = vmatpush3.msra.mxu1 %v281_v28 }
  0x2a   :  { %1245 = vmatmul.mubr.msk.f32.vlgmr.msra.gmra.mxu1 %vm234_vm7, %v278_v29  ;;  %1250 = vmatprep.subr.bf16.mxu1 %v389_v34 }
  0x2b   :  { %1247 = vmatprep.mubr.msk.f32.mxu1 %vm234_vm7, %v279_v30  ;;  %1251 = vmatpush3.bf16.msra.mxu1 %v389_v34 }
  0x2c   :  { %1252 = vmatprep.subr.bf16.mxu1 %v388_v37 }
  0x2e   :  { %1248 = vmatmul.mubr.msk.f32.gmra.mxu1 %vm234_vm7, %v280_v31 }
  0x2f   :  { %1253 = vmatpush3.bf16.msra.mxu1 %v388_v37 }
  0xe2   :  { %v1232_v45 = vpop.f32.mrf.mxu1 }
  0xe3   :  { %v207_v46 = vmin.f32 %v1232_v45, 1.0 }
  0xe4   :  { %v187_v50 = vpop.f32.mrf.mxu1 }
  0xe5   :  { %v206_v52 = vmin.f32 %v187_v50, 1.0  ;;  %v231_v55 = vmax.f32 %v207_v46, %v227_v47  ;;  %v529_v47 = vld [vmem:[%s1888_s10 + $0x10] sm:$0xff]  ;;  %v527_v50 = vld [vmem:[%s1888_s10] sm:$0xff] }
  0xe6   :  { %v1235_v53 = vpop.f32.mrf.mxu1 }
  0xe7   :  { %v209_v56 = vmin.f32 %v1235_v53, 1.0  ;;  %v230_v57 = vmax.f32 %v206_v52, %v226_v48  ;;  %v238_v8 = vsel %vm234_vm7, %v231_v55, 0.0  ;;  %v530_v48 = vld [vmem:[%s1888_s10 + $0x18] sm:$0xff]  ;;  %v531_v52 = vpack.c.bf16 %v528_v51, %v527_v50  ;;  %v902_v50 = vld [vmem:[%s1892_s15 + $0x60] sm:$0xff] }
  0xe8   :  { %v197_v59 = vpop.f32.mrf.mxu1  ;;  %v532_v49 = vpack.c.bf16 %v530_v48, %v529_v47  ;;  %v904_v48 = vld [vmem:[%s1892_s15 + $0x70] sm:$0xff] }
  0xe9   :  { %v208_v60 = vmin.f32 %v197_v59, 1.0  ;;  %v235_v61 = vsel %vm234_vm7, %v230_v57, 0.0  ;;  %v259_v62 = vpack.c.bf16 %v231_v55, %v230_v57  ;;  %v233_v4 = vmax.f32 %v209_v56, %v229_v54 }
  0xea   :  { %236 = vadd.xlane.f32.xlu1 %v235_v61  ;;  %v1246_v63 = vpop.f32.mrf.mxu1  ;;  %1266 = vmatprep.subr.bf16.mxu1 %v532_v49 }
  0xeb   :  { %1262 = vmatprep.mubr.msk.bf16.mxu0 %vm234_vm7, %v259_v62  ;;  %v232_v0 = vmax.f32 %v208_v60, %v228_v58  ;;  %v244_v19 = vsel %vm234_vm7, %v233_v4, 0.0  ;;  %v1153_v58 = vld [vmem:[%s1889_s9] ss:$0 sm:$0xff] }
  0xec   :  { %v363_v5 = vpop.f32.mrf.mxu1 }
  0xed   :  { %v382_v6 = vpack.c.bf16 %v1246_v63, %v363_v5  ;;  %v241_v9 = vsel %vm234_vm7, %v232_v0, 0.0  ;;  %v1637_v10 = vpack.c.bf16 %v233_v4, %v232_v0 }
  0xee   :  { %239 = vadd.xlane.f32.xlu1 %v238_v8  ;;  %242 = vadd.xlane.f32.xlu0 %v241_v9  ;;  %v1249_v11 = vpop.f32.mrf.mxu1 }
  0xef   :  { %1254 = vmatprep.mubr.msk.bf16.mxu1 %vm234_vm7, %v382_v6 }
  0xf0   :  { %v373_v12 = vpop.f32.mrf.mxu1 }
  0xf1   :  { %v383_v14 = vpack.c.bf16 %v1249_v11, %v373_v12 }
  0xf2   :  { %245 = vadd.xlane.f32.xlu0 %v244_v19 }
  0xf3   :  { %1255 = vmatmul.mubr.msk.bf16.vlgmr.msra.gmra.mxu1 %vm234_vm7, %v383_v14 }
  0xf4   :  { %1267 = vmatpush3.bf16.msra.mxu1 %v532_v49  ;;  %v905_v49 = vld [vmem:[%s1892_s15 + $0x78] sm:$0xff] }
  0xf5   :  { %1268 = vmatprep.subr.bf16.mxu1 %v531_v52  ;;  %v913_v51 = vpack.c.bf16 %v905_v49, %v904_v48 }
  0xf8   :  { %1269 = vmatpush3.bf16.msra.mxu1 %v531_v52  ;;  %v903_v52 = vld [vmem:[%s1892_s15 + $0x68] sm:$0xff] }
 0x173   :  { %v237_v23 = vpop.xlane.xlu1 %236 }
 0x174   :  { %vm247_vm2 = vcmp.gt.f32.partialorder %v237_v23, 0.0 }
 0x177   :  { %v243_v20 = vpop.xlane.xlu0 %242  ;;  %v240_v26 = vpop.xlane.xlu1 %239 }
 0x178   :  { %1340 = vrsqrt.f32 %v243_v20  ;;  %vm249_vm3 = vcmp.gt.f32.partialorder %v243_v20, 0.0  ;;  %vm248_vm10 = vcmp.gt.f32.partialorder %v240_v26, 0.0 }
 0x17b   :  { %v246_v24 = vpop.xlane.xlu0 %245 }
 0x17c   :  { %1342 = vrsqrt.f32 %v246_v24  ;;  %vm250_vm1 = vcmp.gt.f32.partialorder %v246_v24, 0.0 }
 0x17d   :  { %1344 = vrsqrt.f32 %v237_v23 }
 0x17e   :  { %1346 = vrsqrt.f32 %v240_v26 }
 0x185   :  { %v1341_v27 = vpop.eup %1340 }
 0x186   :  { %v1642_v33 = vsel %vm249_vm3, %v1341_v27, 0.0 }
 0x189   :  { %v1343_v29 = vpop.eup %1342 }
 0x18a   :  { %v1345_v30 = vpop.eup %1344  ;;  %v1644_v34 = vsel %vm250_vm1, %v1343_v29, 0.0 }
 0x18b   :  { %v1347_v32 = vpop.eup %1346  ;;  %v1648_v39 = vsel %vm247_vm2, %v1345_v30, 0.0  ;;  %v664_v30 = vld [vmem:[%s1890_s12 + $0x10] sm:$0xff] }
 0x18c   :  { %v1650_v41 = vsel %vm248_vm10, %v1347_v32, 0.0 }
 0x1b3   :  { %v1256_v28 = vpop.f32.mrf.mxu1 }
 0x1b4   :  { %v447_v36 = vmul.f32 %v1256_v28, %v1642_v33 }
 0x1b5   :  { %v430_v31 = vpop.f32.mrf.mxu1 }
 0x1b6   :  { %v445_v43 = vmul.f32 %v430_v31, %v1648_v39  ;;  %v665_v31 = vld [vmem:[%s1890_s12 + $0x18] sm:$0xff] }
 0x1b7   :  { %v1257_v35 = vpop.f32.mrf.mxu1 }
 0x1b8   :  { %v448_v37 = vmul.f32 %v1257_v35, %v1644_v34  ;;  %v667_v35 = vpack.c.bf16 %v665_v31, %v664_v30  ;;  %v892_v30 = vld [vmem:[%s1892_s15 + $0x10] sm:$0xff]  ;;  %v893_v31 = vld [vmem:[%s1892_s15 + $0x18] sm:$0xff] }
 0x1b9   :  { %v433_v42 = vpop.f32.mrf.mxu1 }
 0x1ba   :  { %v446_v44 = vmul.f32 %v433_v42, %v1650_v41  ;;  %v450_v45 = vpack.c.bf16 %v448_v37, %v447_v36  ;;  %v662_v36 = vld [vmem:[%s1890_s12] sm:$0xff]  ;;  %v663_v37 = vld [vmem:[%s1890_s12 + $0x8] sm:$0xff] }
 0x1bb   :  { %v666_v42 = vpack.c.bf16 %v663_v37, %v662_v36  ;;  %v891_v36 = vld [vmem:[%s1892_s15 + $0x8] sm:$0xff] }
 0x1bc   :  { %v449_v46 = vpack.c.bf16 %v446_v44, %v445_v43  ;;  %1258 = vmatprep.subr.bf16.mxu0 %v450_v45  ;;  %v672_v43 = vld [vmem:[%s1891_s13 + $0x10] sm:$0xff]  ;;  %v673_v44 = vld [vmem:[%s1891_s13 + $0x18] sm:$0xff] }
 0x1bd   :  { %1259 = vmatpush3.bf16.msra.mxu0 %v450_v45  ;;  %v675_v45 = vpack.c.bf16 %v673_v44, %v672_v43 }
 0x1be   :  { %1260 = vmatprep.subr.bf16.mxu0 %v449_v46 }
 0x1bf   :  { %1282 = vmatprep.subr.bf16.mxu1 %v675_v45 }
 0x1c1   :  { %1261 = vmatpush3.bf16.msra.mxu0 %v449_v46  ;;  %v671_v46 = vld [vmem:[%s1891_s13 + $0x8] sm:$0xff] }
 0x1c4   :  { %1263 = vmatmul.mubr.msk.bf16.vlgmr.msra.gmra.mxu0 %vm234_vm7, %v1637_v10 }
 0x1c5   :  { %1278 = vmatprep.mubr.msk.bf16.mxu0 %vm234_vm7, %v259_v62 }
 0x284   :  { %v1264_v53 = vpop.f32.mrf.mxu0 }
 0x285   :  { %v508_v56 = vmul.f32 %v1264_v53, %v1642_v33  ;;  %v912_v53 = vpack.c.bf16 %v903_v52, %v902_v50 }
 0x286   :  { %v491_v54 = vpop.f32.mrf.mxu0 }
 0x287   :  { %v506_v55 = vmul.f32 %v491_v54, %v1648_v39  ;;  %v519_v0 = vadd.f32 %v1153_v58, %v508_v56  ;;  %v900_v54 = vld [vmem:[%s1892_s15 + $0x50] sm:$0xff] }
 0x288   :  { %v1265_v57 = vpop.f32.mrf.mxu0 }
 0x289   :  { %v509_v59 = vmul.f32 %v1265_v57, %v1644_v34  ;;  %v517_v61 = vadd.f32 %v1153_v58, %v506_v55  ;;  %v523_v9 = vmax.f32 %v519_v0, 0.0  ;;  %v901_v55 = vld [vmem:[%s1892_s15 + $0x58] sm:$0xff]  ;;  %v898_v57 = vld [vmem:[%s1892_s15 + $0x40] sm:$0xff] }
 0x28a   :  { %v494_v60 = vpop.f32.mrf.mxu0  ;;  %v911_v56 = vpack.c.bf16 %v901_v55, %v900_v54 }
 0x28b   :  { %v520_v62 = vadd.f32 %v1153_v58, %v509_v59  ;;  %v507_v63 = vmul.f32 %v494_v60, %v1650_v41  ;;  %v521_v6 = vmax.f32 %v517_v61, 0.0 }
 0x28d   :  { %v518_v4 = vadd.f32 %v1153_v58, %v507_v63  ;;  %v524_v5 = vmax.f32 %v520_v62, 0.0  ;;  %v899_v58 = vld [vmem:[%s1892_s15 + $0x48] sm:$0xff] }
 0x28e   :  { %v910_v59 = vpack.c.bf16 %v899_v58, %v898_v57 }
 0x28f   :  { %v522_v8 = vmax.f32 %v518_v4, 0.0  ;;  %v526_v12 = vpack.c.bf16 %v524_v5, %v523_v9  ;;  %v1158_v4 = vld [vmem:[%s1893_s11] ss:$0 sm:$0xff] }
 0x291   :  { %v525_v11 = vpack.c.bf16 %v522_v8, %v521_v6 }
 0x293   :  { %1270 = vmatprep.mubr.msk.bf16.mxu1 %vm234_vm7, %v525_v11 }
 0x294   :  { %1271 = vmatmul.mubr.msk.bf16.vlgmr.msra.gmra.mxu1 %vm234_vm7, %v526_v12 }
 0x295   :  { %1283 = vmatpush3.bf16.msra.mxu1 %v675_v45  ;;  %v1163_v45 = vld [vmem:[%s1894_s14] ss:$0 sm:$0xff] }
 0x354   :  { %v1272_v14 = vpop.f32.mrf.mxu1 }
 0x355   :  { %v590_v23 = vmul.f32 %v1272_v14, %v1642_v33 }
 0x356   :  { %v573_v19 = vpop.f32.mrf.mxu1 }
 0x357   :  { %v588_v27 = vmul.f32 %v573_v19, %v1648_v39 }
 0x358   :  { %v1273_v20 = vpop.f32.mrf.mxu1 }
 0x359   :  { %v591_v24 = vmul.f32 %v1273_v20, %v1644_v34 }
 0x35a   :  { %v576_v26 = vpop.f32.mrf.mxu1 }
 0x35b   :  { %v593_v28 = vpack.c.bf16 %v591_v24, %v590_v23  ;;  %v589_v29 = vmul.f32 %v576_v26, %v1650_v41 }
 0x35d   :  { %v592_v32 = vpack.c.bf16 %v589_v29, %v588_v27  ;;  %1274 = vmatprep.subr.bf16.mxu0 %v593_v28  ;;  %v894_v27 = vld [vmem:[%s1892_s15 + $0x20] sm:$0xff] }
 0x35e   :  { %1275 = vmatpush3.bf16.msra.mxu0 %v593_v28  ;;  %v895_v28 = vld [vmem:[%s1892_s15 + $0x28] sm:$0xff] }
 0x35f   :  { %1276 = vmatprep.subr.bf16.mxu0 %v592_v32  ;;  %v908_v29 = vpack.c.bf16 %v895_v28, %v894_v27 }
 0x362   :  { %1277 = vmatpush3.bf16.msra.mxu0 %v592_v32  ;;  %v907_v32 = vpack.c.bf16 %v893_v31, %v892_v30 }
 0x363   :  { %1290 = vmatprep.subr.bf16.mxu0 %v667_v35 }
 0x365   :  { %1279 = vmatmul.mubr.msk.bf16.vlgmr.msra.gmra.mxu0 %vm234_vm7, %v1637_v10  ;;  %v670_v10 = vld [vmem:[%s1891_s13] sm:$0xff] }
 0x366   :  { %1291 = vmatpush3.bf16.msra.mxu0 %v667_v35  ;;  %1294 = vmatprep.mubr.msk.bf16.mxu0 %vm234_vm7, %v525_v11  ;;  %v674_v47 = vpack.c.bf16 %v671_v46, %v670_v10  ;;  %v890_v35 = vld [vmem:[%s1892_s15] sm:$0xff] }
 0x367   :  { %1292 = vmatprep.subr.bf16.mxu0 %v666_v42  ;;  %v906_v37 = vpack.c.bf16 %v891_v36, %v890_v35 }
 0x368   :  { %1284 = vmatprep.subr.bf16.mxu1 %v674_v47 }
 0x369   :  { %1285 = vmatpush3.bf16.msra.mxu1 %v674_v47 }
 0x36a   :  { %1293 = vmatpush3.bf16.msra.mxu0 %v666_v42  ;;  %1298 = vmatprep.subr.mxu1 %v1356_v40 }
 0x36b   :  { %1309 = vmatprep.subr.bf16.mxu0 %v913_v51 }
 0x36d   :  { %1295 = vmatmul.mubr.msk.bf16.vlgmr.msra.gmra.mxu0 %vm234_vm7, %v526_v12 }
 0x36e   :  { %1310 = vmatpush3.bf16.msra.mxu0 %v913_v51 }
 0x36f   :  { %1311 = vmatprep.subr.bf16.mxu0 %v912_v53 }
 0x372   :  { %1312 = vmatpush3.bf16.msra.mxu0 %v912_v53 }
 0x373   :  { %1313 = vmatprep.subr.bf16.mxu0 %v911_v56 }
 0x376   :  { %1314 = vmatpush3.bf16.msra.mxu0 %v911_v56 }
 0x377   :  { %1315 = vmatprep.subr.bf16.mxu0 %v910_v59 }
 0x37a   :  { %1316 = vmatpush3.bf16.msra.mxu0 %v910_v59 }
 0x425   :  { %v1280_v60 = vpop.f32.mrf.mxu0 }
 0x426   :  { %v645_v63 = vmul.f32 %v1280_v60, %v1642_v33 }
 0x427   :  { %v628_v61 = vpop.f32.mrf.mxu0 }
 0x428   :  { %v643_v62 = vmul.f32 %v628_v61, %v1648_v39  ;;  %v656_v12 = vadd.f32 %v1158_v4, %v645_v63 }
 0x429   :  { %v1281_v0 = vpop.f32.mrf.mxu0 }
 0x42a   :  { %v646_v5 = vmul.f32 %v1281_v0, %v1644_v34  ;;  %v654_v8 = vadd.f32 %v1158_v4, %v643_v62  ;;  %v660_v39 = vmax.f32 %v656_v12, 0.0  ;;  %v896_v34 = vld [vmem:[%s1892_s15 + $0x30] sm:$0xff]  ;;  %v25_v0 = vstv %s1896_s16 }
 0x42b   :  { %v631_v6 = vpop.f32.mrf.mxu0  ;;  %26 = vst [vmem:[#allocation2] sm:$0x1] %v25_v0  ;;  %v66_v12 = vsel %vm65_vm13, 1, %v1354_v2 }
 0x42c   :  { %v657_v9 = vadd.f32 %v1158_v4, %v646_v5  ;;  %v644_v11 = vmul.f32 %v631_v6, %v1650_v41  ;;  %v658_v20 = vmax.f32 %v654_v8, 0.0  ;;  %v897_v41 = vld [vmem:[%s1892_s15 + $0x38] sm:$0xff]  ;;  %v1357_v6 = vmov 1  }
 0x42d   :  { %v909_v26 = vpack.c.bf16 %v897_v41, %v896_v34  ;;  %v1296_v42 = vpop.f32.mrf.mxu0  ;;  %v1133_v41 = vsel %vm1509_vm6, 1.0, %v1356_v40 }
 0x42e   :  { %v655_v14 = vadd.f32 %v1158_v4, %v644_v11  ;;  %v661_v19 = vmax.f32 %v657_v9, 0.0 }
 0x42f   :  { %1317 = vmatprep.subr.bf16.mxu0 %v909_v26  ;;  %v765_v43 = vpop.f32.mrf.mxu0 }
 0x430   :  { %v659_v23 = vmax.f32 %v655_v14, 0.0  ;;  %v669_v33 = vpack.c.bf16 %v661_v19, %v660_v39  ;;  %1318 = vmatpush3.bf16.msra.mxu0 %v909_v26  ;;  %v804_v14 = vrot.slane %v66_v12, %v1480_v7  ;;  %v1164_v19 = vld [vmem:[%s1897_s7] ss:$0 sm:$0xff] }
 0x431   :  { %1319 = vmatprep.subr.bf16.mxu0 %v908_v29  ;;  %v1297_v46 = vpop.f32.mrf.mxu0  ;;  %vm800_vm12 = vcmp.eq.s32.totalorder %v1468_v3, %v1164_v19  ;;  %v1132_v3 = vsel %vm1520_vm8, 1.0, %v1356_v40 }
 0x432   :  { %v668_v24 = vpack.c.bf16 %v659_v23, %v658_v20  ;;  %v1026_v11 = vld [vmem:[#allocation2] sm:$0x1]  ;;  %vm805_vm3 = vcmp.eq.s32.totalorder %v804_v14, 1 }
 0x433   :  { %v768_v54 = vpop.f32.mrf.mxu0  ;;  %vm806_vm1 = vmand %vm800_vm12, %vm805_vm3 }
 0x434   :  { %1286 = vmatprep.mubr.msk.bf16.mxu1 %vm234_vm7, %v668_v24  ;;  %1320 = vmatpush3.bf16.msra.mxu0 %v908_v29  ;;  %v1165_v20 = vsel %vm806_vm1, 1.0, %v1356_v40  ;;  %v1134_v29 = vsel %vm1500_vm4, 1.0, %v1356_v40  ;;  %vm1358_vm4 = vmmov 0  }
 0x435   :  { %1287 = vmatmul.mubr.msk.bf16.vlgmr.msra.gmra.mxu1 %vm234_vm7, %v669_v33  ;;  %1321 = vmatprep.subr.bf16.mxu0 %v907_v32  ;;  %v809_v23 = vsel %vm234_vm7, %v1165_v20, 0.0 }
 0x436   :  { %1306 = vmatprep.mubr.msk.f32.mxu1 %vm1358_vm4, %v1356_v40 }
 0x438   :  { %1322 = vmatpush3.bf16.msra.mxu0 %v907_v32 }
 0x439   :  { %1323 = vmatprep.subr.bf16.mxu0 %v906_v37 }
 0x43c   :  { %1324 = vmatpush3.bf16.msra.mxu0 %v906_v37 }
 0x4f5   :  { %v1288_v44 = vpop.f32.mrf.mxu1 }
 0x4f6   :  { %v774_v10 = vadd.f32 %v1296_v42, %v1288_v44 }
 0x4f7   :  { %v716_v47 = vpop.f32.mrf.mxu1 }
 0x4f8   :  { %v789_v48 = vadd.f32 %v1163_v45, %v774_v10  ;;  %v766_v49 = vadd.f32 %v765_v43, %v716_v47  ;;  %v1833_v43 = vsel %vm1583_vm5, 1.0, %v1356_v40 }
 0x4f9   :  { %v1289_v50 = vpop.f32.mrf.mxu1 }
 0x4fa   :  { %v793_v51 = vmax.f32 %v789_v48, 0.0  ;;  %v787_v52 = vadd.f32 %v1163_v45, %v766_v49  ;;  %v777_v53 = vadd.f32 %v1297_v46, %v1289_v50 }
 0x4fb   :  { %v719_v55 = vpop.f32.mrf.mxu1 }
 0x4fc   :  { %v791_v56 = vmax.f32 %v787_v52, 0.0  ;;  %v790_v57 = vadd.f32 %v1163_v45, %v777_v53  ;;  %v769_v58 = vadd.f32 %v768_v54, %v719_v55  ;;  %1109 = vst [vmem:[%s1895_s17 + $0x10] sm:$0xff] %v793_v51 }
 0x4fe   :  { %v794_v59 = vmax.f32 %v790_v57, 0.0  ;;  %v788_v60 = vadd.f32 %v1163_v45, %v769_v58  ;;  %1107 = vst [vmem:[%s1895_s17] sm:$0xff] %v791_v56 }
 0x500   :  { %v792_v61 = vmax.f32 %v788_v60, 0.0  ;;  %1299 = vmatpush3.msra.mxu1 %v794_v59  ;;  %1110 = vst [vmem:[%s1895_s17 + $0x18] sm:$0xff] %v794_v59  ;;  %v889_v63 = vpack.c.bf16 %v794_v59, %v793_v51 }
 0x501   :  { %1300 = vmatprep.subr.mxu1 %v1356_v40 }
 0x502   :  { %1301 = vmatpush3.msra.mxu1 %v793_v51  ;;  %v888_v62 = vpack.c.bf16 %v792_v61, %v791_v56  ;;  %1108 = vst [vmem:[%s1895_s17 + $0x8] sm:$0xff] %v792_v61 }
 0x503   :  { %1302 = vmatprep.subr.mxu1 %v1356_v40 }
 0x504   :  { %1303 = vmatpush3.msra.mxu1 %v792_v61  ;;  %1325 = vmatprep.mubr.bf16.mxu0 %v888_v62 }
 0x505   :  { %1304 = vmatprep.subr.mxu1 %v1356_v40  ;;  %1326 = vmatmul.mubr.bf16.vlgmr.msra.gmra.mxu0 %v889_v63 }
 0x506   :  { %1305 = vmatpush3.msra.mxu1 %v791_v56 }
 0x5c5   :  { %v1327_v4 = vpop.f32.mrf.mxu0 }
 0x5c6   :  { %975 = vperm.xlu1 %1334, %v1327_v4  }
 0x5c7   :  { %v948_v5 = vpop.f32.mrf.mxu0 }
 0x5c8   :  { %965 = vperm.xlu0 %1336, %v948_v5  }
 0x5c9   :  { %v1328_v8 = vpop.f32.mrf.mxu0 }
 0x5ca   :  { %1335 = vset.pattern.permute.xlu1 %v1357_v6 }
 0x5cb   :  { %1005 = vperm.xlu1 %1335, %v1327_v4   ;;  %v951_v9 = vpop.f32.mrf.mxu0 }
 0x5cf   :  { %997 = vperm.xlu1 %1335, %v948_v5  }
 0x5d3   :  { %1337 = vset.pattern.permute.xlu1 %v1354_v2 }
 0x5d4   :  { %980 = vperm.xlu1 %1337, %v1328_v8  }
 0x5d8   :  { %970 = vperm.xlu1 %1337, %v951_v9  }
 0x5dc   :  { %1338 = vset.pattern.permute.xlu1 %v1357_v6 }
 0x5dd   :  { %1001 = vperm.xlu1 %1338, %v951_v9  }
 0x5e1   :  { %1009 = vperm.xlu1 %1338, %v1328_v8  }
 0x5e5   :  { %1339 = vset.pattern.permute.xlu1 %v1354_v2  ;;  %v1131_v2 = vsel %vm1539_vm11, 1.0, %v1356_v40 }
 0x5e6   :  { %1029 = vperm.xlu1 %1339, %v1026_v11  }
 0x5e7   :  { %810 = vadd.xlane.f32.xlu0 %v809_v23 }
 0x641   :  { %v976_v39 = vpop.permute.xlu1 %975 }
 0x642   :  { %v985_v30 = vmul.f32 %v1133_v41, %v976_v39 }
 0x643   :  { %v966_v34 = vpop.permute.xlu0 %965 }
 0x644   :  { %v983_v27 = vmul.f32 %v1131_v2, %v966_v34 }
 0x646   :  { %v1006_v24 = vpop.permute.xlu1 %1005 }
 0x647   :  { %v1014_v44 = vmul.f32 %v1826_v15, %v1006_v24 }
 0x64a   :  { %v998_v33 = vpop.permute.xlu1 %997 }
 0x64b   :  { %v1012_v36 = vmul.f32 %v1816_v18, %v998_v33 }
 0x64f   :  { %v981_v38 = vpop.permute.xlu1 %980 }
 0x650   :  { %v986_v32 = vmul.f32 %v1134_v29, %v981_v38 }
 0x653   :  { %v971_v26 = vpop.permute.xlu1 %970 }
 0x654   :  { %v984_v28 = vmul.f32 %v1132_v3, %v971_v26 }
 0x656   :  { %v987_v31 = vadd.f32 %v984_v28, %v983_v27 }
 0x658   :  { %v988_v13 = vadd.f32 %v987_v31, %v985_v30  ;;  %v1002_v35 = vpop.permute.xlu1 %1001 }
 0x659   :  { %v1013_v37 = vmul.f32 %v1821_v16, %v1002_v35 }
 0x65a   :  { %v989_v42 = vadd.f32 %v988_v13, %v986_v32 }
 0x65b   :  { %v1016_v45 = vadd.f32 %v1013_v37, %v1012_v36 }
 0x65c   :  { %v990_v10 = vrot.slane %v989_v42, 4  ;;  %v1010_v46 = vpop.permute.xlu1 %1009 }
 0x65d   :  { %v1017_v47 = vadd.f32 %v1016_v45, %v1014_v44  ;;  %v1015_v48 = vmul.f32 %v1833_v43, %v1010_v46 }
 0x65e   :  { %v991_v49 = vadd.f32 %v990_v10, %v989_v42 }
 0x65f   :  { %v1018_v50 = vadd.f32 %v1017_v47, %v1015_v48 }
 0x660   :  { %v992_v51 = vrot.slane %v991_v49, 2 }
 0x661   :  { %v1019_v52 = vrot.slane %v1018_v50, 4  ;;  %v1030_v58 = vpop.permute.xlu1 %1029 }
 0x662   :  { %v993_v54 = vadd.f32 %v992_v51, %v991_v49  ;;  %v1035_v62 = vrot.slane %v1030_v58, %v1480_v7 }
 0x663   :  { %v1020_v53 = vadd.f32 %v1019_v52, %v1018_v50 }
 0x664   :  { %v994_v57 = vrot.slane %v993_v54, 1 }
 0x665   :  { %v1021_v55 = vrot.slane %v1020_v53, 2 }
 0x666   :  { %v995_v60 = vadd.f32 %v994_v57, %v993_v54 }
 0x667   :  { %v1022_v56 = vadd.f32 %v1021_v55, %v1020_v53 }
 0x669   :  { %v1023_v59 = vrot.slane %v1022_v56, 1 }
 0x66b   :  { %v1024_v61 = vadd.f32 %v1023_v59, %v1022_v56 }
 0x66d   :  { %v1025_v63 = vadd.f32 %v1024_v61, %v995_v60 }
 0x66f   :  { %v1036_v0 = vadd.f32 %v1035_v62, %v1025_v63 }
 0x670   :  { %v811_v9 = vpop.xlane.xlu0 %810 }
 0x671   :  { %v1039_v4 = vsel %vm1559_vm14, %v1036_v0, -1e+30  ;;  %v1038_v5 = vsel %vm1526_vm9, %v1036_v0, -1e+30  ;;  %v1040_v6 = vsel %vm1565_vm15, %v1036_v0, -1e+30 }
 0x672   :  { %1044 = vmax.xlane.f32.xlu0 %v1039_v4  ;;  %1042 = vmax.xlane.f32.xlu1 %v1038_v5  ;;  %v1041_v8 = vsel %vm1583_vm5, %v1036_v0, -1e+30  ;;  %v812_v11 = vmax.f32 %v811_v9, 1.0  ;;  %v1037_v31 = vsel %vm63_vm0, %v1036_v0, -1e+30 }
 0x674   :  { %1348 = vrcp.f32 %v812_v11 }
 0x676   :  { %1046 = vmax.xlane.f32.xlu0 %v1040_v6  ;;  %1048 = vmax.xlane.f32.xlu1 %v1041_v8 }
 0x681   :  { %v1349_v12 = vpop.eup %1348 }
 0x682   :  { %v814_v14 = vmul.f32 %v1349_v12, %v1165_v20 }
 0x684   :  { %1307 = vmatmul.mubr.msk.f32.vlgmr.msra.gmra.mxu1 %vm234_vm7, %v814_v14 }
 0x6fb   :  { %v1045_v19 = vpop.xlane.xlu0 %1044  ;;  %v1043_v23 = vpop.xlane.xlu1 %1042 }
 0x6fc   :  { %v1051_v39 = vmul.f32 %v1821_v16, %v1045_v19  ;;  %v1050_v24 = vmul.f32 %v1816_v18, %v1043_v23 }
 0x6fe   :  { %v1054_v2 = vadd.f32 %v1051_v39, %v1050_v24 }
 0x6ff   :  { %v1047_v33 = vpop.xlane.xlu0 %1046  ;;  %v1049_v38 = vpop.xlane.xlu1 %1048 }
 0x700   :  { %v1052_v34 = vmul.f32 %v1826_v15, %v1047_v33  ;;  %v1053_v41 = vmul.f32 %v1833_v43, %v1049_v38 }
 0x702   :  { %v1055_v3 = vadd.f32 %v1054_v2, %v1052_v34 }
 0x704   :  { %v1056_v20 = vadd.f32 %v1055_v3, %v1053_v41 }
 0x706   :  { %v1057_v26 = vrot.slane %v1056_v20, 4 }
 0x708   :  { %v1058_v27 = vadd.f32 %v1057_v26, %v1056_v20 }
 0x70a   :  { %v1059_v40 = vrot.slane %v1058_v27, 2 }
 0x70c   :  { %v1060_v28 = vadd.f32 %v1059_v40, %v1058_v27 }
 0x70e   :  { %v1061_v29 = vrot.slane %v1060_v28, 1 }
 0x710   :  { %v1062_v30 = vadd.f32 %v1061_v29, %v1060_v28 }
 0x712   :  { %v1063_v32 = vsel %vm63_vm0, %v1062_v30, 0.0 }
 0x713   :  { %v1064_v13 = vsub.f32 %v1037_v31, %v1063_v32 }
 0x715   :  { %v1065_v35 = vmul.f32 1.442695, %v1064_v13 }
 0x717   :  { %1350 = vpow2.f32 %v1065_v35 }
 0x724   :  { %v1351_v36 = vpop.eup %1350 }
 0x725   :  { %v1071_v37 = vrot.slane %v1351_v36, %v1480_v7 }
 0x727   :  { %v1074_v42 = vsel %vm1559_vm14, %v1071_v37, 0.0  ;;  %v1073_v44 = vsel %vm1526_vm9, %v1071_v37, 0.0  ;;  %v1076_v45 = vsel %vm1583_vm5, %v1071_v37, 0.0  ;;  %v1075_v10 = vsel %vm1565_vm15, %v1071_v37, 0.0 }
 0x728   :  { %1079 = vadd.xlane.f32.xlu1 %v1074_v42  ;;  %1077 = vadd.xlane.f32.xlu0 %v1073_v44 }
 0x72c   :  { %1083 = vadd.xlane.f32.xlu1 %v1076_v45  ;;  %1081 = vadd.xlane.f32.xlu0 %v1075_v10 }
 0x744   :  { %v884_v46 = vpop.f32.mrf.mxu1 }
 0x745   :  { %1111 = vst [vmem:[%s1895_s17 + $0x20] sm:$0xff] %v884_v46 }
 0x746   :  { %v1308_v7 = vpop.f32.mrf.mxu1 }
 0x7b1   :  { %v1080_v21 = vpop.xlane.xlu1 %1079  ;;  %v1078_v47 = vpop.xlane.xlu0 %1077 }
 0x7b2   :  { %v1086_v17 = vmul.f32 %v1821_v16, %v1080_v21  ;;  %v1085_v48 = vmul.f32 %v1816_v18, %v1078_v47 }
 0x7b4   :  { %v1089_v50 = vadd.f32 %v1086_v17, %v1085_v48 }
 0x7b5   :  { %v1084_v49 = vpop.xlane.xlu1 %1083  ;;  %v1082_v25 = vpop.xlane.xlu0 %1081 }
 0x7b6   :  { %v1087_v22 = vmul.f32 %v1826_v15, %v1082_v25  ;;  %v1088_v51 = vmul.f32 %v1833_v43, %v1084_v49 }
 0x7b8   :  { %v1090_v52 = vadd.f32 %v1089_v50, %v1087_v22 }
 0x7ba   :  { %v1091_v53 = vadd.f32 %v1090_v52, %v1088_v51 }
 0x7bc   :  { %v1092_v54 = vrot.slane %v1091_v53, 4 }
 0x7be   :  { %v1093_v55 = vadd.f32 %v1092_v54, %v1091_v53 }
 0x7c0   :  { %v1094_v56 = vrot.slane %v1093_v55, 2 }
 0x7c2   :  { %v1095_v57 = vadd.f32 %v1094_v56, %v1093_v55 }
 0x7c4   :  { %v1096_v58 = vrot.slane %v1095_v57, 1 }
 0x7c6   :  { %v1097_v59 = vadd.f32 %v1096_v58, %v1095_v57 }
 0x7c8   :  { %vm1098_vm6 = vcmp.gt.f32.partialorder %v1097_v59, 0.0 }
 0x7c9   :  { %v1099_v60 = vsel %vm1098_vm6, %v1097_v59, 1.0 }
 0x7ca   :  { %1352 = vrcp.f32 %v1099_v60 }
 0x7d7   :  { %v1353_v16 = vpop.eup %1352 }
 0x7d8   :  { %v1101_v18 = vmul.f32 %v1353_v16, %v1351_v36 }
 0x7da   :  { %v1102_v61 = vadd.f32 0.5, %v1101_v18 }
 0x7dc   :  { %v1103_v62 = vsub.f32 0.0, %v1102_v61  ;;  %1105 = vst [vmem:[%s1898_s18] sm:$0x1] %v1102_v61 }
 0x7de   :  { %v1104_v15 = vsel %vm63_vm0, %v1103_v62, 1e+30 }
 0x7df   :  { %1106 = vst [vmem:[%s1899_s19] sm:$0x1] %v1104_v15 }

// kernel: edgepool_forward.9
= control target key start
LH: loop header
LB: loop body
LE: loop exit
PB: predicated region body
PF: predicated region fallthrough
CT: control target
= control target key end

     0   :  { %s1836_s0 = inlined_call_operand.vmem [shape: s32[1,32], index: 0, kind: input, shape index: {}]   ;;  %s1837_s1 = inlined_call_operand.vmem [shape: f32[1,32], index: 1, kind: input, shape index: {}]   ;;  %s1838_s2 = inlined_call_operand.vmem [shape: f32[40,128], index: 2, kind: input, shape index: {}]   ;;  %s1839_s3 = inlined_call_operand.vmem [shape: f32[40,128], index: 3, kind: input, shape index: {}]   ;;  %s1840_s4 = inlined_call_operand.vmem [shape: s32[1,128], index: 4, kind: input, shape index: {}]   ;;  %s1841_s5 = inlined_call_operand.vmem [shape: s32[1,128], index: 5, kind: input, shape index: {}]   ;;  %s1842_s6 = inlined_call_operand.vmem [shape: s32[1,128], index: 6, kind: input, shape index: {}]   ;;  %s1843_s7 = inlined_call_operand.vmem [shape: s32[1,32], index: 7, kind: input, shape index: {}]   ;;  %s1844_s8 = inlined_call_operand.vmem [shape: s32[1,32], index: 8, kind: input, shape index: {}]   ;;  %s1845_s9 = inlined_call_operand.vmem [shape: f32[32,32], index: 9, kind: input, shape index: {}]   ;;  %s1846_s10 = inlined_call_operand.vmem [shape: f32[1,32], index: 10, kind: input, shape index: {}]   ;;  %s1847_s11 = inlined_call_operand.vmem [shape: f32[32,32], index: 11, kind: input, shape index: {}]   ;;  %s1848_s12 = inlined_call_operand.vmem [shape: f32[1,32], index: 12, kind: input, shape index: {}]   ;;  %s1849_s13 = inlined_call_operand.vmem [shape: f32[32,128], index: 13, kind: input, shape index: {}]   ;;  %s1850_s14 = inlined_call_operand.vmem [shape: f32[32,128], index: 14, kind: input, shape index: {}]   ;;  %s1851_s15 = inlined_call_operand.vmem [shape: f32[1,128], index: 15, kind: input, shape index: {}]   ;;  %s1852_s16 = inlined_call_operand.vmem [shape: f32[32,32], index: 16, kind: input, shape index: {}]   ;;  %s1853_s17 = inlined_call_operand.vmem [shape: f32[32,32], index: 17, kind: input, shape index: {}]   ;;  %s1854_s18 = inlined_call_operand.vmem [shape: f32[32,32], index: 18, kind: input, shape index: {}]   ;;  %s1855_s19 = inlined_call_operand.vmem [shape: f32[1,32], index: 19, kind: input, shape index: {}]   ;;  %s1856_s20 = inlined_call_operand.vmem [shape: f32[32,4], index: 20, kind: input, shape index: {}]   ;;  %s1857_s21 = inlined_call_operand.vmem [shape: f32[1,4], index: 21, kind: input, shape index: {}]   ;;  %s1858_s22 = inlined_call_operand.hbm [shape: f32[2,4], index: 22, kind: output, shape index: {}]  }
   0x1   :  { %1860 = sst [smem:[#allocation5_spill]] %s1836_s0 }
   0x2   :  { %1861 = sst [smem:[#allocation6_spill]] %s1837_s1 }
   0x3   :  { %1862 = sst [smem:[#allocation7_spill]] %s1838_s2 }
   0x4   :  { %1863 = sst [smem:[#allocation8_spill]] %s1839_s3 }
   0x5   :  { %1864 = sst [smem:[#allocation9_spill]] %s1840_s4 }
   0x6   :  { %1865 = sst [smem:[#allocation10_spill]] %s1841_s5 }
   0x7   :  { %1866 = sst [smem:[#allocation11_spill]] %s1842_s6 }
   0x8   :  { %s1867_s29 = sld [smem:[#allocation8_spill]]  ;;  %v79_v2 = vlaneseq  ;;  %vm245_vm0 = vcmask 261120  }
   0x9   :  { %s1868_s1 = sld [smem:[#allocation5_spill]] }
   0xa   :  { %v1542_v5 = vshrl.u32 %v79_v2, 7  ;;  %s1869_s26 = sld [smem:[#allocation6_spill]] }
   0xb   :  { %s1870_s3 = sld [smem:[#allocation11_spill]] }
   0xc   :  { %s1871_s4 = sld [smem:[#allocation9_spill]] }
   0xe   :  { %v295_v0 = vld [vmem:[%s1867_s29 + $0x18] sm:$0xff]  ;;  %v294_v1 = vld [vmem:[%s1867_s29 + $0x10] sm:$0xff]  ;;  %v293_v4 = vld [vmem:[%s1867_s29 + $0x8] sm:$0xff] }
   0xf   :  { %1263 = vmatprep.subr.mxu1 %v295_v0  ;;  %v1162_v3 = vld [vmem:[%s1868_s1] ss:$0 sm:$0xff] }
  0x10   :  { %1264 = vmatpush3.msra.mxu1 %v295_v0  ;;  %v1163_v6 = vld [vmem:[%s1869_s26] ss:$0 sm:$0xff] }
  0x11   :  { %v73_v7 = vld [vmem:[%s1870_s3] sm:$0x1]  ;;  %1265 = vmatprep.subr.mxu1 %v294_v1 }
  0x12   :  { %vm74_vm1 = vcmp.ne.s32.totalorder %v73_v7, 0  ;;  %v1145_v8 = vld [vmem:[%s1871_s4] ss:$0 sm:$0xff] }
  0x13   :  { %27 = vsyncpa [#allocation3], 0  ;;  %1266 = vmatpush3.msra.mxu1 %v294_v1  ;;  %v292_v9 = vld [vmem:[%s1867_s29] sm:$0xff]  ;;  %vm277_vm2 = vcmp.eq.s32.totalorder %v1542_v5, %v1162_v3  ;;  %v1558_v10 = vadd.s32 8, %v1542_v5  ;;  %v1561_v11 = vadd.s32 24, %v1542_v5  ;;  %v1409_v12 = vmov 0  }
  0x14   :  { %v93_v13 = vsel %vm74_vm1, 1, %v1409_v12  ;;  %1267 = vmatprep.subr.mxu1 %v293_v4  ;;  %v288_v14 = vsel %vm277_vm2, %v1163_v6, 0.0  ;;  %v1565_v15 = vsub.s32 0, %v1542_v5  ;;  %v1568_v16 = vadd.s32 16, %v1542_v5  ;;  %s1872_s24 = sld [smem:[#allocation10_spill]]  ;;  %v397_v24 = vld [vmem:[%s1845_s9 + $0x10] sm:$0xff] }
  0x15   :  { %1268 = vmatpush3.msra.mxu1 %v293_v4  ;;  %1271 = vmatprep.mubr.msk.f32.mxu1 %vm245_vm0, %v288_v14  ;;  %vm278_vm3 = vcmp.eq.s32.totalorder %v1558_v10, %v1162_v3  ;;  %vm111_vm4 = vcmp.eq.s32.totalorder %v1561_v11, %v1145_v8  ;;  %vm280_vm6 = vcmp.eq.s32.totalorder %v1561_v11, %v1162_v3  ;;  %v1410_v23 = vmov 1.0   ;;  %v398_v25 = vld [vmem:[%s1845_s9 + $0x18] sm:$0xff]  ;;  %v395_v27 = vld [vmem:[%s1845_s9] sm:$0xff]  ;;  %v396_v28 = vld [vmem:[%s1845_s9 + $0x8] sm:$0xff] }
  0x16   :  { %1269 = vmatprep.subr.mxu1 %v292_v9  ;;  %v289_v17 = vsel %vm278_vm3, %v1163_v6, 0.0  ;;  %v97_v18 = vrot.slane %v93_v13, %v1565_v15  ;;  %vm279_vm5 = vcmp.eq.s32.totalorder %v1568_v16, %v1162_v3  ;;  %vm110_vm7 = vcmp.eq.s32.totalorder %v1568_v16, %v1145_v8  ;;  %v1625_v35 = vld [vmem:[%s1843_s7] sm:$0x1]  ;;  %s1875_s7 = sld [smem:[#allocation7_spill]] }
  0x17   :  { %1270 = vmatpush3.msra.mxu1 %v292_v9  ;;  %v290_v19 = vsel %vm279_vm5, %v1163_v6, 0.0  ;;  %v291_v22 = vsel %vm280_vm6, %v1163_v6, 0.0  ;;  %vm109_vm10 = vcmp.eq.s32.totalorder %v1558_v10, %v1145_v8  ;;  %vm108_vm15 = vcmp.eq.s32.totalorder %v1542_v5, %v1145_v8 }
  0x18   :  { %1272 = vmatmul.mubr.msk.f32.vlgmr.msra.gmra.mxu1 %vm245_vm0, %v289_v17  ;;  %vm1581_vm8 = vcmp.eq.s32.totalorder %v97_v18, 1  ;;  %v400_v26 = vpack.c.bf16 %v398_v25, %v397_v24  ;;  %v399_v29 = vpack.c.bf16 %v396_v28, %v395_v27  ;;  %v222_v37 = vand.u32 127, %v79_v2  ;;  %v540_v28 = vld [vmem:[%s1847_s11 + $0x10] sm:$0xff] }
  0x19   :  { %vm115_vm9 = vmand %vm111_vm4, %vm1581_vm8  ;;  %1274 = vmatprep.mubr.msk.f32.mxu1 %vm245_vm0, %v290_v19  ;;  %v1411_v38 = vmov 0.0  }
  0x1a   :  { %v1144_v20 = vld [vmem:[%s1872_s24] ss:$0 sm:$0xff]  ;;  %1249 = vmatprep.subr.msk.mxu0 %vm115_vm9, %v1410_v23  ;;  %vm114_vm11 = vmand %vm110_vm7, %vm1581_vm8  ;;  %1277 = vmatprep.subr.bf16.mxu1 %v400_v26 }
  0x1b   :  { %vm89_vm12 = vcmp.eq.s32.totalorder %v1542_v5, %v1144_v20  ;;  %1250 = vmatpush3.xpose.msk.msra.mxu0 %vm115_vm9, %v1410_v23  ;;  %vm113_vm13 = vmand %vm109_vm10, %vm1581_vm8  ;;  %vm90_vm2 = vcmp.eq.s32.totalorder %v1558_v10, %v1144_v20  ;;  %vm91_vm3 = vcmp.eq.s32.totalorder %v1568_v16, %v1144_v20  ;;  %vm92_vm6 = vcmp.eq.s32.totalorder %v1561_v11, %v1144_v20 }
  0x1c   :  { %1275 = vmatmul.mubr.msk.f32.gmra.mxu1 %vm245_vm0, %v291_v22  ;;  %1251 = vmatprep.subr.msk.mxu0 %vm114_vm11, %v1410_v23  ;;  %vm99_vm14 = vmand %vm89_vm12, %vm1581_vm8  ;;  %vm223_vm9 = vcmp.eq.s32.totalorder %v1542_v5, %v222_v37  ;;  %vm224_vm10 = vcmp.eq.s32.totalorder %v1558_v10, %v222_v37  ;;  %vm226_vm12 = vcmp.eq.s32.totalorder %v1561_v11, %v222_v37 }
  0x1d   :  { %1257 = vmatprep.mubr.msk.f32.mxu0 %vm99_vm14, %v1410_v23  ;;  %vm112_vm1 = vmand %vm108_vm15, %vm1581_vm8  ;;  %1278 = vmatpush3.bf16.msra.mxu1 %v400_v26  ;;  %v227_v41 = vsel %vm223_vm9, 1.0, %v1411_v38  ;;  %v228_v42 = vsel %vm224_vm10, 1.0, %v1411_v38  ;;  %v230_v49 = vsel %vm226_vm12, 1.0, %v1411_v38 }
  0x1e   :  { %vm100_vm4 = vmand %vm90_vm2, %vm1581_vm8  ;;  %1279 = vmatprep.subr.bf16.mxu1 %v399_v29 }
  0x1f   :  { %1252 = vmatpush3.xpose.msk.msra.mxu0 %vm114_vm11, %v1410_v23  ;;  %vm101_vm5 = vmand %vm91_vm3, %vm1581_vm8  ;;  %vm225_vm11 = vcmp.eq.s32.totalorder %v1568_v16, %v222_v37 }
  0x20   :  { %1253 = vmatprep.subr.msk.mxu0 %vm113_vm13, %v1410_v23  ;;  %vm102_vm7 = vmand %vm92_vm6, %vm1581_vm8  ;;  %vm76_vm8 = vcmp.ne.s32.totalorder %v1625_v35, 0  ;;  %v229_v47 = vsel %vm225_vm11, 1.0, %v1411_v38  ;;  %vm1115_vm6 = vcmask 25600  }
  0x21   :  { %1280 = vmatpush3.bf16.msra.mxu1 %v399_v29  ;;  %v1143_v39 = vsel %vm76_vm8, 1.0, %v1411_v38  ;;  %v541_v29 = vld [vmem:[%s1847_s11 + $0x18] sm:$0xff] }
  0x22   :  { %v235_v40 = vrot.slane %v1143_v39, %v1565_v15 }
  0x23   :  { %1254 = vmatpush3.xpose.msk.msra.mxu0 %vm113_vm13, %v1410_v23 }
  0x24   :  { %1255 = vmatprep.subr.msk.mxu0 %vm112_vm1, %v1410_v23  ;;  %v237_v45 = vmul.f32 %v235_v40, %v227_v41  ;;  %v238_v46 = vmul.f32 %v235_v40, %v228_v42  ;;  %v239_v52 = vmul.f32 %v235_v40, %v229_v47  ;;  %v240_v56 = vmul.f32 %v235_v40, %v230_v49  ;;  %v1172_v41 = vld [vmem:[%s1846_s10] ss:$0 sm:$0xff] }
  0x27   :  { %1256 = vmatpush3.xpose.msk.msra.mxu0 %vm112_vm1, %v1410_v23 }
  0x2a   :  { %1258 = vmatmul.mubr.msk.f32.vlgmr.msra.gmra.mxu0 %vm100_vm4, %v1410_v23 }
  0x2b   :  { %1260 = vmatprep.mubr.msk.f32.mxu0 %vm101_vm5, %v1410_v23  ;;  %vm1412_vm5 = vmmov 0  }
  0x2e   :  { %1261 = vmatmul.mubr.msk.f32.gmra.mxu0 %vm102_vm7, %v1410_v23 }
  0xd8   :  { %v1273_v30 = vpop.f32.mrf.mxu1 }
  0xda   :  { %v374_v31 = vpop.f32.mrf.mxu1 }
  0xdb   :  { %v393_v32 = vpack.c.bf16 %v1273_v30, %v374_v31  ;;  %v543_v30 = vpack.c.bf16 %v541_v29, %v540_v28  ;;  %v538_v31 = vld [vmem:[%s1847_s11] sm:$0xff] }
  0xdc   :  { %v1276_v33 = vpop.f32.mrf.mxu1 }
  0xdd   :  { %1281 = vmatprep.mubr.msk.bf16.mxu1 %vm245_vm0, %v393_v32  ;;  %1293 = vmatprep.subr.bf16.mxu1 %v543_v30  ;;  %v539_v32 = vld [vmem:[%s1847_s11 + $0x8] sm:$0xff] }
  0xde   :  { %v384_v34 = vpop.f32.mrf.mxu1 }
  0xdf   :  { %v394_v36 = vpack.c.bf16 %v1276_v33, %v384_v34  ;;  %v542_v33 = vpack.c.bf16 %v539_v32, %v538_v31 }
  0xe1   :  { %1282 = vmatmul.mubr.msk.bf16.vlgmr.msra.gmra.mxu1 %vm245_vm0, %v394_v36 }
  0xe2   :  { %1294 = vmatpush3.bf16.msra.mxu1 %v543_v30 }
  0xe3   :  { %1295 = vmatprep.subr.bf16.mxu1 %v542_v33 }
  0xe6   :  { %1296 = vmatpush3.bf16.msra.mxu1 %v542_v33 }
  0xea   :  { %v1259_v43 = vpop.f32.mrf.mxu0 }
  0xeb   :  { %v218_v44 = vmin.f32 %v1259_v43, 1.0 }
  0xec   :  { %v198_v48 = vpop.f32.mrf.mxu0 }
  0xed   :  { %v217_v50 = vmin.f32 %v198_v48, 1.0  ;;  %v242_v55 = vmax.f32 %v218_v44, %v238_v46 }
  0xee   :  { %v1262_v51 = vpop.f32.mrf.mxu0 }
  0xef   :  { %v220_v53 = vmin.f32 %v1262_v51, 1.0  ;;  %v241_v54 = vmax.f32 %v217_v50, %v237_v45  ;;  %v249_v61 = vsel %vm245_vm0, %v242_v55, 0.0 }
  0xf0   :  { %v208_v57 = vpop.f32.mrf.mxu0 }
  0xf1   :  { %v219_v58 = vmin.f32 %v208_v57, 1.0  ;;  %v246_v59 = vsel %vm245_vm0, %v241_v54, 0.0  ;;  %v270_v60 = vpack.c.bf16 %v242_v55, %v241_v54  ;;  %v244_v63 = vmax.f32 %v220_v53, %v240_v56 }
  0xf2   :  { %247 = vadd.xlane.f32.xlu1 %v246_v59 }
  0xf3   :  { %v243_v62 = vmax.f32 %v219_v58, %v239_v52  ;;  %1289 = vmatprep.mubr.msk.bf16.mxu0 %vm245_vm0, %v270_v60  ;;  %v255_v2 = vsel %vm245_vm0, %v244_v63, 0.0 }
  0xf5   :  { %v252_v0 = vsel %vm245_vm0, %v243_v62, 0.0  ;;  %v1646_v1 = vpack.c.bf16 %v244_v63, %v243_v62 }
  0xf6   :  { %250 = vadd.xlane.f32.xlu1 %v249_v61  ;;  %253 = vadd.xlane.f32.xlu0 %v252_v0  ;;  %v675_v0 = vld [vmem:[%s1849_s13 + $0x10] sm:$0xff] }
  0xfa   :  { %256 = vadd.xlane.f32.xlu0 %v255_v2  ;;  %v676_v2 = vld [vmem:[%s1849_s13 + $0x18] sm:$0xff] }
 0x17b   :  { %v248_v4 = vpop.xlane.xlu1 %247 }
 0x17c   :  { %vm258_vm15 = vcmp.gt.f32.partialorder %v248_v4, 0.0 }
 0x17f   :  { %v254_v3 = vpop.xlane.xlu0 %253  ;;  %v251_v7 = vpop.xlane.xlu1 %250 }
 0x180   :  { %1373 = vrsqrt.f32 %v254_v3  ;;  %vm260_vm13 = vcmp.gt.f32.partialorder %v254_v3, 0.0  ;;  %vm259_vm1 = vcmp.gt.f32.partialorder %v251_v7, 0.0 }
 0x183   :  { %v257_v6 = vpop.xlane.xlu0 %256 }
 0x184   :  { %1375 = vrsqrt.f32 %v257_v6  ;;  %vm261_vm14 = vcmp.gt.f32.partialorder %v257_v6, 0.0  ;;  %v673_v6 = vld [vmem:[%s1849_s13] sm:$0xff] }
 0x185   :  { %1377 = vrsqrt.f32 %v248_v4  ;;  %v678_v4 = vpack.c.bf16 %v676_v2, %v675_v0 }
 0x186   :  { %1379 = vrsqrt.f32 %v251_v7  ;;  %v674_v7 = vld [vmem:[%s1849_s13 + $0x8] sm:$0xff] }
 0x18d   :  { %v1374_v8 = vpop.eup %1373 }
 0x18e   :  { %v1649_v16 = vsel %vm260_vm13, %v1374_v8, 0.0  ;;  %v677_v8 = vpack.c.bf16 %v674_v7, %v673_v6  ;;  %v959_v6 = vld [vmem:[%s1853_s17 + $0x18] sm:$0xff] }
 0x191   :  { %v1376_v10 = vpop.eup %1375 }
 0x192   :  { %v1378_v11 = vpop.eup %1377  ;;  %v1651_v17 = vsel %vm261_vm14, %v1376_v10, 0.0  ;;  %v684_v10 = vld [vmem:[%s1850_s14 + $0x18] sm:$0xff] }
 0x193   :  { %v1380_v14 = vpop.eup %1379  ;;  %v1655_v21 = vsel %vm258_vm15, %v1378_v11, 0.0 }
 0x194   :  { %v1657_v22 = vsel %vm259_vm1, %v1380_v14, 0.0 }
 0x1a1   :  { %v1283_v9 = vpop.f32.mrf.mxu1 }
 0x1a2   :  { %v458_v19 = vmul.f32 %v1283_v9, %v1649_v16  ;;  %v683_v9 = vld [vmem:[%s1850_s14 + $0x10] sm:$0xff] }
 0x1a3   :  { %v441_v13 = vpop.f32.mrf.mxu1  ;;  %v686_v11 = vpack.c.bf16 %v684_v10, %v683_v9 }
 0x1a4   :  { %v456_v24 = vmul.f32 %v441_v13, %v1655_v21  ;;  %v682_v13 = vld [vmem:[%s1850_s14 + $0x8] sm:$0xff] }
 0x1a5   :  { %v1284_v18 = vpop.f32.mrf.mxu1  ;;  %1309 = vmatprep.subr.bf16.mxu1 %v686_v11 }
 0x1a6   :  { %v459_v20 = vmul.f32 %v1284_v18, %v1651_v17  ;;  %v77_v18 = vsel %vm76_vm8, 1, %v1409_v12 }
 0x1a7   :  { %v444_v23 = vpop.f32.mrf.mxu1 }
 0x1a8   :  { %v461_v25 = vpack.c.bf16 %v459_v20, %v458_v19  ;;  %v457_v26 = vmul.f32 %v444_v23, %v1657_v22  ;;  %v1183_v19 = vld [vmem:[%s1844_s8] ss:$0 sm:$0xff]  ;;  %v811_v20 = vrot.slane %v77_v18, %v1565_v15 }
 0x1a9   :  { %vm807_vm2 = vcmp.eq.s32.totalorder %v1542_v5, %v1183_v19  ;;  %v1177_v5 = vld [vmem:[%s1848_s12] ss:$0 sm:$0xff] }
 0x1aa   :  { %v460_v27 = vpack.c.bf16 %v457_v26, %v456_v24  ;;  %1285 = vmatprep.subr.bf16.mxu0 %v461_v25  ;;  %vm812_vm3 = vcmp.eq.s32.totalorder %v811_v20, 1  ;;  %v1007_v19 = vld [vmem:[%s1854_s18] sm:$0xff]  ;;  %v1008_v20 = vld [vmem:[%s1854_s18 + $0x8] sm:$0xff] }
 0x1ab   :  { %1286 = vmatpush3.bf16.msra.mxu0 %v461_v25  ;;  %vm813_vm4 = vmand %vm807_vm2, %vm812_vm3 }
 0x1ac   :  { %1287 = vmatprep.subr.bf16.mxu0 %v460_v27  ;;  %v1728_v23 = vsel %vm813_vm4, 1.0, %v1411_v38 }
 0x1ad   :  { %v816_v24 = vsel %vm245_vm0, %v1728_v23, 0.0 }
 0x1ae   :  { %817 = vadd.xlane.f32.xlu0 %v816_v24 }
 0x1af   :  { %1288 = vmatpush3.bf16.msra.mxu0 %v460_v27 }
 0x1b2   :  { %1290 = vmatmul.mubr.msk.bf16.vlgmr.msra.gmra.mxu0 %vm245_vm0, %v1646_v1 }
 0x1b3   :  { %1305 = vmatprep.mubr.msk.bf16.mxu0 %vm245_vm0, %v270_v60 }
 0x272   :  { %v1291_v34 = vpop.f32.mrf.mxu0 }
 0x273   :  { %v519_v39 = vmul.f32 %v1291_v34, %v1649_v16 }
 0x274   :  { %v502_v36 = vpop.f32.mrf.mxu0 }
 0x275   :  { %v517_v37 = vmul.f32 %v502_v36, %v1655_v21  ;;  %v530_v47 = vadd.f32 %v1172_v41, %v519_v39 }
 0x276   :  { %v1292_v40 = vpop.f32.mrf.mxu0 }
 0x277   :  { %v520_v42 = vmul.f32 %v1292_v40, %v1651_v17  ;;  %v528_v44 = vadd.f32 %v1172_v41, %v517_v37  ;;  %v534_v52 = vmax.f32 %v530_v47, 0.0  ;;  %v898_v40 = vld [vmem:[%s1852_s16] sm:$0xff]  ;;  %v1010_v47 = vld [vmem:[%s1854_s18 + $0x18] sm:$0xff] }
 0x278   :  { %v505_v43 = vpop.f32.mrf.mxu0 }
 0x279   :  { %v531_v45 = vadd.f32 %v1172_v41, %v520_v42  ;;  %v518_v46 = vmul.f32 %v505_v43, %v1657_v22  ;;  %v532_v50 = vmax.f32 %v528_v44, 0.0  ;;  %v899_v42 = vld [vmem:[%s1852_s16 + $0x8] sm:$0xff]  ;;  %v896_v44 = vld [vmem:[%s1875_s7 + $0x20] sm:$0x3] }
 0x27a   :  { %v902_v43 = vpack.c.bf16 %v899_v42, %v898_v40 }
 0x27b   :  { %v529_v48 = vadd.f32 %v1172_v41, %v518_v46  ;;  %v535_v49 = vmax.f32 %v531_v45, 0.0  ;;  %v897_v45 = vpack.c.bf16 %v896_v44, %v896_v44  ;;  %v1009_v46 = vld [vmem:[%s1854_s18 + $0x10] sm:$0xff] }
 0x27d   :  { %v533_v51 = vmax.f32 %v529_v48, 0.0  ;;  %v537_v54 = vpack.c.bf16 %v535_v49, %v534_v52  ;;  %v1012_v48 = vpack.c.bf16 %v1010_v47, %v1009_v46  ;;  %v818_v49 = vpop.xlane.xlu0 %817 }
 0x27f   :  { %v536_v53 = vpack.c.bf16 %v533_v51, %v532_v50  ;;  %v819_v50 = vmax.f32 %v818_v49, 1.0 }
 0x281   :  { %1297 = vmatprep.mubr.msk.bf16.mxu1 %vm245_vm0, %v536_v53  ;;  %1381 = vrcp.f32 %v819_v50 }
 0x282   :  { %1298 = vmatmul.mubr.msk.bf16.vlgmr.msra.gmra.mxu1 %vm245_vm0, %v537_v54 }
 0x283   :  { %1310 = vmatpush3.bf16.msra.mxu1 %v686_v11  ;;  %v956_v11 = vld [vmem:[%s1853_s17] sm:$0xff] }
 0x28e   :  { %v1382_v0 = vpop.eup %1381 }
 0x342   :  { %v1299_v55 = vpop.f32.mrf.mxu1 }
 0x343   :  { %v601_v58 = vmul.f32 %v1299_v55, %v1649_v16 }
 0x344   :  { %v584_v56 = vpop.f32.mrf.mxu1 }
 0x345   :  { %v599_v61 = vmul.f32 %v584_v56, %v1655_v21 }
 0x346   :  { %v1300_v57 = vpop.f32.mrf.mxu1 }
 0x347   :  { %v602_v59 = vmul.f32 %v1300_v57, %v1651_v17 }
 0x348   :  { %v587_v60 = vpop.f32.mrf.mxu1 }
 0x349   :  { %v604_v62 = vpack.c.bf16 %v602_v59, %v601_v58  ;;  %v600_v63 = vmul.f32 %v587_v60, %v1657_v22  ;;  %v1182_v60 = vld [vmem:[%s1851_s15] ss:$0 sm:$0xff] }
 0x34b   :  { %v603_v3 = vpack.c.bf16 %v600_v63, %v599_v61  ;;  %1301 = vmatprep.subr.bf16.mxu0 %v604_v62 }
 0x34c   :  { %1302 = vmatpush3.bf16.msra.mxu0 %v604_v62 }
 0x34d   :  { %1303 = vmatprep.subr.bf16.mxu0 %v603_v3 }
 0x350   :  { %1304 = vmatpush3.bf16.msra.mxu0 %v603_v3 }
 0x351   :  { %1317 = vmatprep.subr.bf16.mxu0 %v678_v4 }
 0x353   :  { %1306 = vmatmul.mubr.msk.bf16.vlgmr.msra.gmra.mxu0 %vm245_vm0, %v1646_v1  ;;  %v681_v1 = vld [vmem:[%s1850_s14] sm:$0xff] }
 0x354   :  { %1318 = vmatpush3.bf16.msra.mxu0 %v678_v4  ;;  %1321 = vmatprep.mubr.msk.bf16.mxu0 %vm245_vm0, %v536_v53  ;;  %v685_v14 = vpack.c.bf16 %v682_v13, %v681_v1  ;;  %v958_v4 = vld [vmem:[%s1853_s17 + $0x10] sm:$0xff]  ;;  %v957_v1 = vld [vmem:[%s1853_s17 + $0x8] sm:$0xff] }
 0x355   :  { %1319 = vmatprep.subr.bf16.mxu0 %v677_v8  ;;  %v961_v10 = vpack.c.bf16 %v959_v6, %v958_v4  ;;  %v960_v13 = vpack.c.bf16 %v957_v1, %v956_v11 }
 0x356   :  { %1311 = vmatprep.subr.bf16.mxu1 %v685_v14 }
 0x357   :  { %1312 = vmatpush3.bf16.msra.mxu1 %v685_v14  ;;  %v954_v14 = vld [vmem:[%s1867_s29 + $0x20] sm:$0x3] }
 0x358   :  { %1320 = vmatpush3.bf16.msra.mxu0 %v677_v8  ;;  %1325 = vmatprep.subr.mxu1 %v1411_v38  ;;  %v821_v8 = vmul.f32 %v1382_v0, %v1728_v23  ;;  %v955_v18 = vpack.c.bf16 %v954_v14, %v954_v14  ;;  %v1011_v23 = vpack.c.bf16 %v1008_v20, %v1007_v19 }
 0x359   :  { %1336 = vmatprep.subr.bf16.mxu0 %v1411_v38 }
 0x35b   :  { %1322 = vmatmul.mubr.msk.bf16.vlgmr.msra.gmra.mxu0 %vm245_vm0, %v537_v54 }
 0x35c   :  { %1340 = vmatprep.mubr.msk.bf16.mxu0 %vm1412_vm5, %v1411_v38 }
 0x413   :  { %v1307_v25 = vpop.f32.mrf.mxu0 }
 0x414   :  { %v656_v26 = vmul.f32 %v1307_v25, %v1649_v16 }
 0x415   :  { %v639_v35 = vpop.f32.mrf.mxu0 }
 0x416   :  { %v654_v12 = vmul.f32 %v639_v35, %v1655_v21  ;;  %v667_v32 = vadd.f32 %v1177_v5, %v656_v26 }
 0x417   :  { %v1308_v27 = vpop.f32.mrf.mxu0 }
 0x418   :  { %v657_v15 = vmul.f32 %v1308_v27, %v1651_v17  ;;  %v665_v29 = vadd.f32 %v1177_v5, %v654_v12  ;;  %v671_v21 = vmax.f32 %v667_v32, 0.0  ;;  %v900_v17 = vld [vmem:[%s1852_s16 + $0x10] sm:$0xff] }
 0x419   :  { %v642_v28 = vpop.f32.mrf.mxu0 }
 0x41a   :  { %v668_v30 = vadd.f32 %v1177_v5, %v657_v15  ;;  %v655_v31 = vmul.f32 %v642_v28, %v1657_v22  ;;  %v669_v36 = vmax.f32 %v665_v29, 0.0  ;;  %v901_v22 = vld [vmem:[%s1852_s16 + $0x18] sm:$0xff]  ;;  %v1187_v15 = vld [vmem:[%s1855_s19] ss:$0 sm:$0xff] }
 0x41b   :  { %v903_v41 = vpack.c.bf16 %v901_v22, %v900_v17  ;;  %v1323_v51 = vpop.f32.mrf.mxu0 }
 0x41c   :  { %v666_v33 = vadd.f32 %v1177_v5, %v655_v31  ;;  %v672_v34 = vmax.f32 %v668_v30, 0.0 }
 0x41d   :  { %1337 = vmatpush3.bf16.msra.mxu0 %v903_v41  ;;  %v776_v52 = vpop.f32.mrf.mxu0 }
 0x41e   :  { %v670_v37 = vmax.f32 %v666_v33, 0.0  ;;  %v680_v16 = vpack.c.bf16 %v672_v34, %v671_v21  ;;  %1338 = vmatprep.subr.bf16.mxu0 %v1411_v38  ;;  %v1061_v34 = vld [vmem:[%s1856_s20 + $0x10] sm:$0xff]  ;;  %v1059_v21 = vld [vmem:[%s1856_s20] sm:$0xff] }
 0x41f   :  { %v1324_v54 = vpop.f32.mrf.mxu0 }
 0x420   :  { %v679_v39 = vpack.c.bf16 %v670_v37, %v669_v36  ;;  %v1062_v36 = vld [vmem:[%s1856_s20 + $0x18] sm:$0xff] }
 0x421   :  { %1339 = vmatpush3.bf16.msra.mxu0 %v902_v43  ;;  %v779_v59 = vpop.f32.mrf.mxu0  ;;  %v1064_v37 = vpack.c.bf16 %v1062_v36, %v1061_v34 }
 0x422   :  { %1313 = vmatprep.mubr.msk.bf16.mxu1 %vm245_vm0, %v679_v39  ;;  %1352 = vmatprep.subr.bf16.mxu0 %v1411_v38  ;;  %v1060_v39 = vld [vmem:[%s1856_s20 + $0x8] sm:$0xff]  ;;  %s1413_s20 = smov [#allocation2]  }
 0x423   :  { %1314 = vmatmul.mubr.msk.bf16.vlgmr.msra.gmra.mxu1 %vm245_vm0, %v680_v16  ;;  %v1063_v16 = vpack.c.bf16 %v1060_v39, %v1059_v21 }
 0x424   :  { %1333 = vmatprep.mubr.msk.f32.mxu1 %vm1412_vm5, %v1411_v38  ;;  %1341 = vmatmul.mubr.msk.bf16.vlgmr.msra.gmra.mxu0 %vm245_vm0, %v897_v45 }
 0x425   :  { %1353 = vmatpush3.bf16.msra.mxu0 %v1012_v48  ;;  %1356 = vmatprep.mubr.msk.bf16.mxu0 %vm1412_vm5, %v1411_v38 }
 0x426   :  { %1354 = vmatprep.subr.bf16.mxu0 %v1411_v38 }
 0x429   :  { %1355 = vmatpush3.bf16.msra.mxu0 %v1011_v23 }
 0x4e3   :  { %v1315_v53 = vpop.f32.mrf.mxu1 }
 0x4e4   :  { %v785_v57 = vadd.f32 %v1323_v51, %v1315_v53  ;;  %v941_v24 = vpop.f32.mrf.mxu0 }
 0x4e5   :  { %v727_v55 = vpop.f32.mrf.mxu1  ;;  %v953_v28 = vadd.f32 %v1187_v15, %v941_v24 }
 0x4e6   :  { %v800_v2 = vadd.f32 %v1182_v60, %v785_v57  ;;  %v777_v3 = vadd.f32 %v776_v52, %v727_v55  ;;  %v1342_v25 = vpop.f32.mrf.mxu0 }
 0x4e7   :  { %v1316_v56 = vpop.f32.mrf.mxu1 }
 0x4e8   :  { %v788_v58 = vadd.f32 %v1324_v54, %v1316_v56  ;;  %v798_v9 = vadd.f32 %v1182_v60, %v777_v3  ;;  %v944_v35 = vpop.f32.mrf.mxu0 }
 0x4e9   :  { %v730_v61 = vpop.f32.mrf.mxu1 }
 0x4ea   :  { %v801_v62 = vadd.f32 %v1182_v60, %v788_v58  ;;  %v780_v63 = vadd.f32 %v779_v59, %v730_v61  ;;  %v1343_v12 = vpop.f32.mrf.mxu0 }
 0x4ec   :  { %1326 = vmatpush3.msra.mxu1 %v801_v62  ;;  %v799_v7 = vadd.f32 %v1182_v60, %v780_v63 }
 0x4ed   :  { %1327 = vmatprep.subr.mxu1 %v1411_v38 }
 0x4ee   :  { %1328 = vmatpush3.msra.mxu1 %v800_v2 }
 0x4ef   :  { %1329 = vmatprep.subr.mxu1 %v1411_v38 }
 0x4f0   :  { %1330 = vmatpush3.msra.mxu1 %v799_v7 }
 0x4f1   :  { %1331 = vmatprep.subr.mxu1 %v1411_v38 }
 0x4f2   :  { %1332 = vmatpush3.msra.mxu1 %v798_v9 }
 0x4f3   :  { %1334 = vmatmul.mubr.msk.f32.vlgmr.msra.gmra.mxu1 %vm245_vm0, %v821_v8  ;;  %1344 = vmatprep.subr.bf16.mxu1 %v1411_v38 }
 0x4f4   :  { %1345 = vmatpush3.bf16.msra.mxu1 %v961_v10  ;;  %1348 = vmatprep.mubr.msk.bf16.mxu1 %vm1412_vm5, %v1411_v38 }
 0x4f5   :  { %1346 = vmatprep.subr.bf16.mxu1 %v1411_v38 }
 0x4f8   :  { %1347 = vmatpush3.bf16.msra.mxu1 %v960_v13 }
 0x4f9   :  { %1360 = vmatprep.subr.bf16.mxu1 %v1411_v38 }
 0x4fb   :  { %1349 = vmatmul.mubr.msk.bf16.vlgmr.msra.gmra.mxu1 %vm245_vm0, %v955_v18 }
 0x4fc   :  { %1364 = vmatprep.mubr.msk.bf16.mxu1 %vm1412_vm5, %v1411_v38  ;;  %1361 = vmatpush3.bf16.msra.mxu1 %v1064_v37 }
 0x4fd   :  { %1362 = vmatprep.subr.bf16.mxu1 %v1411_v38  ;;  %v1190_v38 = vld [vmem:[%s1857_s21] ss:$0 sm:$0xff]  ;;  %s1135_s21 = sshll.u32 %s1413_s20, 4  ;;  %s1136_s21 = int_to_ptr.vmem [resolvable:$true] %s1135_s21 }
 0x4fe   :  { %s1387_s16 = scalar_lea.vmem %s1136_s21, 32  ;;  %p1392_p1 = scmp.lt.s32.totalorder %s1136_s21, %s1136_s21 }
 0x4ff   :  { %p1388_p0 = scmp.ne.s32.totalorder %s1136_s21, %s1387_s16  ;;  %p1393_p2 = scmp.lt.s32.totalorder %s1387_s16, %s1387_s16 }
 0x500   :  { %1363 = vmatpush3.bf16.msra.mxu1 %v1063_v16 }
 0x501   :  { %p1394_p3 = por %p1393_p2, %p1392_p1 }
 0x503   :  { %p1395_p4 = pnand %p1394_p3, %p1388_p0 }
 0x5b3   :  { %v891_v26 = vpop.f32.mrf.mxu1 }
 0x5b4   :  { %v1006_v27 = vpack.c.bf16 %v891_v26, %v891_v26 }
 0x5b5   :  { %v1335_v5 = vpop.f32.mrf.mxu1 }
 0x5b6   :  { %1357 = vmatmul.mubr.msk.bf16.vlgmr.msra.gmra.mxu0 %vm245_vm0, %v1006_v27 }
 0x5bb   :  { %v999_v29 = vpop.f32.mrf.mxu1 }
 0x5bc   :  { %v1005_v30 = vadd.f32 %v999_v29, %v953_v28 }
 0x5bd   :  { %v1350_v31 = vpop.f32.mrf.mxu1 }
 0x5bf   :  { %v1002_v32 = vpop.f32.mrf.mxu1 }
 0x5c1   :  { %v1351_v33 = vpop.f32.mrf.mxu1 }
 0x676   :  { %v1050_v17 = vpop.f32.mrf.mxu0 }
 0x677   :  { %v1056_v22 = vadd.f32 %v1050_v17, %v1005_v30 }
 0x678   :  { %v1358_v40 = vpop.f32.mrf.mxu0 }
 0x679   :  { %v1057_v41 = vmax.f32 %v1056_v22, 0.0 }
 0x67a   :  { %v1053_v42 = vpop.f32.mrf.mxu0 }
 0x67b   :  { %v1058_v43 = vpack.c.bf16 %v1057_v41, %v1057_v41 }
 0x67c   :  { %v1359_v44 = vpop.f32.mrf.mxu0 }
 0x67d   :  { %1365 = vmatmul.mubr.msk.bf16.vlgmr.msra.gmra.mxu1 %vm245_vm0, %v1058_v43 }
 0x73d   :  { %v1109_v45 = vpop.f32.mrf.mxu1 }
 0x73e   :  { %v1110_v46 = vadd.f32 %v1190_v38, %v1109_v45 }
 0x73f   :  { %v1366_v47 = vpop.f32.mrf.mxu1 }
 0x740   :  { %v1116_v48 = vsel %vm1115_vm6, %v1110_v46, -inf }
 0x741   :  { %1117 = vmax.xlane.f32.xlu1 %v1116_v48  ;;  %v1112_v49 = vpop.f32.mrf.mxu1 }
 0x743   :  { %v1367_v50 = vpop.f32.mrf.mxu1 }
 0x7ca   :  { %v1118_v51 = vpop.xlane.xlu1 %1117 }
 0x7cb   :  { %v1119_v52 = vsub.f32 %v1110_v46, %v1118_v51 }
 0x7cd   :  { %v1120_v53 = vmul.f32 1.442695, %v1119_v52 }
 0x7cf   :  { %1383 = vpow2.f32 %v1120_v53 }
 0x7dc   :  { %v1384_v54 = vpop.eup %1383 }
 0x7dd   :  { %v1122_v55 = vsel %vm1115_vm6, %v1384_v54, 0.0 }
 0x7de   :  { %1123 = vadd.xlane.f32.xlu0 %v1122_v55 }
 0x867   :  { %v1124_v56 = vpop.xlane.xlu0 %1123 }
 0x868   :  { %1385 = vlog2.f32 %v1124_v56 }
 0x875   :  { %v1386_v57 = vpop.eup %1385 }
 0x876   :  { %v1126_v58 = vmul.f32 0.6931472, %v1386_v57 }
 0x878   :  { %v1127_v59 = vsub.f32 %v1119_v52, %v1126_v58 }
 0x87a   :  { %1128 = vst.msk [vmem:[#allocation2] sm:$0x3] %vm1115_vm6, %v1127_v59 }
 0x87b   :  { %1398 = shalt.err (!%p1395_p4)
}
 0x87c   :  { %1138 = dma.vmem_to_hbm [thread:$0]  %s1136_s21, 32, %s1858_s22, [#allocation3]  }
 0x87d   :  { %1407 = dma.done.wait [#allocation3], 32  }
 0x87e   :  { %1408 = vsyncadd [#allocation3], 4294967264 }
 0x87f   :  { %1142 = vsyncpa [#allocation3], 1 }

</bundles_post_ra>
